<compile_context>
chip_gen: v6e
topology: v6e:2x2x1
jax: 0.10.0
libtpu: 0.0.40
codegen_flags: <defaults>
</compile_context>

<pallas_src>
import functools

import jax
import jax.numpy as jnp
from jax.experimental import pallas as pl
from jax.experimental.pallas import tpu as pltpu

# ----------------------------- configuration --------------------------------
N = 2              # batch size
C_IN = 4           # input channels
H = W = 8          # spatial size -> M = H*W dense positions
M = H * W
C_FEAT = 32        # backbone feature channels
HID = 64           # projection MLP hidden width
FEAT_DIM = 128     # global embedding dim (matches queue dim 128)
DENSE_DIM = 128    # dense embedding dim (matches queue_dense dim 128)
QUEUE_K = 256      # queue size (must be divisible by batch size)
MOMENTUM = 0.999
TEMP = 0.07
# torch F.normalize clamps the norm at eps=1e-12; x * rsqrt(sum_sq + eps^2) matches
# it to float precision (differs only for exactly-zero vectors).
EPS = 1e-12
EPS2 = EPS * EPS


# ------------------------------ fused kernel --------------------------------
def densecl_fused_kernel(
        xq_ref, xk_ref,
        qcw_ref, qcb_ref, qf1w_ref, qf1b_ref, qf2w_ref, qf2b_ref,
        kcw_ref, kcb_ref, kf1w_ref, kf1b_ref, kf2w_ref, kf2b_ref,
        d1w_ref, d1b_ref, d2w_ref, d2b_ref,
        queue_ref, qdense_ref,
        qn_ref, kn_ref, logits_ref, dqn_ref, dkg_ref, dkmean_ref, loss_ref,
        *, n, m, temperature):
    """Whole DenseCL forward in VMEM (no grid, no intermediate HBM traffic)."""
    f32 = jnp.float32
    inv_t = 1.0 / temperature

    def l2n(x):  # F.normalize along the last axis (rsqrt -> EUP slot)
        return x * jax.lax.rsqrt(jnp.sum(x * x, axis=-1, keepdims=True) + EPS2)

    def encoder(x, cw, cb, f1w, f1b, f2w, f2b):
        # 1x1-conv backbone as a pixel-wise matmul + ReLU
        feat = jnp.maximum(jnp.dot(x, cw, preferred_element_type=f32) + cb, 0.0)   # (n*m, C)
        # global average pool: sublane mean per sample (XLU), no mask matmul
        pooled = jnp.mean(feat.reshape(n, m, feat.shape[-1]), axis=1)              # (n, C)
        h1 = jnp.maximum(jnp.dot(pooled, f1w, preferred_element_type=f32) + f1b, 0.0)
        g = jnp.dot(h1, f2w, preferred_element_type=f32) + f2b                     # (n, FEAT)
        return feat, g

    feat_q, q_raw = encoder(xq_ref[...], qcw_ref[...], qcb_ref[...],
                            qf1w_ref[...], qf1b_ref[...], qf2w_ref[...], qf2b_ref[...])
    feat_k, k_raw = encoder(xk_ref[...], kcw_ref[...], kcb_ref[...],
                            kf1w_ref[...], kf1b_ref[...], kf2w_ref[...], kf2b_ref[...])

    # Shared dense head (prodictor) applied to both branches at once (2*n*m rows
    # feeding the MXU instead of two half-sized matmuls).
    feat_all = jnp.concatenate([feat_q, feat_k], axis=0)                            # (2nm, C)
    d1 = jnp.maximum(jnp.dot(feat_all, d1w_ref[...], preferred_element_type=f32)
                     + d1b_ref[...], 0.0)
    dense_all = jnp.dot(d1, d2w_ref[...], preferred_element_type=f32) + d2b_ref[...]  # (2nm, D)
    dense_q = dense_all[:n * m]
    dense_k = dense_all[n * m:]

    # ---------------------------- global InfoNCE ----------------------------
    qn = l2n(q_raw)
    kn = l2n(k_raw)
    qn_ref[...] = qn
    kn_ref[...] = kn
    l_pos = jnp.sum(qn * kn, axis=1, keepdims=True) * inv_t                          # (n, 1)
    l_neg = jnp.dot(qn, queue_ref[...], preferred_element_type=f32) * inv_t          # (n, K)
    logits_ref[...] = jnp.concatenate([l_pos, l_neg], axis=1)                        # (n, 1+K)
    mx = jnp.maximum(jnp.max(l_neg, axis=1, keepdims=True), l_pos)
    lse = mx + jnp.log(jnp.exp(l_pos - mx)
                       + jnp.sum(jnp.exp(l_neg - mx), axis=1, keepdims=True))
    loss_cls = jnp.mean(lse - l_pos, keepdims=True)                                  # (1, 1)

    # -------------------- dense correspondence matching ---------------------
    fqn = l2n(feat_q).reshape(n, m, feat_q.shape[-1])                                # (n, m, C)
    fkn = l2n(feat_k).reshape(n, m, feat_k.shape[-1])
    cosine = jnp.einsum('nac,nbc->nab', fqn, fkn, preferred_element_type=f32)        # (n, m, m)
    cmax = jnp.max(cosine, axis=2, keepdims=True)
    col = jax.lax.broadcasted_iota(jnp.int32, cosine.shape, 2)
    # first-occurrence argmax along the key axis
    idx = jnp.min(jnp.where(cosine >= cmax, col, m), axis=2, keepdims=True)          # (n, m, 1)
    onehot = (col == idx).astype(f32)                                                # (n, m, m)

    dqn = l2n(dense_q)                                                               # (nm, D)
    dkn = l2n(dense_k).reshape(n, m, dense_k.shape[-1])                              # (n, m, D)
    dkg = jnp.einsum('nab,nbd->nad', onehot, dkn, preferred_element_type=f32)        # (n, m, D)
    dqn_ref[...] = dqn.reshape(n, m, dqn.shape[-1])
    dkg_ref[...] = dkg

    # ----------------------------- dense InfoNCE ----------------------------
    d_pos = jnp.sum(dqn * dkg.reshape(n * m, dqn.shape[-1]),
                    axis=1, keepdims=True) * inv_t                                   # (nm, 1)
    d_neg = jnp.dot(dqn, qdense_ref[...], preferred_element_type=f32) * inv_t        # (nm, K)
    dmx = jnp.maximum(jnp.max(d_neg, axis=1, keepdims=True), d_pos)
    dlse = dmx + jnp.log(jnp.exp(d_pos - dmx)
                         + jnp.sum(jnp.exp(d_neg - dmx), axis=1, keepdims=True))
    loss_dense = jnp.mean(dlse - d_pos, keepdims=True)                               # (1, 1)

    # enqueue keys: l2-normalized pixel-mean of the RAW dense_k (torch semantics)
    dkmean_ref[...] = l2n(jnp.mean(dense_k.reshape(n, m, dense_k.shape[-1]), axis=1))  # (n, D)

    loss_ref[...] = jnp.concatenate([loss_cls, loss_dense], axis=1)                  # (1, 2)


def densecl_fused_forward(params_q, params_k, head, queue, queue_dense, x_q, x_k):
    n, cin, h, w = x_q.shape
    m = h * w
    k = queue.shape[1]
    d = queue_dense.shape[0]
    xq_flat = jnp.transpose(x_q, (0, 2, 3, 1)).reshape(n * m, cin)
    xk_flat = jnp.transpose(x_k, (0, 2, 3, 1)).reshape(n * m, cin)
    kern = functools.partial(densecl_fused_kernel, n=n, m=m, temperature=TEMP)
    vmem = pl.BlockSpec(memory_space=pltpu.MemorySpace.VMEM)
    return pl.pallas_call(
        kern,
        out_shape=(
            jax.ShapeDtypeStruct((n, FEAT_DIM), jnp.float32),     # q  (normalized)
            jax.ShapeDtypeStruct((n, FEAT_DIM), jnp.float32),     # k  (normalized)
            jax.ShapeDtypeStruct((n, 1 + k), jnp.float32),        # logits (already / T)
            jax.ShapeDtypeStruct((n, m, d), jnp.float32),         # normalized dense_q
            jax.ShapeDtypeStruct((n, m, d), jnp.float32),         # gathered normalized dense_k
            jax.ShapeDtypeStruct((n, d), jnp.float32),            # keys for queue_dense enqueue
            jax.ShapeDtypeStruct((1, 2), jnp.float32),            # [loss_cls, loss_dense]
        ),
        in_specs=[vmem] * 20,
        out_specs=(vmem,) * 7,
    )(xq_flat, xk_flat,
      params_q["conv_w"], params_q["conv_b"], params_q["fc1_w"], params_q["fc1_b"],
      params_q["fc2_w"], params_q["fc2_b"],
      params_k["conv_w"], params_k["conv_b"], params_k["fc1_w"], params_k["fc1_b"],
      params_k["fc2_w"], params_k["fc2_b"],
      head["dh1_w"], head["dh1_b"], head["dh2_w"], head["dh2_b"],
      queue, queue_dense)


# --------------------------- model building blocks ---------------------------
# TODO(synk): the real backbone / projection_MLP / dense_Head live in an external
# `models` package; stood in here with a 1x1-conv backbone + 2-layer MLP projection
# + 2-layer dense head, which preserves the DenseCL forward-pass structure.
def init_params(key):
    ks = jax.random.split(key, 5)

    def wn(k, shape):
        return 0.1 * jax.random.normal(k, shape, jnp.float32)

    enc = {
        "conv_w": wn(ks[0], (C_IN, C_FEAT)), "conv_b": jnp.zeros((1, C_FEAT), jnp.float32),
        "fc1_w": wn(ks[1], (C_FEAT, HID)),   "fc1_b": jnp.zeros((1, HID), jnp.float32),
        "fc2_w": wn(ks[2], (HID, FEAT_DIM)), "fc2_b": jnp.zeros((1, FEAT_DIM), jnp.float32),
    }
    head = {
        "dh1_w": wn(ks[3], (C_FEAT, C_FEAT)),    "dh1_b": jnp.zeros((1, C_FEAT), jnp.float32),
        "dh2_w": wn(ks[4], (C_FEAT, DENSE_DIM)), "dh2_b": jnp.zeros((1, DENSE_DIM), jnp.float32),
    }
    return enc, head


def densecl_forward(params_q, params_k, head, queue, queue_dense, ptr, x_q, x_k):
    n = x_q.shape[0]

    # Momentum update of the key encoder (tiny elementwise; fused by XLA, in-place
    # via donation). The dense head ("prodictor") is shared between branches and is
    # NOT momentum-updated, exactly as in the reference torch module.
    params_k = jax.tree_util.tree_map(
        lambda pk, pq: MOMENTUM * pk + (1.0 - MOMENTUM) * pq, params_k, params_q)

    (qn, kn, logits, dqn, dkg, dk_enqueue, losses) = densecl_fused_forward(
        params_q, params_k, head, queue, queue_dense, x_q, x_k)

    labels = jnp.zeros((n,), jnp.int32)
    extra = {
        "qk": [qn, kn],
        # present dense embeddings in the torch (N, D, M) convention
        "dense_qk": [jnp.transpose(dqn, (0, 2, 1)), jnp.transpose(dkg, (0, 2, 1))],
        "logits": logits,
        "labels": labels,
    }

    # queue bookkeeping — in-place column writes thanks to donated buffers under jit
    queue = jax.lax.dynamic_update_slice(queue, kn.T, (0, ptr))
    queue_dense = jax.lax.dynamic_update_slice(queue_dense, dk_enqueue.T, (0, ptr))
    new_ptr = (ptr + n) % queue.shape[1]

    new_state = (params_k, queue, queue_dense, new_ptr)
    return losses[0, 0], losses[0, 1], extra, new_state


# Donate key-encoder params and both queues so the momentum + enqueue updates are
# in-place HBM writes instead of full-buffer copies.
densecl_step = jax.jit(densecl_forward, donate_argnums=(1, 3, 4))


# ----------------------------------- main ------------------------------------
if __name__ == "__main__":
    key = jax.random.PRNGKey(0)
    k_par, k_q1, k_q2, k_xq, k_xk = jax.random.split(key, 5)

    params_q, head = init_params(k_par)
    # key encoder starts as a copy of the query encoder (distinct buffers: donated)
    params_k = jax.tree_util.tree_map(jnp.copy, params_q)

    queue = jax.random.normal(k_q1, (FEAT_DIM, QUEUE_K), jnp.float32)
    queue = queue / jnp.maximum(jnp.linalg.norm(queue, axis=0, keepdims=True), EPS)
    queue_dense = jax.random.normal(k_q2, (DENSE_DIM, QUEUE_K), jnp.float32)
    queue_dense = queue_dense / jnp.maximum(
        jnp.linalg.norm(queue_dense, axis=0, keepdims=True), EPS)
    ptr = jnp.int32(0)

    x_q = jax.random.normal(k_xq, (N, C_IN, H, W), jnp.float32)
    x_k = jax.random.normal(k_xk, (N, C_IN, H, W), jnp.float32)

    loss_cls, loss_dense, extra, new_state = densecl_step(
        params_q, params_k, head, queue, queue_dense, ptr, x_q, x_k)
    jax.block_until_ready((loss_cls, loss_dense, extra, new_state))

    params_k_new, queue_new, queue_dense_new, ptr_new = new_state
    ok = (bool(jnp.isfinite(loss_cls)) and bool(jnp.isfinite(loss_dense))
          and extra["logits"].shape == (N, QUEUE_K + 1)
          and extra["qk"][0].shape == (N, FEAT_DIM)
          and extra["dense_qk"][0].shape == (N, DENSE_DIM, M)
          and extra["dense_qk"][1].shape == (N, DENSE_DIM, M)
          and queue_new.shape == (FEAT_DIM, QUEUE_K)
          and queue_dense_new.shape == (DENSE_DIM, QUEUE_K)
          and int(ptr_new) == N)
    if ok:
        print("KERNEL_OK")
</pallas_src>

<mosaic_0001>
module attributes {stable_mosaic.version = 11 : i64} {
  func.func @densecl_fused_kernel(%arg0: memref<128x4xf32, #tpu.memory_space<vmem>>, %arg1: memref<128x4xf32, #tpu.memory_space<vmem>>, %arg2: memref<4x32xf32, #tpu.memory_space<vmem>>, %arg3: memref<1x32xf32, #tpu.memory_space<vmem>>, %arg4: memref<32x64xf32, #tpu.memory_space<vmem>>, %arg5: memref<1x64xf32, #tpu.memory_space<vmem>>, %arg6: memref<64x128xf32, #tpu.memory_space<vmem>>, %arg7: memref<1x128xf32, #tpu.memory_space<vmem>>, %arg8: memref<4x32xf32, #tpu.memory_space<vmem>>, %arg9: memref<1x32xf32, #tpu.memory_space<vmem>>, %arg10: memref<32x64xf32, #tpu.memory_space<vmem>>, %arg11: memref<1x64xf32, #tpu.memory_space<vmem>>, %arg12: memref<64x128xf32, #tpu.memory_space<vmem>>, %arg13: memref<1x128xf32, #tpu.memory_space<vmem>>, %arg14: memref<32x32xf32, #tpu.memory_space<vmem>>, %arg15: memref<1x32xf32, #tpu.memory_space<vmem>>, %arg16: memref<32x128xf32, #tpu.memory_space<vmem>>, %arg17: memref<1x128xf32, #tpu.memory_space<vmem>>, %arg18: memref<128x256xf32, #tpu.memory_space<vmem>>, %arg19: memref<128x256xf32, #tpu.memory_space<vmem>>, %arg20: memref<2x128xf32, #tpu.memory_space<vmem>>, %arg21: memref<2x128xf32, #tpu.memory_space<vmem>>, %arg22: memref<2x257xf32, #tpu.memory_space<vmem>>, %arg23: memref<2x64x128xf32, #tpu.memory_space<vmem>>, %arg24: memref<2x64x128xf32, #tpu.memory_space<vmem>>, %arg25: memref<2x128xf32, #tpu.memory_space<vmem>>, %arg26: memref<1x2xf32, #tpu.memory_space<vmem>>) attributes {dimension_semantics = [], scalar_prefetch = 0 : i64, scratch_operands = 0 : i64, tpu.core_type = #tpu.core_type<tc>} {
    %c0 = arith.constant 0 : index
    %c0_0 = arith.constant 0 : index
    %0 = vector.load %arg0[%c0, %c0_0] : memref<128x4xf32, #tpu.memory_space<vmem>>, vector<128x4xf32>
    %c0_1 = arith.constant 0 : index
    %c0_2 = arith.constant 0 : index
    %1 = vector.load %arg2[%c0_1, %c0_2] : memref<4x32xf32, #tpu.memory_space<vmem>>, vector<4x32xf32>
    %c0_3 = arith.constant 0 : index
    %c0_4 = arith.constant 0 : index
    %2 = vector.load %arg3[%c0_3, %c0_4] : memref<1x32xf32, #tpu.memory_space<vmem>>, vector<1x32xf32>
    %c0_5 = arith.constant 0 : index
    %c0_6 = arith.constant 0 : index
    %3 = vector.load %arg4[%c0_5, %c0_6] : memref<32x64xf32, #tpu.memory_space<vmem>>, vector<32x64xf32>
    %c0_7 = arith.constant 0 : index
    %c0_8 = arith.constant 0 : index
    %4 = vector.load %arg5[%c0_7, %c0_8] : memref<1x64xf32, #tpu.memory_space<vmem>>, vector<1x64xf32>
    %c0_9 = arith.constant 0 : index
    %c0_10 = arith.constant 0 : index
    %5 = vector.load %arg6[%c0_9, %c0_10] : memref<64x128xf32, #tpu.memory_space<vmem>>, vector<64x128xf32>
    %c0_11 = arith.constant 0 : index
    %c0_12 = arith.constant 0 : index
    %6 = vector.load %arg7[%c0_11, %c0_12] : memref<1x128xf32, #tpu.memory_space<vmem>>, vector<1x128xf32>
    %cst = arith.constant dense<0.000000e+00> : vector<128x32xf32>
    %7 = tpu.matmul %0, %1, %cst {dimension_numbers = #tpu.dot_dimension_numbers<[1], [0], [0], [1], [0, 0, 1, 1], [], []>} : vector<128x4xf32>, vector<4x32xf32>, vector<128x32xf32> -> vector<128x32xf32>
    %8 = vector.broadcast %2 : vector<1x32xf32> to vector<128x32xf32>
    %9 = arith.addf %7, %8 : vector<128x32xf32>
    %cst_13 = arith.constant 0.000000e+00 : f32
    %10 = vector.broadcast %cst_13 : f32 to vector<128x32xf32>
    %11 = arith.maximumf %9, %10 : vector<128x32xf32>
    %12 = vector.shape_cast %11 : vector<128x32xf32> to vector<2x64x32xf32>
    %cst_14 = arith.constant dense<0.000000e+00> : vector<2x32xf32>
    %13 = vector.multi_reduction <add>, %12, %cst_14 [1] : vector<2x64x32xf32> to vector<2x32xf32>
    %cst_15 = arith.constant 6.400000e+01 : f32
    %14 = vector.broadcast %cst_15 : f32 to vector<2x32xf32>
    %15 = arith.divf %13, %14 : vector<2x32xf32>
    %cst_16 = arith.constant dense<0.000000e+00> : vector<2x64xf32>
    %16 = tpu.matmul %15, %3, %cst_16 {dimension_numbers = #tpu.dot_dimension_numbers<[1], [0], [0], [1], [0, 0, 1, 1], [], []>} : vector<2x32xf32>, vector<32x64xf32>, vector<2x64xf32> -> vector<2x64xf32>
    %17 = vector.broadcast %4 : vector<1x64xf32> to vector<2x64xf32>
    %18 = arith.addf %16, %17 : vector<2x64xf32>
    %cst_17 = arith.constant 0.000000e+00 : f32
    %19 = vector.broadcast %cst_17 : f32 to vector<2x64xf32>
    %20 = arith.maximumf %18, %19 : vector<2x64xf32>
    %cst_18 = arith.constant dense<0.000000e+00> : vector<2x128xf32>
    %21 = tpu.matmul %20, %5, %cst_18 {dimension_numbers = #tpu.dot_dimension_numbers<[1], [0], [0], [1], [0, 0, 1, 1], [], []>} : vector<2x64xf32>, vector<64x128xf32>, vector<2x128xf32> -> vector<2x128xf32>
    %22 = vector.broadcast %6 : vector<1x128xf32> to vector<2x128xf32>
    %23 = arith.addf %21, %22 : vector<2x128xf32>
    %c0_19 = arith.constant 0 : index
    %c0_20 = arith.constant 0 : index
    %24 = vector.load %arg1[%c0_19, %c0_20] : memref<128x4xf32, #tpu.memory_space<vmem>>, vector<128x4xf32>
    %c0_21 = arith.constant 0 : index
    %c0_22 = arith.constant 0 : index
    %25 = vector.load %arg8[%c0_21, %c0_22] : memref<4x32xf32, #tpu.memory_space<vmem>>, vector<4x32xf32>
    %c0_23 = arith.constant 0 : index
    %c0_24 = arith.constant 0 : index
    %26 = vector.load %arg9[%c0_23, %c0_24] : memref<1x32xf32, #tpu.memory_space<vmem>>, vector<1x32xf32>
    %c0_25 = arith.constant 0 : index
    %c0_26 = arith.constant 0 : index
    %27 = vector.load %arg10[%c0_25, %c0_26] : memref<32x64xf32, #tpu.memory_space<vmem>>, vector<32x64xf32>
    %c0_27 = arith.constant 0 : index
    %c0_28 = arith.constant 0 : index
    %28 = vector.load %arg11[%c0_27, %c0_28] : memref<1x64xf32, #tpu.memory_space<vmem>>, vector<1x64xf32>
    %c0_29 = arith.constant 0 : index
    %c0_30 = arith.constant 0 : index
    %29 = vector.load %arg12[%c0_29, %c0_30] : memref<64x128xf32, #tpu.memory_space<vmem>>, vector<64x128xf32>
    %c0_31 = arith.constant 0 : index
    %c0_32 = arith.constant 0 : index
    %30 = vector.load %arg13[%c0_31, %c0_32] : memref<1x128xf32, #tpu.memory_space<vmem>>, vector<1x128xf32>
    %cst_33 = arith.constant dense<0.000000e+00> : vector<128x32xf32>
    %31 = tpu.matmul %24, %25, %cst_33 {dimension_numbers = #tpu.dot_dimension_numbers<[1], [0], [0], [1], [0, 0, 1, 1], [], []>} : vector<128x4xf32>, vector<4x32xf32>, vector<128x32xf32> -> vector<128x32xf32>
    %32 = vector.broadcast %26 : vector<1x32xf32> to vector<128x32xf32>
    %33 = arith.addf %31, %32 : vector<128x32xf32>
    %cst_34 = arith.constant 0.000000e+00 : f32
    %34 = vector.broadcast %cst_34 : f32 to vector<128x32xf32>
    %35 = arith.maximumf %33, %34 : vector<128x32xf32>
    %36 = vector.shape_cast %35 : vector<128x32xf32> to vector<2x64x32xf32>
    %cst_35 = arith.constant dense<0.000000e+00> : vector<2x32xf32>
    %37 = vector.multi_reduction <add>, %36, %cst_35 [1] : vector<2x64x32xf32> to vector<2x32xf32>
    %cst_36 = arith.constant 6.400000e+01 : f32
    %38 = vector.broadcast %cst_36 : f32 to vector<2x32xf32>
    %39 = arith.divf %37, %38 : vector<2x32xf32>
    %cst_37 = arith.constant dense<0.000000e+00> : vector<2x64xf32>
    %40 = tpu.matmul %39, %27, %cst_37 {dimension_numbers = #tpu.dot_dimension_numbers<[1], [0], [0], [1], [0, 0, 1, 1], [], []>} : vector<2x32xf32>, vector<32x64xf32>, vector<2x64xf32> -> vector<2x64xf32>
    %41 = vector.broadcast %28 : vector<1x64xf32> to vector<2x64xf32>
    %42 = arith.addf %40, %41 : vector<2x64xf32>
    %cst_38 = arith.constant 0.000000e+00 : f32
    %43 = vector.broadcast %cst_38 : f32 to vector<2x64xf32>
    %44 = arith.maximumf %42, %43 : vector<2x64xf32>
    %cst_39 = arith.constant dense<0.000000e+00> : vector<2x128xf32>
    %45 = tpu.matmul %44, %29, %cst_39 {dimension_numbers = #tpu.dot_dimension_numbers<[1], [0], [0], [1], [0, 0, 1, 1], [], []>} : vector<2x64xf32>, vector<64x128xf32>, vector<2x128xf32> -> vector<2x128xf32>
    %46 = vector.broadcast %30 : vector<1x128xf32> to vector<2x128xf32>
    %47 = arith.addf %45, %46 : vector<2x128xf32>
    %48 = tpu.concatenate %11, %35 in 0 : vector<128x32xf32>, vector<128x32xf32> -> vector<256x32xf32>
    %c0_40 = arith.constant 0 : index
    %c0_41 = arith.constant 0 : index
    %49 = vector.load %arg14[%c0_40, %c0_41] : memref<32x32xf32, #tpu.memory_space<vmem>>, vector<32x32xf32>
    %cst_42 = arith.constant dense<0.000000e+00> : vector<256x32xf32>
    %50 = tpu.matmul %48, %49, %cst_42 {dimension_numbers = #tpu.dot_dimension_numbers<[1], [0], [0], [1], [0, 0, 1, 1], [], []>} : vector<256x32xf32>, vector<32x32xf32>, vector<256x32xf32> -> vector<256x32xf32>
    %c0_43 = arith.constant 0 : index
    %c0_44 = arith.constant 0 : index
    %51 = vector.load %arg15[%c0_43, %c0_44] : memref<1x32xf32, #tpu.memory_space<vmem>>, vector<1x32xf32>
    %52 = vector.broadcast %51 : vector<1x32xf32> to vector<256x32xf32>
    %53 = arith.addf %50, %52 : vector<256x32xf32>
    %cst_45 = arith.constant 0.000000e+00 : f32
    %54 = vector.broadcast %cst_45 : f32 to vector<256x32xf32>
    %55 = arith.maximumf %53, %54 : vector<256x32xf32>
    %c0_46 = arith.constant 0 : index
    %c0_47 = arith.constant 0 : index
    %56 = vector.load %arg16[%c0_46, %c0_47] : memref<32x128xf32, #tpu.memory_space<vmem>>, vector<32x128xf32>
    %cst_48 = arith.constant dense<0.000000e+00> : vector<256x128xf32>
    %57 = tpu.matmul %55, %56, %cst_48 {dimension_numbers = #tpu.dot_dimension_numbers<[1], [0], [0], [1], [0, 0, 1, 1], [], []>} : vector<256x32xf32>, vector<32x128xf32>, vector<256x128xf32> -> vector<256x128xf32>
    %c0_49 = arith.constant 0 : index
    %c0_50 = arith.constant 0 : index
    %58 = vector.load %arg17[%c0_49, %c0_50] : memref<1x128xf32, #tpu.memory_space<vmem>>, vector<1x128xf32>
    %59 = vector.broadcast %58 : vector<1x128xf32> to vector<256x128xf32>
    %60 = arith.addf %57, %59 : vector<256x128xf32>
    %61 = vector.extract_strided_slice %60 {offsets = [0, 0], sizes = [128, 128], strides = [1, 1]} : vector<256x128xf32> to vector<128x128xf32>
    %62 = vector.extract_strided_slice %60 {offsets = [128, 0], sizes = [128, 128], strides = [1, 1]} : vector<256x128xf32> to vector<128x128xf32>
    %63 = arith.mulf %23, %23 : vector<2x128xf32>
    %cst_51 = arith.constant dense<0.000000e+00> : vector<2xf32>
    %64 = vector.multi_reduction <add>, %63, %cst_51 [1] : vector<2x128xf32> to vector<2xf32>
    %65 = vector.shape_cast %64 : vector<2xf32> to vector<2x1xf32>
    %cst_52 = arith.constant 1.000000e-24 : f32
    %66 = vector.broadcast %cst_52 : f32 to vector<2x1xf32>
    %67 = arith.addf %65, %66 : vector<2x1xf32>
    %68 = math.rsqrt %67 : vector<2x1xf32>
    %69 = vector.broadcast %68 : vector<2x1xf32> to vector<2x128xf32>
    %70 = arith.mulf %23, %69 : vector<2x128xf32>
    %71 = arith.mulf %47, %47 : vector<2x128xf32>
    %cst_53 = arith.constant dense<0.000000e+00> : vector<2xf32>
    %72 = vector.multi_reduction <add>, %71, %cst_53 [1] : vector<2x128xf32> to vector<2xf32>
    %73 = vector.shape_cast %72 : vector<2xf32> to vector<2x1xf32>
    %cst_54 = arith.constant 1.000000e-24 : f32
    %74 = vector.broadcast %cst_54 : f32 to vector<2x1xf32>
    %75 = arith.addf %73, %74 : vector<2x1xf32>
    %76 = math.rsqrt %75 : vector<2x1xf32>
    %77 = vector.broadcast %76 : vector<2x1xf32> to vector<2x128xf32>
    %78 = arith.mulf %47, %77 : vector<2x128xf32>
    %c0_55 = arith.constant 0 : index
    %c0_56 = arith.constant 0 : index
    %79 = vector.load %arg20[%c0_55, %c0_56] : memref<2x128xf32, #tpu.memory_space<vmem>>, vector<2x128xf32>
    tpu.vector_store %arg20[%c0_55, %c0_56], %70 {strides = array<i32>} : memref<2x128xf32, #tpu.memory_space<vmem>>, vector<2x128xf32>,
    %c0_57 = arith.constant 0 : index
    %c0_58 = arith.constant 0 : index
    %80 = vector.load %arg21[%c0_57, %c0_58] : memref<2x128xf32, #tpu.memory_space<vmem>>, vector<2x128xf32>
    tpu.vector_store %arg21[%c0_57, %c0_58], %78 {strides = array<i32>} : memref<2x128xf32, #tpu.memory_space<vmem>>, vector<2x128xf32>,
    %81 = arith.mulf %70, %78 : vector<2x128xf32>
    %cst_59 = arith.constant dense<0.000000e+00> : vector<2xf32>
    %82 = vector.multi_reduction <add>, %81, %cst_59 [1] : vector<2x128xf32> to vector<2xf32>
    %83 = vector.shape_cast %82 : vector<2xf32> to vector<2x1xf32>
    %cst_60 = arith.constant 14.2857141 : f32
    %84 = vector.broadcast %cst_60 : f32 to vector<2x1xf32>
    %85 = arith.mulf %83, %84 : vector<2x1xf32>
    %c0_61 = arith.constant 0 : index
    %c0_62 = arith.constant 0 : index
    %86 = vector.load %arg18[%c0_61, %c0_62] : memref<128x256xf32, #tpu.memory_space<vmem>>, vector<128x256xf32>
    %cst_63 = arith.constant dense<0.000000e+00> : vector<2x256xf32>
    %87 = tpu.matmul %70, %86, %cst_63 {dimension_numbers = #tpu.dot_dimension_numbers<[1], [0], [0], [1], [0, 0, 1, 1], [], []>} : vector<2x128xf32>, vector<128x256xf32>, vector<2x256xf32> -> vector<2x256xf32>
    %cst_64 = arith.constant 14.2857141 : f32
    %88 = vector.broadcast %cst_64 : f32 to vector<2x256xf32>
    %89 = arith.mulf %87, %88 : vector<2x256xf32>
    %90 = tpu.concatenate %85, %89 in 1 : vector<2x1xf32>, vector<2x256xf32> -> vector<2x257xf32>
    %c0_65 = arith.constant 0 : index
    %c0_66 = arith.constant 0 : index
    %91 = vector.load %arg22[%c0_65, %c0_66] : memref<2x257xf32, #tpu.memory_space<vmem>>, vector<2x257xf32>
    tpu.vector_store %arg22[%c0_65, %c0_66], %90 {strides = array<i32>} : memref<2x257xf32, #tpu.memory_space<vmem>>, vector<2x257xf32>,
    %cst_67 = arith.constant dense<0xFF800000> : vector<2xf32>
    %92 = vector.multi_reduction <maximumf>, %89, %cst_67 [1] : vector<2x256xf32> to vector<2xf32>
    %93 = vector.shape_cast %92 : vector<2xf32> to vector<2x1xf32>
    %94 = arith.maximumf %93, %85 : vector<2x1xf32>
    %95 = arith.subf %85, %94 : vector<2x1xf32>
    %96 = math.exp %95 : vector<2x1xf32>
    %97 = vector.broadcast %94 : vector<2x1xf32> to vector<2x256xf32>
    %98 = arith.subf %89, %97 : vector<2x256xf32>
    %99 = math.exp %98 : vector<2x256xf32>
    %cst_68 = arith.constant dense<0.000000e+00> : vector<2xf32>
    %100 = vector.multi_reduction <add>, %99, %cst_68 [1] : vector<2x256xf32> to vector<2xf32>
    %101 = vector.shape_cast %100 : vector<2xf32> to vector<2x1xf32>
    %102 = arith.addf %96, %101 : vector<2x1xf32>
    %103 = math.log %102 : vector<2x1xf32>
    %104 = arith.addf %94, %103 : vector<2x1xf32>
    %105 = arith.subf %104, %85 : vector<2x1xf32>
    %106 = vector.shape_cast %105 : vector<2x1xf32> to vector<1x2x1xf32>
    %cst_69 = arith.constant dense<0.000000e+00> : vector<1xf32>
    %107 = vector.multi_reduction <add>, %106, %cst_69 [1, 2] : vector<1x2x1xf32> to vector<1xf32>
    %108 = vector.shape_cast %107 : vector<1xf32> to vector<1x1x1xf32>
    %109 = vector.extract %108[0, 0, 0] : f32 from vector<1x1x1xf32>
    %110 = vector.broadcast %109 : f32 to vector<1x1xf32>
    %cst_70 = arith.constant 2.000000e+00 : f32
    %111 = vector.broadcast %cst_70 : f32 to vector<1x1xf32>
    %112 = arith.divf %110, %111 : vector<1x1xf32>
    %113 = arith.mulf %11, %11 : vector<128x32xf32>
    %cst_71 = arith.constant dense<0.000000e+00> : vector<128xf32>
    %114 = vector.multi_reduction <add>, %113, %cst_71 [1] : vector<128x32xf32> to vector<128xf32>
    %115 = vector.shape_cast %114 : vector<128xf32> to vector<128x1xf32>
    %cst_72 = arith.constant 1.000000e-24 : f32
    %116 = vector.broadcast %cst_72 : f32 to vector<128x1xf32>
    %117 = arith.addf %115, %116 : vector<128x1xf32>
    %118 = math.rsqrt %117 : vector<128x1xf32>
    %119 = vector.broadcast %118 : vector<128x1xf32> to vector<128x32xf32>
    %120 = arith.mulf %11, %119 : vector<128x32xf32>
    %121 = vector.shape_cast %120 : vector<128x32xf32> to vector<2x64x32xf32>
    %122 = arith.mulf %35, %35 : vector<128x32xf32>
    %cst_73 = arith.constant dense<0.000000e+00> : vector<128xf32>
    %123 = vector.multi_reduction <add>, %122, %cst_73 [1] : vector<128x32xf32> to vector<128xf32>
    %124 = vector.shape_cast %123 : vector<128xf32> to vector<128x1xf32>
    %cst_74 = arith.constant 1.000000e-24 : f32
    %125 = vector.broadcast %cst_74 : f32 to vector<128x1xf32>
    %126 = arith.addf %124, %125 : vector<128x1xf32>
    %127 = math.rsqrt %126 : vector<128x1xf32>
    %128 = vector.broadcast %127 : vector<128x1xf32> to vector<128x32xf32>
    %129 = arith.mulf %35, %128 : vector<128x32xf32>
    %130 = vector.shape_cast %129 : vector<128x32xf32> to vector<2x64x32xf32>
    "tpu.trace_start"() <{level = 10 : i32, message = "nac,nbc->nab"}> : () -> ()
    %cst_75 = arith.constant dense<0.000000e+00> : vector<2x64x64xf32>
    %131 = tpu.matmul %121, %130, %cst_75 {dimension_numbers = #tpu.dot_dimension_numbers<[2], [2], [1], [1], [0, 0, 0, 1, 1, 1], [0], [0]>} : vector<2x64x32xf32>, vector<2x64x32xf32>, vector<2x64x64xf32> -> vector<2x64x64xf32>
    "tpu.trace_stop"() : () -> ()
    %cst_76 = arith.constant dense<0xFF800000> : vector<2x64xf32>
    %132 = vector.multi_reduction <maximumf>, %131, %cst_76 [2] : vector<2x64x64xf32> to vector<2x64xf32>
    %133 = vector.shape_cast %132 : vector<2x64xf32> to vector<2x64x1xf32>
    %134 = tpu.iota {dimensions = array<i32: 2>} : vector<2x64x64xi32>
    %135 = vector.broadcast %133 : vector<2x64x1xf32> to vector<2x64x64xf32>
    %136 = arith.cmpf oge, %131, %135 : vector<2x64x64xf32>
    %c64_i32 = arith.constant 64 : i32
    %137 = vector.broadcast %c64_i32 : i32 to vector<2x64x64xi32>
    %138 = arith.select %136, %134, %137 : vector<2x64x64xi1>, vector<2x64x64xi32>
    %cst_77 = arith.constant dense<2147483647> : vector<2x64xi32>
    %139 = vector.multi_reduction <minsi>, %138, %cst_77 [2] : vector<2x64x64xi32> to vector<2x64xi32>
    %140 = vector.shape_cast %139 : vector<2x64xi32> to vector<2x64x1xi32>
    %141 = vector.broadcast %140 : vector<2x64x1xi32> to vector<2x64x64xi32>
    %142 = arith.cmpi eq, %134, %141 : vector<2x64x64xi32>
    %143 = arith.extui %142 : vector<2x64x64xi1> to vector<2x64x64xi32>
    %144 = arith.sitofp %143 : vector<2x64x64xi32> to vector<2x64x64xf32>
    %145 = arith.mulf %61, %61 : vector<128x128xf32>
    %cst_78 = arith.constant dense<0.000000e+00> : vector<128xf32>
    %146 = vector.multi_reduction <add>, %145, %cst_78 [1] : vector<128x128xf32> to vector<128xf32>
    %147 = vector.shape_cast %146 : vector<128xf32> to vector<128x1xf32>
    %cst_79 = arith.constant 1.000000e-24 : f32
    %148 = vector.broadcast %cst_79 : f32 to vector<128x1xf32>
    %149 = arith.addf %147, %148 : vector<128x1xf32>
    %150 = math.rsqrt %149 : vector<128x1xf32>
    %151 = vector.broadcast %150 : vector<128x1xf32> to vector<128x128xf32>
    %152 = arith.mulf %61, %151 : vector<128x128xf32>
    %153 = arith.mulf %62, %62 : vector<128x128xf32>
    %cst_80 = arith.constant dense<0.000000e+00> : vector<128xf32>
    %154 = vector.multi_reduction <add>, %153, %cst_80 [1] : vector<128x128xf32> to vector<128xf32>
    %155 = vector.shape_cast %154 : vector<128xf32> to vector<128x1xf32>
    %cst_81 = arith.constant 1.000000e-24 : f32
    %156 = vector.broadcast %cst_81 : f32 to vector<128x1xf32>
    %157 = arith.addf %155, %156 : vector<128x1xf32>
    %158 = math.rsqrt %157 : vector<128x1xf32>
    %159 = vector.broadcast %158 : vector<128x1xf32> to vector<128x128xf32>
    %160 = arith.mulf %62, %159 : vector<128x128xf32>
    %161 = vector.shape_cast %160 : vector<128x128xf32> to vector<2x64x128xf32>
    "tpu.trace_start"() <{level = 10 : i32, message = "nab,nbd->nad"}> : () -> ()
    %cst_82 = arith.constant dense<0.000000e+00> : vector<2x64x128xf32>
    %162 = tpu.matmul %144, %161, %cst_82 {dimension_numbers = #tpu.dot_dimension_numbers<[2], [1], [1], [2], [0, 0, 0, 1, 1, 2], [0], [0]>} : vector<2x64x64xf32>, vector<2x64x128xf32>, vector<2x64x128xf32> -> vector<2x64x128xf32>
    "tpu.trace_stop"() : () -> ()
    %163 = vector.shape_cast %152 : vector<128x128xf32> to vector<2x64x128xf32>
    %c0_83 = arith.constant 0 : index
    %c0_84 = arith.constant 0 : index
    %c0_85 = arith.constant 0 : index
    %164 = vector.load %arg23[%c0_83, %c0_84, %c0_85] : memref<2x64x128xf32, #tpu.memory_space<vmem>>, vector<2x64x128xf32>
    tpu.vector_store %arg23[%c0_83, %c0_84, %c0_85], %163 {strides = array<i32>} : memref<2x64x128xf32, #tpu.memory_space<vmem>>, vector<2x64x128xf32>,
    %c0_86 = arith.constant 0 : index
    %c0_87 = arith.constant 0 : index
    %c0_88 = arith.constant 0 : index
    %165 = vector.load %arg24[%c0_86, %c0_87, %c0_88] : memref<2x64x128xf32, #tpu.memory_space<vmem>>, vector<2x64x128xf32>
    tpu.vector_store %arg24[%c0_86, %c0_87, %c0_88], %162 {strides = array<i32>} : memref<2x64x128xf32, #tpu.memory_space<vmem>>, vector<2x64x128xf32>,
    %166 = vector.shape_cast %162 : vector<2x64x128xf32> to vector<128x128xf32>
    %167 = arith.mulf %152, %166 : vector<128x128xf32>
    %cst_89 = arith.constant dense<0.000000e+00> : vector<128xf32>
    %168 = vector.multi_reduction <add>, %167, %cst_89 [1] : vector<128x128xf32> to vector<128xf32>
    %169 = vector.shape_cast %168 : vector<128xf32> to vector<128x1xf32>
    %cst_90 = arith.constant 14.2857141 : f32
    %170 = vector.broadcast %cst_90 : f32 to vector<128x1xf32>
    %171 = arith.mulf %169, %170 : vector<128x1xf32>
    %c0_91 = arith.constant 0 : index
    %c0_92 = arith.constant 0 : index
    %172 = vector.load %arg19[%c0_91, %c0_92] : memref<128x256xf32, #tpu.memory_space<vmem>>, vector<128x256xf32>
    %cst_93 = arith.constant dense<0.000000e+00> : vector<128x256xf32>
    %173 = tpu.matmul %152, %172, %cst_93 {dimension_numbers = #tpu.dot_dimension_numbers<[1], [0], [0], [1], [0, 0, 1, 1], [], []>} : vector<128x128xf32>, vector<128x256xf32>, vector<128x256xf32> -> vector<128x256xf32>
    %cst_94 = arith.constant 14.2857141 : f32
    %174 = vector.broadcast %cst_94 : f32 to vector<128x256xf32>
    %175 = arith.mulf %173, %174 : vector<128x256xf32>
    %cst_95 = arith.constant dense<0xFF800000> : vector<128xf32>
    %176 = vector.multi_reduction <maximumf>, %175, %cst_95 [1] : vector<128x256xf32> to vector<128xf32>
    %177 = vector.shape_cast %176 : vector<128xf32> to vector<128x1xf32>
    %178 = arith.maximumf %177, %171 : vector<128x1xf32>
    %179 = arith.subf %171, %178 : vector<128x1xf32>
    %180 = math.exp %179 : vector<128x1xf32>
    %181 = vector.broadcast %178 : vector<128x1xf32> to vector<128x256xf32>
    %182 = arith.subf %175, %181 : vector<128x256xf32>
    %183 = math.exp %182 : vector<128x256xf32>
    %cst_96 = arith.constant dense<0.000000e+00> : vector<128xf32>
    %184 = vector.multi_reduction <add>, %183, %cst_96 [1] : vector<128x256xf32> to vector<128xf32>
    %185 = vector.shape_cast %184 : vector<128xf32> to vector<128x1xf32>
    %186 = arith.addf %180, %185 : vector<128x1xf32>
    %187 = math.log %186 : vector<128x1xf32>
    %188 = arith.addf %178, %187 : vector<128x1xf32>
    %189 = arith.subf %188, %171 : vector<128x1xf32>
    %190 = vector.shape_cast %189 : vector<128x1xf32> to vector<1x128x1xf32>
    %cst_97 = arith.constant dense<0.000000e+00> : vector<1xf32>
    %191 = vector.multi_reduction <add>, %190, %cst_97 [1, 2] : vector<1x128x1xf32> to vector<1xf32>
    %192 = vector.shape_cast %191 : vector<1xf32> to vector<1x1x1xf32>
    %193 = vector.extract %192[0, 0, 0] : f32 from vector<1x1x1xf32>
    %194 = vector.broadcast %193 : f32 to vector<1x1xf32>
    %cst_98 = arith.constant 1.280000e+02 : f32
    %195 = vector.broadcast %cst_98 : f32 to vector<1x1xf32>
    %196 = arith.divf %194, %195 : vector<1x1xf32>
    %197 = vector.shape_cast %62 : vector<128x128xf32> to vector<2x64x128xf32>
    %cst_99 = arith.constant dense<0.000000e+00> : vector<2x128xf32>
    %198 = vector.multi_reduction <add>, %197, %cst_99 [1] : vector<2x64x128xf32> to vector<2x128xf32>
    %cst_100 = arith.constant 6.400000e+01 : f32
    %199 = vector.broadcast %cst_100 : f32 to vector<2x128xf32>
    %200 = arith.divf %198, %199 : vector<2x128xf32>
    %201 = arith.mulf %200, %200 : vector<2x128xf32>
    %cst_101 = arith.constant dense<0.000000e+00> : vector<2xf32>
    %202 = vector.multi_reduction <add>, %201, %cst_101 [1] : vector<2x128xf32> to vector<2xf32>
    %203 = vector.shape_cast %202 : vector<2xf32> to vector<2x1xf32>
    %cst_102 = arith.constant 1.000000e-24 : f32
    %204 = vector.broadcast %cst_102 : f32 to vector<2x1xf32>
    %205 = arith.addf %203, %204 : vector<2x1xf32>
    %206 = math.rsqrt %205 : vector<2x1xf32>
    %207 = vector.broadcast %206 : vector<2x1xf32> to vector<2x128xf32>
    %208 = arith.mulf %200, %207 : vector<2x128xf32>
    %c0_103 = arith.constant 0 : index
    %c0_104 = arith.constant 0 : index
    %209 = vector.load %arg25[%c0_103, %c0_104] : memref<2x128xf32, #tpu.memory_space<vmem>>, vector<2x128xf32>
    tpu.vector_store %arg25[%c0_103, %c0_104], %208 {strides = array<i32>} : memref<2x128xf32, #tpu.memory_space<vmem>>, vector<2x128xf32>,
    %210 = tpu.concatenate %112, %196 in 1 : vector<1x1xf32>, vector<1x1xf32> -> vector<1x2xf32>
    %c0_105 = arith.constant 0 : index
    %c0_106 = arith.constant 0 : index
    %211 = vector.load %arg26[%c0_105, %c0_106] : memref<1x2xf32, #tpu.memory_space<vmem>>, vector<1x2xf32>
    tpu.vector_store %arg26[%c0_105, %c0_106], %210 {strides = array<i32>} : memref<1x2xf32, #tpu.memory_space<vmem>>, vector<1x2xf32>,
    return
  }
}

</mosaic_0001>

<bundles_post_ra>
// kernel: densecl_forward.1
= control target key start
LH: loop header
LB: loop body
LE: loop exit
PB: predicated region body
PF: predicated region fallthrough
CT: control target
= control target key end

     0   :  { %s7575_s0 = inlined_call_operand.vmem [shape: f32[128,4], index: 0, kind: input, shape index: {}]   ;;  %s7576_s1 = inlined_call_operand.vmem [shape: f32[128,4], index: 1, kind: input, shape index: {}]   ;;  %s7577_s2 = inlined_call_operand.vmem [shape: f32[4,32], index: 2, kind: input, shape index: {}]   ;;  %s7578_s3 = inlined_call_operand.vmem [shape: f32[1,32], index: 3, kind: input, shape index: {}]   ;;  %s7579_s4 = inlined_call_operand.vmem [shape: f32[32,64], index: 4, kind: input, shape index: {}]   ;;  %s7580_s5 = inlined_call_operand.vmem [shape: f32[1,64], index: 5, kind: input, shape index: {}]   ;;  %s7581_s6 = inlined_call_operand.vmem [shape: f32[64,128], index: 6, kind: input, shape index: {}]   ;;  %s7582_s7 = inlined_call_operand.vmem [shape: f32[1,128], index: 7, kind: input, shape index: {}]   ;;  %s7583_s8 = inlined_call_operand.vmem [shape: f32[4,32], index: 8, kind: input, shape index: {}]   ;;  %s7584_s9 = inlined_call_operand.vmem [shape: f32[1,32], index: 9, kind: input, shape index: {}]   ;;  %s7585_s10 = inlined_call_operand.vmem [shape: f32[32,64], index: 10, kind: input, shape index: {}]   ;;  %s7586_s11 = inlined_call_operand.vmem [shape: f32[1,64], index: 11, kind: input, shape index: {}]   ;;  %s7587_s12 = inlined_call_operand.vmem [shape: f32[64,128], index: 12, kind: input, shape index: {}]   ;;  %s7588_s13 = inlined_call_operand.vmem [shape: f32[1,128], index: 13, kind: input, shape index: {}]   ;;  %s7589_s14 = inlined_call_operand.vmem [shape: f32[32,32], index: 14, kind: input, shape index: {}]   ;;  %s7590_s15 = inlined_call_operand.vmem [shape: f32[1,32], index: 15, kind: input, shape index: {}]   ;;  %s7591_s16 = inlined_call_operand.hbm [shape: f32[32,128], index: 16, kind: input, shape index: {}]   ;;  %s7592_s17 = inlined_call_operand.vmem [shape: f32[1,128], index: 17, kind: input, shape index: {}]   ;;  %s7593_s18 = inlined_call_operand.vmem [shape: f32[128,256], index: 18, kind: input, shape index: {}]   ;;  %s7594_s19 = inlined_call_operand.vmem [shape: f32[128,256], index: 19, kind: input, shape index: {}]   ;;  %s7595_s20 = inlined_call_operand.hbm [shape: f32[2,128], index: 20, kind: output, shape index: {0}]   ;;  %s7596_s21 = inlined_call_operand.vmem [shape: f32[2,128], index: 21, kind: output, shape index: {1}]   ;;  %s7597_s22 = inlined_call_operand.hbm [shape: f32[2,257], index: 22, kind: output, shape index: {2}]   ;;  %s7598_s23 = inlined_call_operand.hbm [shape: f32[2,64,128], index: 23, kind: output, shape index: {3}]   ;;  %s7599_s24 = inlined_call_operand.hbm [shape: f32[2,64,128], index: 24, kind: output, shape index: {4}]   ;;  %s7600_s25 = inlined_call_operand.vmem [shape: f32[2,128], index: 25, kind: output, shape index: {5}]   ;;  %s7601_s26 = inlined_call_operand.vmem [shape: f32[1,2], index: 26, kind: output, shape index: {6}]  }
   0x1   :  { %7646 = sst [smem:[#allocation45_spill]] %s7575_s0 }
   0x2   :  { %7647 = sst [smem:[#allocation46_spill]] %s7576_s1 }
   0x3   :  { %7648 = sst [smem:[#allocation47_spill]] %s7577_s2 }
   0x4   :  { %7649 = sst [smem:[#allocation48_spill]] %s7578_s3 }
   0x5   :  { %7650 = sst [smem:[#allocation49_spill]] %s7579_s4 }
   0x6   :  { %7651 = sst [smem:[#allocation50_spill]] %s7580_s5 }
   0x7   :  { %7652 = sst [smem:[#allocation51_spill]] %s7581_s6 }
   0x8   :  { %7653 = sst [smem:[#allocation52_spill]] %s7582_s7 }
   0x9   :  { %7654 = sst [smem:[#allocation53_spill]] %s7583_s8 }
   0xa   :  { %7655 = sst [smem:[#allocation54_spill]] %s7584_s9 }
   0xb   :  { %7656 = sst [smem:[#allocation55_spill]] %s7585_s10 }
   0xc   :  { %32 = vsyncpa [#allocation3], 0 }
   0xd   :  { %33 = vsyncpa [#allocation4], 0 }
   0xe   :  { %34 = vsyncpa [#allocation7], 0 }
   0xf   :  { %35 = vsyncpa [#allocation10], 0  ;;  %s5187_s27 = smov [#allocation2]  }
  0x10   :  { %s73_s3 = sshll.u32 %s5187_s27, 4  ;;  %s74_s3 = int_to_ptr.vmem [resolvable:$true] %s73_s3 }
  0x11   :  { %s5087_s7 = scalar_lea.vmem %s74_s3, 512  ;;  %p5092_p1 = scmp.lt.s32.totalorder %s74_s3, %s74_s3 }
  0x12   :  { %p5088_p0 = scmp.ne.s32.totalorder %s74_s3, %s5087_s7  ;;  %p5093_p2 = scmp.lt.s32.totalorder %s5087_s7, %s5087_s7 }
  0x14   :  { %p5094_p3 = por %p5093_p2, %p5092_p1 }
  0x16   :  { %p5095_p4 = pnand %p5094_p3, %p5088_p0 }
  0x18   :  { %5098 = shalt.err (!%p5095_p4)
}
  0x19   :  { %s5188_s28 = smov 128   ;;  %s5189_s8 = smov 8  }
  0x1a   :  { %79 = dma.hbm_to_vmem [thread:$0]  %s7591_s16, 512, %s74_s3, [#allocation3], %s5188_s28, %s5188_s28, %s5189_s8  }
  0x1b   :  { %5179 = dma.done.wait [#allocation3], 512  }
  0x1c   :  { %5180 = vsyncadd [#allocation3], 4294966784  ;;  %vm176_vm0 = vcmask 1043456   ;;  %vm127_vm1 = vcmask 31744   ;;  %s7657_s30 = sld [smem:[#allocation47_spill]]  ;;  %v7607_v18 = vmov 0.0  }
  0x1d   :  { %s7658_s10 = sld [smem:[#allocation45_spill]]  ;;  %vm5191_vm2 = vmmov 0   ;;  %vm341_vm3 = vcmask 261120   ;;  %vm395_vm4 = vcmask 1041409   ;;  %vm476_vm5 = vcmask 523264   ;;  %s5193_s16 = smov [#allocation5]  }
  0x1e   :  { %s7659_s4 = sld [smem:[#allocation49_spill]]  ;;  %vm1702_vm6 = vcmask 1041408   ;;  %s4010_s27 = sshll.u32 %s5193_s16, 4  ;;  %s4011_s27 = int_to_ptr.vmem [resolvable:$true] %s4010_s27 }
  0x1f   :  { %s7660_s1 = sld [smem:[#allocation48_spill]]  ;;  %s5099_s7 = scalar_lea.vmem %s4011_s27, 32 }
  0x20   :  { %s7661_s3 = sld [smem:[#allocation51_spill]]  ;;  %p5100_p5 = scmp.ne.s32.totalorder %s4011_s27, %s5099_s7 }
  0x21   :  { %s7662_s0 = sld [smem:[#allocation53_spill]]  ;;  %p5104_p6 = scmp.lt.s32.totalorder %s4011_s27, %s4011_s27 }
  0x22   :  { %v105_v0 = vld [vmem:[%s7657_s30] sm:$0xf]  ;;  %s7663_s30 = sld [smem:[#allocation50_spill]]  ;;  %p5105_p7 = scmp.lt.s32.totalorder %s5099_s7, %s5099_s7 }
  0x23   :  { %v89_v1 = vld [vmem:[%s7658_s10] sm:$0xff]  ;;  %v90_v2 = vld [vmem:[%s7658_s10 + $0x8] sm:$0xff]  ;;  %4448 = vmatprep.subr.msk.mxu0 %vm176_vm0, %v105_v0  ;;  %v91_v3 = vld [vmem:[%s7658_s10 + $0x10] sm:$0xff]  ;;  %4784 = vmatprep.subr.msk.mxu1 %vm176_vm0, %v105_v0  ;;  %s7664_s6 = sld [smem:[#allocation46_spill]] }
  0x24   :  { %4450 = vmatprep.mubr.msk.f32.mxu0 %vm127_vm1, %v89_v1  ;;  %4449 = vmatpush3.msk.msra.mxu0 %vm176_vm0, %v105_v0  ;;  %v92_v4 = vld [vmem:[%s7658_s10 + $0x18] sm:$0xff]  ;;  %v101_v5 = vld [vmem:[%s7658_s10 + $0x60] sm:$0xff]  ;;  %v102_v6 = vld [vmem:[%s7658_s10 + $0x68] sm:$0xff]  ;;  %p5106_p8 = por %p5105_p7, %p5104_p6 }
  0x25   :  { %4451 = vmatmul.mubr.msk.f32.vlgmr.msra.gmra.mxu0 %vm127_vm1, %v90_v2  ;;  %4785 = vmatpush3.msk.msra.mxu1 %vm176_vm0, %v105_v0  ;;  %v93_v7 = vld [vmem:[%s7658_s10 + $0x20] sm:$0xff]  ;;  %v103_v8 = vld [vmem:[%s7658_s10 + $0x70] sm:$0xff]  ;;  %v104_v9 = vld [vmem:[%s7658_s10 + $0x78] sm:$0xff] }
  0x26   :  { %4453 = vmatprep.mubr.msk.f32.mxu0 %vm127_vm1, %v91_v3  ;;  %4468 = vmatprep.mubr.msk.f32.mxu1 %vm127_vm1, %v101_v5  ;;  %v94_v10 = vld [vmem:[%s7658_s10 + $0x28] sm:$0xff]  ;;  %v95_v11 = vld [vmem:[%s7658_s10 + $0x30] sm:$0xff]  ;;  %v96_v12 = vld [vmem:[%s7658_s10 + $0x38] sm:$0xff]  ;;  %p5107_p9 = pnand %p5106_p8, %p5100_p5 }
  0x27   :  { %4469 = vmatmul.mubr.msk.f32.vlgmr.msra.gmra.mxu1 %vm127_vm1, %v102_v6  ;;  %v97_v13 = vld [vmem:[%s7658_s10 + $0x40] sm:$0xff]  ;;  %v98_v14 = vld [vmem:[%s7658_s10 + $0x48] sm:$0xff]  ;;  %v99_v15 = vld [vmem:[%s7658_s10 + $0x50] sm:$0xff]  ;;  %4474 = vmatprep.subr.mxu1 %v7607_v18 }
  0x28   :  { %4471 = vmatprep.mubr.msk.f32.mxu1 %vm127_vm1, %v103_v8  ;;  %v100_v16 = vld [vmem:[%s7658_s10 + $0x58] sm:$0xff]  ;;  %v109_v19 = vld [vmem:[%s7659_s4 + $0x10] sm:$0xff]  ;;  %4530 = vmatprep.subr.mxu0 %v7607_v18  ;;  %v108_v20 = vld [vmem:[%s7659_s4 + $0x8] sm:$0xff] }
  0x29   :  { %4454 = vmatmul.mubr.msk.f32.gmra.mxu0 %vm127_vm1, %v92_v4  ;;  %v110_v17 = vld [vmem:[%s7659_s4 + $0x18] sm:$0xff]  ;;  %v107_v21 = vld [vmem:[%s7659_s4] sm:$0xff] }
  0x2a   :  { %4456 = vmatprep.mubr.msk.f32.mxu0 %vm127_vm1, %v93_v7  ;;  %4475 = vmatpush3.msra.mxu1 %v110_v17  ;;  %v5435_v22 = vld [vmem:[%s7660_s1] ss:$0 sm:$0xff] }
  0x2b   :  { %4472 = vmatmul.mubr.msk.f32.gmra.mxu1 %vm127_vm1, %v104_v9  ;;  %4476 = vmatprep.subr.mxu1 %v7607_v18 }
  0x2c   :  { %4482 = vmatprep.mubr.msk.f32.mxu1 %vm5191_vm2, %v7607_v18  ;;  %4477 = vmatpush3.msra.mxu1 %v109_v19 }
  0x2d   :  { %4457 = vmatmul.mubr.msk.f32.gmra.mxu0 %vm127_vm1, %v94_v10  ;;  %4478 = vmatprep.subr.mxu1 %v7607_v18 }
  0x2e   :  { %4459 = vmatprep.mubr.msk.f32.mxu0 %vm127_vm1, %v95_v11  ;;  %4479 = vmatpush3.msra.mxu1 %v108_v20 }
  0x2f   :  { %4480 = vmatprep.subr.mxu1 %v7607_v18 }
  0x30   :  { %4481 = vmatpush3.msra.mxu1 %v107_v21 }
  0x31   :  { %4460 = vmatmul.mubr.msk.f32.gmra.mxu0 %vm127_vm1, %v96_v12  ;;  %4485 = vmatprep.subr.mxu1 %v7607_v18 }
  0x32   :  { %4462 = vmatprep.mubr.msk.f32.mxu0 %vm127_vm1, %v97_v13 }
  0x35   :  { %4463 = vmatmul.mubr.msk.f32.gmra.mxu0 %vm127_vm1, %v98_v14 }
  0x36   :  { %4465 = vmatprep.mubr.msk.f32.mxu0 %vm127_vm1, %v99_v15 }
  0x39   :  { %4466 = vmatmul.mubr.msk.f32.gmra.mxu0 %vm127_vm1, %v100_v16 }
  0x3a   :  { %4538 = vmatprep.mubr.msk.f32.mxu0 %vm5191_vm2, %v7607_v18 }
  0xe5   :  { %v4452_v23 = vpop.f32.mrf.mxu0 }
  0xe6   :  { %v252_v24 = vadd.f32 %v4452_v23, %v5435_v22 }
  0xe7   :  { %v246_v25 = vpop.f32.mrf.mxu0  ;;  %v4470_v45 = vpop.f32.mrf.mxu1 }
  0xe8   :  { %v247_v26 = vadd.f32 %v5435_v22, %v246_v25  ;;  %v5439_v28 = vmax.f32 %v252_v24, 0.0  ;;  %v312_v17 = vadd.f32 %v4470_v45, %v5435_v22 }
  0xe9   :  { %v4455_v27 = vpop.f32.mrf.mxu0  ;;  %v306_v56 = vpop.f32.mrf.mxu1 }
  0xea   :  { %v5441_v29 = vmax.f32 %v247_v26, 0.0  ;;  %v262_v30 = vadd.f32 %v4455_v27, %v5435_v22  ;;  %v343_v35 = vsel %vm341_vm3, %v5439_v28, 0.0  ;;  %v307_v11 = vadd.f32 %v5435_v22, %v306_v56 }
  0xeb   :  { %v256_v31 = vpop.f32.mrf.mxu0  ;;  %v4473_v3 = vpop.f32.mrf.mxu1  ;;  %v5502_v27 = vmax.f32 %v312_v17, 0.0  ;;  %v552_v17 = vld [vmem:[%s7664_s6 + $0x10] sm:$0xff] }
  0xec   :  { %v342_v32 = vsel %vm341_vm3, %v5441_v29, 0.0  ;;  %v257_v33 = vadd.f32 %v5435_v22, %v256_v31  ;;  %v5449_v36 = vmax.f32 %v262_v30, 0.0  ;;  %v5497_v21 = vmax.f32 %v307_v11, 0.0 }
  0xed   :  { %v4458_v34 = vpop.f32.mrf.mxu0  ;;  %v344_v39 = vadd.f32 %v343_v35, %v342_v32  ;;  %v316_v13 = vpop.f32.mrf.mxu1  ;;  %v322_v30 = vadd.f32 %v4473_v3, %v5435_v22  ;;  %v113_v3 = vld [vmem:[%s7661_s3 + $0x8] sm:$0xff] }
  0xee   :  { %v5451_v37 = vmax.f32 %v257_v33, 0.0  ;;  %v272_v38 = vadd.f32 %v4458_v34, %v5435_v22  ;;  %v347_v46 = vsel %vm341_vm3, %v5449_v36, 0.0  ;;  %v317_v23 = vadd.f32 %v5435_v22, %v316_v13  ;;  %v550_v13 = vld [vmem:[%s7664_s6] sm:$0xff] }
  0xef   :  { %v266_v40 = vpop.f32.mrf.mxu0  ;;  %v370_v32 = vsel %vm341_vm3, %v5497_v21, 0.0 }
  0xf0   :  { %v345_v41 = vsel %vm341_vm3, %v5451_v37, 0.0  ;;  %v267_v42 = vadd.f32 %v5435_v22, %v266_v40  ;;  %v5459_v47 = vmax.f32 %v272_v38, 0.0  ;;  %v5507_v33 = vmax.f32 %v317_v23, 0.0  ;;  %v555_v23 = vld [vmem:[%s7664_s6 + $0x28] sm:$0xff] }
  0xf1   :  { %v346_v43 = vadd.f32 %v345_v41, %v344_v39  ;;  %v4461_v44 = vpop.f32.mrf.mxu0  ;;  %v372_v38 = vsel %vm341_vm3, %v5502_v27, 0.0  ;;  %v5511_v39 = vmax.f32 %v322_v30, 0.0  ;;  %v559_v30 = vld [vmem:[%s7664_s6 + $0x48] sm:$0xff] }
  0xf2   :  { %v5461_v48 = vmax.f32 %v267_v42, 0.0  ;;  %v282_v52 = vadd.f32 %v4461_v44, %v5435_v22  ;;  %v351_v57 = vsel %vm341_vm3, %v5459_v47, 0.0  ;;  %v374_v41 = vsel %vm341_vm3, %v5507_v33, 0.0 }
  0xf3   :  { %v348_v49 = vadd.f32 %v347_v46, %v346_v43  ;;  %v276_v50 = vpop.f32.mrf.mxu0 }
  0xf4   :  { %v349_v51 = vsel %vm341_vm3, %v5461_v48, 0.0  ;;  %v277_v53 = vadd.f32 %v5435_v22, %v276_v50  ;;  %v5472_v62 = vmax.f32 %v282_v52, 0.0 }
  0xf5   :  { %v350_v54 = vadd.f32 %v349_v51, %v348_v49  ;;  %v4464_v55 = vpop.f32.mrf.mxu0 }
  0xf6   :  { %v5469_v58 = vmax.f32 %v277_v53, 0.0  ;;  %v292_v59 = vadd.f32 %v4464_v55, %v5435_v22  ;;  %v355_v8 = vsel %vm341_vm3, %v5472_v62, 0.0 }
  0xf7   :  { %v352_v60 = vadd.f32 %v351_v57, %v350_v54  ;;  %v286_v61 = vpop.f32.mrf.mxu0 }
  0xf8   :  { %v353_v63 = vsel %vm341_vm3, %v5469_v58, 0.0  ;;  %v287_v0 = vadd.f32 %v5435_v22, %v286_v61  ;;  %v5477_v4 = vmax.f32 %v292_v59, 0.0  ;;  %v119_v59 = vld [vmem:[%s7661_s3 + $0x38] sm:$0xff]  ;;  %v118_v61 = vld [vmem:[%s7661_s3 + $0x30] sm:$0xff] }
  0xf9   :  { %v354_v1 = vadd.f32 %v353_v63, %v352_v60  ;;  %v4467_v2 = vpop.f32.mrf.mxu0  ;;  %v117_v63 = vld [vmem:[%s7661_s3 + $0x28] sm:$0xff] }
  0xfa   :  { %v5479_v5 = vmax.f32 %v287_v0, 0.0  ;;  %v302_v6 = vadd.f32 %v4467_v2, %v5435_v22  ;;  %v364_v14 = vsel %vm341_vm3, %v5477_v4, 0.0  ;;  %v116_v0 = vld [vmem:[%s7661_s3 + $0x20] sm:$0xff]  ;;  %v114_v2 = vld [vmem:[%s7661_s3 + $0x10] sm:$0xff] }
  0xfb   :  { %v296_v7 = vpop.f32.mrf.mxu0  ;;  %v356_v12 = vadd.f32 %v355_v8, %v354_v1  ;;  %v115_v1 = vld [vmem:[%s7661_s3 + $0x18] sm:$0xff]  ;;  %v4094_v8 = vld [vmem:[%s7663_s30] ss:$0 sm:$0xff]  ;;  %s7667_s30 = sld [smem:[#allocation52_spill]] }
  0xfc   :  { %v363_v9 = vsel %vm341_vm3, %v5479_v5, 0.0  ;;  %v297_v10 = vadd.f32 %v5435_v22, %v296_v7  ;;  %v5490_v15 = vmax.f32 %v302_v6, 0.0  ;;  %v376_v22 = vsel %vm341_vm3, %v5511_v39, 0.0  ;;  %v112_v6 = vld [vmem:[%s7661_s3] sm:$0xff]  ;;  %s7665_s3 = sld [smem:[#allocation55_spill]] }
  0xfd   :  { %v365_v19 = vadd.f32 %v364_v14, %v363_v9  ;;  %v357_v24 = vrot.slane %v356_v12, 4  ;;  %v566_v7 = vld [vmem:[%s7662_s0] sm:$0xf]  ;;  %v551_v14 = vld [vmem:[%s7664_s6 + $0x8] sm:$0xff] }
  0xfe   :  { %v5492_v16 = vmax.f32 %v297_v10, 0.0  ;;  %v368_v26 = vsel %vm341_vm3, %v5490_v15, 0.0 }
  0xff   :  { %v358_v34 = vadd.f32 %v357_v24, %v356_v12  ;;  %v556_v24 = vld [vmem:[%s7664_s6 + $0x30] sm:$0xff] }
 0x100   :  { %v366_v20 = vsel %vm341_vm3, %v5492_v16, 0.0 }
 0x101   :  { %v367_v25 = vadd.f32 %v366_v20, %v365_v19  ;;  %v359_v42 = vrot.slane %v358_v34, 2  ;;  %v553_v19 = vld [vmem:[%s7664_s6 + $0x18] sm:$0xff]  ;;  %v554_v20 = vld [vmem:[%s7664_s6 + $0x20] sm:$0xff] }
 0x103   :  { %v369_v31 = vadd.f32 %v368_v26, %v367_v25  ;;  %v360_v46 = vadd.f32 %v359_v42, %v358_v34  ;;  %v557_v25 = vld [vmem:[%s7664_s6 + $0x38] sm:$0xff]  ;;  %v558_v26 = vld [vmem:[%s7664_s6 + $0x40] sm:$0xff]  ;;  %v5635_v42 = vld [vmem:[%s7589_s14 + $0x10] sm:$0xff] }
 0x104   :  { %v562_v34 = vld [vmem:[%s7664_s6 + $0x60] sm:$0xff] }
 0x105   :  { %v371_v35 = vadd.f32 %v370_v32, %v369_v31  ;;  %v361_v51 = vrot.slane %v360_v46, 1  ;;  %v560_v31 = vld [vmem:[%s7664_s6 + $0x50] sm:$0xff]  ;;  %v561_v32 = vld [vmem:[%s7664_s6 + $0x58] sm:$0xff] }
 0x107   :  { %v373_v40 = vadd.f32 %v372_v38, %v371_v35  ;;  %v362_v53 = vadd.f32 %v361_v51, %v360_v46  ;;  %v563_v35 = vld [vmem:[%s7664_s6 + $0x68] sm:$0xff]  ;;  %v564_v38 = vld [vmem:[%s7664_s6 + $0x70] sm:$0xff] }
 0x108   :  { %v569_v46 = vld [vmem:[%s7665_s3 + $0x8] sm:$0xff] }
 0x109   :  { %v375_v43 = vadd.f32 %v374_v41, %v373_v40  ;;  %v385_v56 = vmul.f32 0.015625, %v362_v53  ;;  %v565_v40 = vld [vmem:[%s7664_s6 + $0x78] sm:$0xff]  ;;  %s7666_s6 = sld [smem:[#allocation54_spill]] }
 0x10a   :  { %v5628_v41 = vld [vmem:[%s7589_s14 + $0x18] sm:$0xff] }
 0x10b   :  { %v377_v44 = vadd.f32 %v376_v22, %v375_v43  ;;  %v5642_v43 = vld [vmem:[%s7589_s14 + $0x8] sm:$0xff]  ;;  %v5649_v22 = vld [vmem:[%s7589_s14] sm:$0xff] }
 0x10d   :  { %v378_v45 = vrot.slane %v377_v44, 4 }
 0x10f   :  { %v379_v49 = vadd.f32 %v378_v45, %v377_v44  ;;  %v571_v44 = vld [vmem:[%s7665_s3 + $0x18] sm:$0xff]  ;;  %v570_v45 = vld [vmem:[%s7665_s3 + $0x10] sm:$0xff] }
 0x110   :  { %4531 = vmatpush3.msra.mxu0 %v571_v44 }
 0x111   :  { %v380_v50 = vrot.slane %v379_v49, 2  ;;  %4532 = vmatprep.subr.mxu0 %v7607_v18 }
 0x112   :  { %4533 = vmatpush3.msra.mxu0 %v570_v45 }
 0x113   :  { %v381_v52 = vadd.f32 %v380_v50, %v379_v49  ;;  %4534 = vmatprep.subr.mxu0 %v7607_v18  ;;  %v568_v49 = vld [vmem:[%s7665_s3] sm:$0xff] }
 0x114   :  { %4535 = vmatpush3.msra.mxu0 %v569_v46 }
 0x115   :  { %v382_v54 = vrot.slane %v381_v52, 1  ;;  %4536 = vmatprep.subr.mxu0 %v7607_v18 }
 0x116   :  { %4537 = vmatpush3.msra.mxu0 %v568_v49 }
 0x117   :  { %v383_v55 = vadd.f32 %v382_v54, %v381_v52  ;;  %4541 = vmatprep.subr.mxu0 %v7607_v18  ;;  %v5672_v52 = vld [vmem:[%s7666_s6] ss:$0 sm:$0xff] }
 0x119   :  { %v386_v57 = vmul.f32 0.015625, %v383_v55 }
 0x11b   :  { %v396_v60 = vsel %vm395_vm4, %v386_v57, %v385_v56 }
 0x11c   :  { %4483 = vmatmul.mubr.msk.f32.vlgmr.msra.gmra.mxu1 %vm341_vm3, %v396_v60 }
 0x11d   :  { %4486 = vmatpush3.msra.mxu1 %v119_v59  ;;  %4501 = vmatprep.mubr.msk.f32.mxu1 %vm5191_vm2, %v7607_v18 }
 0x11e   :  { %4487 = vmatprep.subr.mxu1 %v7607_v18 }
 0x11f   :  { %4488 = vmatpush3.msra.mxu1 %v118_v61 }
 0x120   :  { %4489 = vmatprep.subr.mxu1 %v7607_v18 }
 0x121   :  { %4490 = vmatpush3.msra.mxu1 %v117_v63 }
 0x122   :  { %4491 = vmatprep.subr.mxu1 %v7607_v18 }
 0x123   :  { %4492 = vmatpush3.msra.mxu1 %v116_v0 }
 0x124   :  { %4493 = vmatprep.subr.mxu1 %v7607_v18 }
 0x125   :  { %4494 = vmatpush3.msra.mxu1 %v115_v1 }
 0x126   :  { %4495 = vmatprep.subr.mxu1 %v7607_v18 }
 0x127   :  { %4496 = vmatpush3.msra.mxu1 %v114_v2 }
 0x128   :  { %4497 = vmatprep.subr.mxu1 %v7607_v18 }
 0x129   :  { %4498 = vmatpush3.msra.mxu1 %v113_v3 }
 0x12a   :  { %4499 = vmatprep.subr.mxu1 %v7607_v18 }
 0x12b   :  { %4500 = vmatpush3.msra.mxu1 %v112_v6 }
 0x12c   :  { %4504 = vmatprep.subr.msk.mxu1 %vm176_vm0, %v566_v7 }
 0x1dc   :  { %v465_v9 = vpop.f32.mrf.mxu1 }
 0x1dd   :  { %v466_v10 = vadd.f32 %v4094_v8, %v465_v9 }
 0x1de   :  { %v4484_v11 = vpop.f32.mrf.mxu1 }
 0x1df   :  { %v469_v12 = vmax.f32 %v466_v10, 0.0 }
 0x1e1   :  { %4502 = vmatmul.mubr.msk.f32.vlgmr.msra.gmra.mxu1 %vm476_vm5, %v469_v12 }
 0x1e2   :  { %4505 = vmatpush3.msk.msra.mxu1 %vm176_vm0, %v566_v7  ;;  %4506 = vmatprep.mubr.msk.f32.mxu1 %vm127_vm1, %v550_v13 }
 0x1e3   :  { %4786 = vmatprep.subr.mxu1 %v5628_v41 }
 0x1e5   :  { %4507 = vmatmul.mubr.msk.f32.vlgmr.msra.gmra.mxu1 %vm127_vm1, %v551_v14 }
 0x1e6   :  { %4509 = vmatprep.mubr.msk.f32.mxu1 %vm127_vm1, %v552_v17  ;;  %4790 = vmatpush3.msra.mxu1 %v5628_v41 }
 0x1e7   :  { %4787 = vmatprep.subr.mxu1 %v5635_v42 }
 0x1e8   :  { %4791 = vmatpush3.msra.mxu1 %v5635_v42 }
 0x1e9   :  { %4510 = vmatmul.mubr.msk.f32.gmra.mxu1 %vm127_vm1, %v553_v19  ;;  %4788 = vmatprep.subr.mxu1 %v5642_v43 }
 0x1ea   :  { %4512 = vmatprep.mubr.msk.f32.mxu1 %vm127_vm1, %v554_v20  ;;  %4792 = vmatpush3.msra.mxu1 %v5642_v43 }
 0x1eb   :  { %4789 = vmatprep.subr.mxu1 %v5649_v22 }
 0x1ec   :  { %4793 = vmatpush3.msra.mxu1 %v5649_v22 }
 0x1ed   :  { %4513 = vmatmul.mubr.msk.f32.gmra.mxu1 %vm127_vm1, %v555_v23 }
 0x1ee   :  { %4515 = vmatprep.mubr.msk.f32.mxu1 %vm127_vm1, %v556_v24 }
 0x1f1   :  { %4516 = vmatmul.mubr.msk.f32.gmra.mxu1 %vm127_vm1, %v557_v25 }
 0x1f2   :  { %4518 = vmatprep.mubr.msk.f32.mxu1 %vm127_vm1, %v558_v26 }
 0x1f5   :  { %4519 = vmatmul.mubr.msk.f32.gmra.mxu1 %vm127_vm1, %v559_v30 }
 0x1f6   :  { %4521 = vmatprep.mubr.msk.f32.mxu1 %vm127_vm1, %v560_v31 }
 0x1f9   :  { %4522 = vmatmul.mubr.msk.f32.gmra.mxu1 %vm127_vm1, %v561_v32  ;;  %v4096_v32 = vld [vmem:[%s7667_s30] ss:$0 sm:$0xff] }
 0x1fa   :  { %4524 = vmatprep.mubr.msk.f32.mxu1 %vm127_vm1, %v562_v34 }
 0x1fd   :  { %4525 = vmatmul.mubr.msk.f32.gmra.mxu1 %vm127_vm1, %v563_v35 }
 0x1fe   :  { %4527 = vmatprep.mubr.msk.f32.mxu1 %vm127_vm1, %v564_v38 }
 0x201   :  { %4528 = vmatmul.mubr.msk.f32.gmra.mxu1 %vm127_vm1, %v565_v40 }
 0x2a1   :  { %v546_v50 = vpop.f32.mrf.mxu1 }
 0x2a3   :  { %v4503_v51 = vpop.f32.mrf.mxu1 }
 0x2a5   :  { %v4508_v53 = vpop.f32.mrf.mxu1 }
 0x2a6   :  { %v711_v54 = vadd.f32 %v4508_v53, %v5672_v52 }
 0x2a7   :  { %v705_v55 = vpop.f32.mrf.mxu1 }
 0x2a8   :  { %v706_v56 = vadd.f32 %v5672_v52, %v705_v55  ;;  %v5676_v59 = vmax.f32 %v711_v54, 0.0  ;;  %v5736_v55 = vadd.f32 %v4096_v32, %v546_v50 }
 0x2a9   :  { %v4511_v57 = vpop.f32.mrf.mxu1 }
 0x2aa   :  { %v5678_v60 = vmax.f32 %v706_v56, 0.0  ;;  %v721_v61 = vadd.f32 %v4511_v57, %v5672_v52  ;;  %v801_v6 = vsel %vm341_vm3, %v5676_v59, 0.0 }
 0x2ab   :  { %v715_v63 = vpop.f32.mrf.mxu1 }
 0x2ac   :  { %v800_v0 = vsel %vm341_vm3, %v5678_v60, 0.0  ;;  %v5683_v1 = vmax.f32 %v721_v61, 0.0  ;;  %v716_v2 = vadd.f32 %v5672_v52, %v715_v63  ;;  %4592 = vmatprep.mubr.msk.f32.mxu1 %vm341_vm3, %v5678_v60 }
 0x2ad   :  { %v4514_v3 = vpop.f32.mrf.mxu1  ;;  %4593 = vmatmul.mubr.msk.f32.vlgmr.msra.gmra.mxu1 %vm341_vm3, %v5676_v59  ;;  %v802_v10 = vadd.f32 %v801_v6, %v800_v0 }
 0x2ae   :  { %v5692_v7 = vmax.f32 %v716_v2, 0.0  ;;  %v731_v8 = vadd.f32 %v4514_v3, %v5672_v52  ;;  %v2015_v9 = vmul.f32 %v5683_v1, %v5683_v1  ;;  %v805_v23 = vsel %vm341_vm3, %v5683_v1, 0.0 }
 0x2af   :  { %v725_v11 = vpop.f32.mrf.mxu1 }
 0x2b0   :  { %v803_v12 = vsel %vm341_vm3, %v5692_v7, 0.0  ;;  %v5699_v13 = vmax.f32 %v731_v8, 0.0  ;;  %v726_v14 = vadd.f32 %v5672_v52, %v725_v11  ;;  %4595 = vmatprep.mubr.msk.f32.mxu1 %vm341_vm3, %v5692_v7  ;;  %v2037_v17 = vsel %vm341_vm3, %v2015_v9, 0.0 }
 0x2b1   :  { %v804_v19 = vadd.f32 %v803_v12, %v802_v10  ;;  %2038 = vadd.xlane.f32.xlu0 %v2037_v17  ;;  %v4517_v20 = vpop.f32.mrf.mxu1  ;;  %4596 = vmatmul.mubr.msk.f32.gmra.mxu1 %vm341_vm3, %v5683_v1  ;;  %v2014_v61 = vmul.f32 %v5692_v7, %v5692_v7  ;;  %v1701_v17 = vmul.f32 %v5736_v55, %v5736_v55 }
 0x2b2   :  { %v5709_v24 = vmax.f32 %v726_v14, 0.0  ;;  %v741_v25 = vadd.f32 %v4517_v20, %v5672_v52  ;;  %v2017_v26 = vmul.f32 %v5699_v13, %v5699_v13  ;;  %v809_v49 = vsel %vm341_vm3, %v5699_v13, 0.0 }
 0x2b3   :  { %v806_v30 = vadd.f32 %v805_v23, %v804_v19  ;;  %v735_v31 = vpop.f32.mrf.mxu1  ;;  %v2034_v14 = vsel %vm341_vm3, %v2014_v61, 0.0  ;;  %v2013_v19 = vmul.f32 %v5676_v59, %v5676_v59 }
 0x2b4   :  { %v807_v34 = vsel %vm341_vm3, %v5709_v24, 0.0  ;;  %v5719_v35 = vmax.f32 %v741_v25, 0.0  ;;  %v736_v38 = vadd.f32 %v5672_v52, %v735_v31  ;;  %4598 = vmatprep.mubr.msk.f32.mxu1 %vm341_vm3, %v5709_v24  ;;  %v2043_v40 = vsel %vm341_vm3, %v2017_v26, 0.0 }
 0x2b5   :  { %v808_v44 = vadd.f32 %v807_v34, %v806_v30  ;;  %2044 = vadd.xlane.f32.xlu1 %v2043_v40  ;;  %v4520_v45 = vpop.f32.mrf.mxu1  ;;  %4599 = vmatmul.mubr.msk.f32.gmra.mxu1 %vm341_vm3, %v5699_v13  ;;  %v2016_v46 = vmul.f32 %v5709_v24, %v5709_v24 }
 0x2b6   :  { %v5731_v51 = vmax.f32 %v736_v38, 0.0  ;;  %v751_v53 = vadd.f32 %v4520_v45, %v5672_v52  ;;  %v2019_v54 = vmul.f32 %v5719_v35, %v5719_v35  ;;  %v813_v20 = vsel %vm341_vm3, %v5719_v35, 0.0 }
 0x2b7   :  { %v810_v56 = vadd.f32 %v809_v49, %v808_v44  ;;  %v745_v57 = vpop.f32.mrf.mxu1  ;;  %v2040_v3 = vsel %vm341_vm3, %v2016_v46, 0.0  ;;  %v1703_v46 = vsel %vm1702_vm6, %v1701_v17, 0.0 }
 0x2b8   :  { %v811_v63 = vsel %vm341_vm3, %v5731_v51, 0.0  ;;  %v746_v0 = vadd.f32 %v5672_v52, %v745_v57  ;;  %4601 = vmatprep.mubr.msk.f32.mxu1 %vm341_vm3, %v5731_v51  ;;  %v2049_v2 = vsel %vm341_vm3, %v2019_v54, 0.0  ;;  %v2018_v8 = vmul.f32 %v5731_v51, %v5731_v51 }
 0x2b9   :  { %v812_v6 = vadd.f32 %v811_v63, %v810_v56  ;;  %2050 = vadd.xlane.f32.xlu0 %v2049_v2  ;;  %v4523_v50 = vpop.f32.mrf.mxu1  ;;  %2041 = vadd.xlane.f32.xlu1 %v2040_v3  ;;  %v5749_v9 = vmax.f32 %v751_v53, 0.0  ;;  %v2031_v56 = vsel %vm341_vm3, %v2013_v19, 0.0 }
 0x2ba   :  { %v5751_v10 = vmax.f32 %v746_v0, 0.0  ;;  %v761_v11 = vadd.f32 %v4523_v50, %v5672_v52  ;;  %4602 = vmatmul.mubr.msk.f32.gmra.mxu1 %vm341_vm3, %v5719_v35  ;;  %v2046_v26 = vsel %vm341_vm3, %v2018_v8, 0.0 }
 0x2bb   :  { %v755_v12 = vpop.f32.mrf.mxu1  ;;  %v814_v30 = vadd.f32 %v813_v20, %v812_v6  ;;  %v822_v32 = vsel %vm341_vm3, %v5749_v9, 0.0 }
 0x2bc   :  { %v821_v23 = vsel %vm341_vm3, %v5751_v10, 0.0  ;;  %v756_v25 = vadd.f32 %v5672_v52, %v755_v12  ;;  %4604 = vmatprep.mubr.msk.f32.mxu1 %vm341_vm3, %v5751_v10  ;;  %v5771_v34 = vmax.f32 %v761_v11, 0.0 }
 0x2bd   :  { %v4526_v31 = vpop.f32.mrf.mxu1  ;;  %2047 = vadd.xlane.f32.xlu0 %v2046_v26  ;;  %2035 = vadd.xlane.f32.xlu1 %v2034_v14  ;;  %v823_v44 = vadd.f32 %v822_v32, %v821_v23  ;;  %v815_v57 = vrot.slane %v814_v30, 4 }
 0x2be   :  { %v5773_v38 = vmax.f32 %v756_v25, 0.0  ;;  %v771_v40 = vadd.f32 %v4526_v31, %v5672_v52  ;;  %4605 = vmatmul.mubr.msk.f32.gmra.mxu1 %vm341_vm3, %v5749_v9  ;;  %v826_v0 = vsel %vm341_vm3, %v5771_v34, 0.0 }
 0x2bf   :  { %v765_v45 = vpop.f32.mrf.mxu1  ;;  %v816_v19 = vadd.f32 %v815_v57, %v814_v30  ;;  %v2012_v30 = vmul.f32 %v5678_v60, %v5678_v60 }
 0x2c0   :  { %v824_v49 = vsel %vm341_vm3, %v5773_v38, 0.0  ;;  %v5781_v53 = vmax.f32 %v771_v40, 0.0  ;;  %v766_v54 = vadd.f32 %v5672_v52, %v765_v45  ;;  %4607 = vmatprep.mubr.msk.f32.mxu1 %vm341_vm3, %v5773_v38 }
 0x2c1   :  { %v825_v61 = vadd.f32 %v824_v49, %v823_v44  ;;  %v4529_v63 = vpop.f32.mrf.mxu1  ;;  %1704 = vadd.xlane.f32.xlu0 %v1703_v46  ;;  %2032 = vadd.xlane.f32.xlu1 %v2031_v56  ;;  %v817_v46 = vrot.slane %v816_v19, 2 }
 0x2c2   :  { %v5789_v2 = vmax.f32 %v766_v54, 0.0  ;;  %v781_v3 = vadd.f32 %v4529_v63, %v5672_v52  ;;  %4608 = vmatmul.mubr.msk.f32.gmra.mxu1 %vm341_vm3, %v5771_v34  ;;  %v2025_v6 = vmul.f32 %v5781_v53, %v5781_v53  ;;  %v830_v25 = vsel %vm341_vm3, %v5781_v53, 0.0 }
 0x2c3   :  { %v827_v50 = vadd.f32 %v826_v0, %v825_v61  ;;  %v775_v8 = vpop.f32.mrf.mxu1  ;;  %v2028_v61 = vsel %vm341_vm3, %v2012_v30, 0.0  ;;  %v1901_v63 = vmul.f32 %v5439_v28, %v5439_v28  ;;  %v1900_v0 = vmul.f32 %v5441_v29, %v5441_v29 }
 0x2c4   :  { %v828_v11 = vsel %vm341_vm3, %v5789_v2, 0.0  ;;  %v5798_v12 = vmax.f32 %v781_v3, 0.0  ;;  %v776_v14 = vadd.f32 %v5672_v52, %v775_v8  ;;  %4610 = vmatprep.mubr.msk.f32.mxu1 %vm341_vm3, %v5789_v2  ;;  %v2067_v17 = vsel %vm341_vm3, %v2025_v6, 0.0 }
 0x2c5   :  { %v829_v20 = vadd.f32 %v828_v11, %v827_v50  ;;  %2068 = vadd.xlane.f32.xlu0 %v2067_v17  ;;  %v2024_v23 = vmul.f32 %v5789_v2, %v5789_v2  ;;  %v818_v6 = vadd.f32 %v817_v46, %v816_v19  ;;  %v1372_v50 = vld [vmem:[#allocation2 + $0x18] sm:$0xff]  ;;  %v1919_v11 = vsel %vm341_vm3, %v1901_v63, 0.0  ;;  %v1370_v19 = vld [vmem:[#allocation2 + $0x8] sm:$0xff] }
 0x2c6   :  { %v5808_v26 = vmax.f32 %v776_v14, 0.0  ;;  %4611 = vmatmul.mubr.msk.f32.gmra.mxu1 %vm341_vm3, %v5781_v53  ;;  %v2027_v52 = vmul.f32 %v5798_v12, %v5798_v12  ;;  %v834_v54 = vsel %vm341_vm3, %v5798_v12, 0.0  ;;  %4616 = vmatprep.subr.mxu1 %v1372_v50  ;;  %v1916_v14 = vsel %vm341_vm3, %v1900_v0, 0.0 }
 0x2c7   :  { %v831_v31 = vadd.f32 %v830_v25, %v829_v20  ;;  %v2064_v40 = vsel %vm341_vm3, %v2024_v23, 0.0  ;;  %v1902_v17 = vmul.f32 %v5451_v37, %v5451_v37  ;;  %v2023_v20 = vmul.f32 %v5771_v34, %v5771_v34  ;;  %4617 = vmatpush3.msra.mxu1 %v1372_v50  ;;  %v1371_v23 = vld [vmem:[#allocation2 + $0x10] sm:$0xff] }
 0x2c8   :  { %v832_v32 = vsel %vm341_vm3, %v5808_v26, 0.0  ;;  %4613 = vmatprep.mubr.msk.f32.mxu1 %vm341_vm3, %v5808_v26  ;;  %v2073_v44 = vsel %vm341_vm3, %v2027_v52, 0.0  ;;  %v2026_v45 = vmul.f32 %v5808_v26, %v5808_v26  ;;  %v819_v52 = vrot.slane %v818_v6, 1  ;;  %4618 = vmatprep.subr.mxu1 %v1371_v23 }
 0x2c9   :  { %v833_v49 = vadd.f32 %v832_v32, %v831_v31  ;;  %2065 = vadd.xlane.f32.xlu0 %v2064_v40  ;;  %2074 = vadd.xlane.f32.xlu1 %v2073_v44  ;;  %v1922_v30 = vsel %vm341_vm3, %v1902_v17, 0.0  ;;  %v2061_v32 = vsel %vm341_vm3, %v2023_v20, 0.0  ;;  %v2022_v40 = vmul.f32 %v5773_v38, %v5773_v38 }
 0x2ca   :  { %4614 = vmatmul.mubr.msk.f32.gmra.mxu1 %vm341_vm3, %v5798_v12  ;;  %v2070_v57 = vsel %vm341_vm3, %v2026_v45, 0.0  ;;  %v1903_v44 = vmul.f32 %v5449_v36, %v5449_v36  ;;  %v1369_v45 = vld [vmem:[#allocation2] sm:$0xff]  ;;  %v820_v46 = vadd.f32 %v819_v52, %v818_v6  ;;  %v1904_v63 = vmul.f32 %v5461_v48, %v5461_v48 }
 0x2cb   :  { %v835_v56 = vadd.f32 %v834_v54, %v833_v49  ;;  %4619 = vmatpush3.msra.mxu1 %v1371_v23  ;;  %v2020_v23 = vmul.f32 %v5751_v10, %v5751_v10 }
 0x2cc   :  { %4620 = vmatprep.subr.mxu1 %v1370_v19  ;;  %v842_v0 = vmul.f32 0.015625, %v820_v46 }
 0x2cd   :  { %v836_v3 = vrot.slane %v835_v56, 4  ;;  %2071 = vadd.xlane.f32.xlu0 %v2070_v57  ;;  %2029 = vadd.xlane.f32.xlu1 %v2028_v61  ;;  %v1925_v57 = vsel %vm341_vm3, %v1903_v44, 0.0  ;;  %v1905_v61 = vmul.f32 %v5459_v47, %v5459_v47  ;;  %v2052_v52 = vsel %vm341_vm3, %v2020_v23, 0.0  ;;  %v574_v23 = vld [vmem:[%s7587_s12 + $0x8] sm:$0xff] }
 0x2ce   :  { %4621 = vmatpush3.msra.mxu1 %v1370_v19  ;;  %v1911_v44 = vmul.f32 %v5490_v15, %v5490_v15 }
 0x2cf   :  { %v837_v8 = vadd.f32 %v836_v3, %v835_v56  ;;  %4622 = vmatprep.subr.mxu1 %v1369_v45  ;;  %v2058_v56 = vsel %vm341_vm3, %v2022_v40, 0.0  ;;  %v1931_v50 = vsel %vm341_vm3, %v1905_v61, 0.0 }
 0x2d0   :  { %4623 = vmatpush3.msra.mxu1 %v1369_v45  ;;  %v1910_v45 = vmul.f32 %v5492_v16, %v5492_v16  ;;  %v1949_v46 = vsel %vm341_vm3, %v1911_v44, 0.0 }
 0x2d1   :  { %v838_v25 = vrot.slane %v837_v8, 2  ;;  %1920 = vadd.xlane.f32.xlu0 %v1919_v11  ;;  %1917 = vadd.xlane.f32.xlu1 %v1916_v14  ;;  %v1906_v11 = vmul.f32 %v5469_v58, %v5469_v58  ;;  %v2021_v14 = vmul.f32 %v5749_v9, %v5749_v9 }
 0x2d3   :  { %v839_v31 = vadd.f32 %v838_v25, %v837_v8  ;;  %v1928_v8 = vsel %vm341_vm3, %v1904_v63, 0.0  ;;  %v1934_v17 = vsel %vm341_vm3, %v1906_v11, 0.0  ;;  %v2055_v20 = vsel %vm341_vm3, %v2021_v14, 0.0  ;;  %v578_v11 = vld [vmem:[%s7587_s12 + $0x28] sm:$0xff]  ;;  %v577_v14 = vld [vmem:[%s7587_s12 + $0x20] sm:$0xff] }
 0x2d4   :  { %v1907_v25 = vmul.f32 %v5472_v62, %v5472_v62  ;;  %v1915_v63 = vmul.f32 %v5511_v39, %v5511_v39 }
 0x2d5   :  { %1923 = vadd.xlane.f32.xlu0 %v1922_v30  ;;  %2062 = vadd.xlane.f32.xlu1 %v2061_v32  ;;  %v840_v49 = vrot.slane %v839_v31, 1  ;;  %v1908_v30 = vmul.f32 %v5479_v5, %v5479_v5 }
 0x2d6   :  { %v1937_v19 = vsel %vm341_vm3, %v1907_v25, 0.0  ;;  %v573_v25 = vld [vmem:[%s7587_s12] sm:$0xff] }
 0x2d7   :  { %v841_v54 = vadd.f32 %v840_v49, %v839_v31  ;;  %v1909_v31 = vmul.f32 %v5477_v4, %v5477_v4  ;;  %v1940_v40 = vsel %vm341_vm3, %v1908_v30, 0.0  ;;  %v1946_v49 = vsel %vm341_vm3, %v1910_v45, 0.0 }
 0x2d9   :  { %2059 = vadd.xlane.f32.xlu0 %v2058_v56  ;;  %1926 = vadd.xlane.f32.xlu1 %v1925_v57  ;;  %v843_v3 = vmul.f32 0.015625, %v841_v54  ;;  %v1943_v32 = vsel %vm341_vm3, %v1909_v31, 0.0  ;;  %v1913_v54 = vmul.f32 %v5502_v27, %v5502_v27  ;;  %v1912_v56 = vmul.f32 %v5497_v21, %v5497_v21 }
 0x2db   :  { %v852_v6 = vsel %vm395_vm4, %v843_v3, %v842_v0  ;;  %v1955_v57 = vsel %vm341_vm3, %v1913_v54, 0.0  ;;  %v1952_v61 = vsel %vm341_vm3, %v1912_v56, 0.0  ;;  %v1914_v0 = vmul.f32 %v5507_v33, %v5507_v33 }
 0x2dc   :  { %4539 = vmatmul.mubr.msk.f32.vlgmr.msra.gmra.mxu0 %vm341_vm3, %v852_v6  ;;  %v1961_v3 = vsel %vm341_vm3, %v1915_v63, 0.0 }
 0x2dd   :  { %1932 = vadd.xlane.f32.xlu0 %v1931_v50  ;;  %1929 = vadd.xlane.f32.xlu1 %v1928_v8  ;;  %v1958_v6 = vsel %vm341_vm3, %v1914_v0, 0.0  ;;  %v580_v50 = vld [vmem:[%s7587_s12 + $0x38] sm:$0xff]  ;;  %v579_v8 = vld [vmem:[%s7587_s12 + $0x30] sm:$0xff] }
 0x2de   :  { %4557 = vmatprep.mubr.msk.f32.mxu0 %vm5191_vm2, %v7607_v18  ;;  %4542 = vmatpush3.msra.mxu0 %v580_v50 }
 0x2df   :  { %4543 = vmatprep.subr.mxu0 %v7607_v18 }
 0x2e0   :  { %4544 = vmatpush3.msra.mxu0 %v579_v8  ;;  %v4116_v8 = vld [vmem:[%s7586_s11] ss:$0 sm:$0xff] }
 0x2e1   :  { %1935 = vadd.xlane.f32.xlu0 %v1934_v17  ;;  %2056 = vadd.xlane.f32.xlu1 %v2055_v20  ;;  %v576_v17 = vld [vmem:[%s7587_s12 + $0x18] sm:$0xff]  ;;  %v575_v20 = vld [vmem:[%s7587_s12 + $0x10] sm:$0xff] }
 0x2e2   :  { %4545 = vmatprep.subr.mxu0 %v7607_v18 }
 0x2e3   :  { %4546 = vmatpush3.msra.mxu0 %v578_v11 }
 0x2e4   :  { %4547 = vmatprep.subr.mxu0 %v7607_v18 }
 0x2e5   :  { %2053 = vadd.xlane.f32.xlu0 %v2052_v52  ;;  %1938 = vadd.xlane.f32.xlu1 %v1937_v19 }
 0x2e6   :  { %4548 = vmatpush3.msra.mxu0 %v577_v14 }
 0x2e7   :  { %4549 = vmatprep.subr.mxu0 %v7607_v18 }
 0x2e8   :  { %4550 = vmatpush3.msra.mxu0 %v576_v17 }
 0x2e9   :  { %1944 = vadd.xlane.f32.xlu0 %v1943_v32  ;;  %1941 = vadd.xlane.f32.xlu1 %v1940_v40 }
 0x2ea   :  { %4551 = vmatprep.subr.mxu0 %v7607_v18 }
 0x2eb   :  { %4552 = vmatpush3.msra.mxu0 %v575_v20 }
 0x2ec   :  { %4553 = vmatprep.subr.mxu0 %v7607_v18 }
 0x2ed   :  { %1950 = vadd.xlane.f32.xlu0 %v1949_v46  ;;  %1947 = vadd.xlane.f32.xlu1 %v1946_v49 }
 0x2ee   :  { %4554 = vmatpush3.msra.mxu0 %v574_v23 }
 0x2ef   :  { %4555 = vmatprep.subr.mxu0 %v7607_v18 }
 0x2f0   :  { %4556 = vmatpush3.msra.mxu0 %v573_v25 }
 0x2f1   :  { %1956 = vadd.xlane.f32.xlu0 %v1955_v57  ;;  %1953 = vadd.xlane.f32.xlu1 %v1952_v61 }
 0x2f2   :  { %4560 = vmatprep.subr.mxu0 %v5628_v41 }
 0x2f5   :  { %1962 = vadd.xlane.f32.xlu0 %v1961_v3  ;;  %1959 = vadd.xlane.f32.xlu1 %v1958_v6 }
 0x33a   :  { %v5926_v52 = vpop.xlane.xlu0 %2038 }
 0x33e   :  { %v5939_v54 = vpop.xlane.xlu1 %2044 }
 0x342   :  { %v2051_v19 = vpop.xlane.xlu0 %2050  ;;  %v5941_v56 = vpop.xlane.xlu1 %2041 }
 0x343   :  { %v2083_v31 = vadd.f32 1e-24, %v2051_v19 }
 0x345   :  { %4809 = vrsqrt.f32 %v2083_v31 }
 0x346   :  { %v5928_v30 = vpop.xlane.xlu0 %2047  ;;  %v5943_v57 = vpop.xlane.xlu1 %2035 }
 0x34a   :  { %v1705_v32 = vpop.xlane.xlu0 %1704  ;;  %v5945_v61 = vpop.xlane.xlu1 %2032 }
 0x34b   :  { %v1706_v40 = vadd.f32 1e-24, %v1705_v32  ;;  %v1754_v32 = vld [vmem:[%s7593_s18 + $0xf8] sm:$0xff] }
 0x34d   :  { %4811 = vrsqrt.f32 %v1706_v40 }
 0x34e   :  { %v5953_v6 = vpop.xlane.xlu0 %2068 }
 0x352   :  { %v4810_v44 = vpop.eup %4809  ;;  %v2075_v63 = vpop.xlane.xlu1 %2074 }
 0x353   :  { %v5931_v45 = vmul.f32 %v4810_v44, %v5719_v35  ;;  %v5957_v50 = vpop.xlane.xlu0 %2065  ;;  %v1749_v44 = vld [vmem:[%s7593_s18 + $0xd0] sm:$0xff] }
 0x355   :  { %4672 = vmatprep.subr.msk.mxu1 %vm341_vm3, %v5931_v45 }
 0x356   :  { %v5947_v35 = vpop.xlane.xlu1 %2029 }
 0x357   :  { %v2072_v25 = vpop.xlane.xlu0 %2071 }
 0x35a   :  { %v4812_v46 = vpop.eup %4811  ;;  %v5949_v0 = vpop.xlane.xlu1 %1917 }
 0x35b   :  { %v5936_v49 = vmul.f32 %v4812_v46, %v5736_v55  ;;  %v5973_v31 = vpop.xlane.xlu0 %1920 }
 0x35d   :  { %7668 = vst [vmem:[#allocation15_spill] sm:$0xff] %v5936_v49  ;;  %1716 = vst [vmem:[#allocation5] sm:$0x3] %v5936_v49 }
 0x35e   :  { %v5951_v3 = vpop.xlane.xlu1 %2062 }
 0x35f   :  { %v6002_v46 = vpop.xlane.xlu0 %1923 }
 0x362   :  { %v5955_v55 = vpop.xlane.xlu1 %1926 }
 0x366   :  { %v5962_v20 = vpop.xlane.xlu1 %1929 }
 0x36a   :  { %v5970_v19 = vpop.xlane.xlu1 %2056 }
 0x36e   :  { %v5997_v40 = vpop.xlane.xlu1 %1938 }
 0x39c   :  { %v921_v11 = vpop.f32.mrf.mxu0 }
 0x39d   :  { %v922_v14 = vadd.f32 %v4116_v8, %v921_v11  ;;  %v1748_v8 = vld [vmem:[%s7593_s18 + $0xc8] sm:$0xff]  ;;  %v1747_v11 = vld [vmem:[%s7593_s18 + $0xc0] sm:$0xff] }
 0x39e   :  { %v4540_v17 = vpop.f32.mrf.mxu0 }
 0x39f   :  { %v925_v23 = vmax.f32 %v922_v14, 0.0  ;;  %v1746_v14 = vld [vmem:[%s7593_s18 + $0xb8] sm:$0xff]  ;;  %v1745_v17 = vld [vmem:[%s7593_s18 + $0xb0] sm:$0xff] }
 0x3a1   :  { %4558 = vmatmul.mubr.msk.f32.vlgmr.msra.gmra.mxu0 %vm476_vm5, %v925_v23  ;;  %v1744_v23 = vld [vmem:[%s7593_s18 + $0xa8] sm:$0xff] }
 0x3a2   :  { %4561 = vmatpush3.msra.mxu0 %v5628_v41  ;;  %4568 = vmatprep.mubr.msk.f32.mxu0 %vm341_vm3, %v5441_v29  ;;  %v1753_v41 = vld [vmem:[%s7593_s18 + $0xf0] sm:$0xff] }
 0x3a3   :  { %4562 = vmatprep.subr.mxu0 %v5635_v42 }
 0x3a4   :  { %4563 = vmatpush3.msra.mxu0 %v5635_v42  ;;  %v1752_v42 = vld [vmem:[%s7593_s18 + $0xe8] sm:$0xff] }
 0x3a5   :  { %4564 = vmatprep.subr.mxu0 %v5642_v43 }
 0x3a6   :  { %4565 = vmatpush3.msra.mxu0 %v5642_v43  ;;  %v1751_v43 = vld [vmem:[%s7593_s18 + $0xe0] sm:$0xff] }
 0x3a7   :  { %4566 = vmatprep.subr.mxu0 %v5649_v22 }
 0x3a8   :  { %4567 = vmatpush3.msra.mxu0 %v5649_v22  ;;  %v1750_v22 = vld [vmem:[%s7593_s18 + $0xd8] sm:$0xff] }
 0x3a9   :  { %4569 = vmatmul.mubr.msk.f32.vlgmr.msra.gmra.mxu0 %vm341_vm3, %v5439_v28  ;;  %1755 = vmatprep.subr.mxu0 %v1754_v32  ;;  %v1942_v32 = vpop.xlane.xlu1 %1941 }
 0x3aa   :  { %4571 = vmatprep.mubr.msk.f32.mxu0 %vm341_vm3, %v5451_v37  ;;  %1756 = vmatpush1.msra.mxu0 %v1753_v41  ;;  %v1743_v41 = vld [vmem:[%s7593_s18 + $0xa0] sm:$0xff] }
 0x3ab   :  { %1757 = vmatprep.subr.mxu0 %v1752_v42  ;;  %v6028_v42 = vpop.xlane.xlu0 %2059 }
 0x3ac   :  { %1758 = vmatpush1.msra.mxu0 %v1751_v43  ;;  %v1742_v43 = vld [vmem:[%s7593_s18 + $0x98] sm:$0xff] }
 0x3ad   :  { %4572 = vmatmul.mubr.msk.f32.gmra.mxu0 %vm341_vm3, %v5449_v36  ;;  %1759 = vmatprep.subr.mxu0 %v1750_v22  ;;  %v2091_v22 = vadd.f32 1e-24, %v2075_v63  ;;  %v1739_v63 = vld [vmem:[%s7593_s18 + $0x80] sm:$0xff] }
 0x3ae   :  { %4574 = vmatprep.mubr.msk.f32.mxu0 %vm341_vm3, %v5461_v48  ;;  %1760 = vmatpush1.msra.mxu0 %v1749_v44  ;;  %v1741_v44 = vld [vmem:[%s7593_s18 + $0x90] sm:$0xff] }
 0x3af   :  { %1761 = vmatprep.subr.mxu0 %v1748_v8  ;;  %v1972_v8 = vadd.f32 1e-24, %v1942_v32  ;;  %4813 = vrsqrt.f32 %v2091_v22  ;;  %v1736_v32 = vld [vmem:[%s7593_s18 + $0x68] sm:$0xff]  ;;  %v1734_v22 = vld [vmem:[%s7593_s18 + $0x58] sm:$0xff] }
 0x3b0   :  { %1762 = vmatpush1.msra.mxu0 %v1747_v11  ;;  %v1740_v11 = vld [vmem:[%s7593_s18 + $0x88] sm:$0xff] }
 0x3b1   :  { %4575 = vmatmul.mubr.msk.f32.gmra.mxu0 %vm341_vm3, %v5459_v47  ;;  %1763 = vmatprep.subr.mxu0 %v1746_v14  ;;  %v2090_v14 = vadd.f32 1e-24, %v2072_v25  ;;  %v1737_v25 = vld [vmem:[%s7593_s18 + $0x70] sm:$0xff]  ;;  %4815 = vrsqrt.f32 %v1972_v8  ;;  %v2088_v8 = vadd.f32 1e-24, %v5957_v50 }
 0x3b2   :  { %4577 = vmatprep.mubr.msk.f32.mxu0 %vm341_vm3, %v5469_v58  ;;  %1764 = vmatpush1.msra.mxu0 %v1745_v17  ;;  %v1738_v17 = vld [vmem:[%s7593_s18 + $0x78] sm:$0xff]  ;;  %v1729_v50 = vld [vmem:[%s7593_s18 + $0x30] sm:$0xff] }
 0x3b3   :  { %1765 = vmatprep.subr.mxu0 %v1744_v23  ;;  %v6054_v23 = vpop.xlane.xlu0 %1932  ;;  %4817 = vrsqrt.f32 %v2090_v14 }
 0x3b4   :  { %1766 = vmatpush1.msra.mxu0 %v1743_v41  ;;  %v2089_v41 = vadd.f32 1e-24, %v5953_v6  ;;  %v1733_v6 = vld [vmem:[%s7593_s18 + $0x50] sm:$0xff] }
 0x3b5   :  { %4578 = vmatmul.mubr.msk.f32.gmra.mxu0 %vm341_vm3, %v5472_v62  ;;  %1767 = vmatprep.subr.mxu0 %v1742_v43  ;;  %v1735_v43 = vld [vmem:[%s7593_s18 + $0x60] sm:$0xff] }
 0x3b6   :  { %4580 = vmatprep.mubr.msk.f32.mxu0 %vm341_vm3, %v5479_v5  ;;  %1768 = vmatpush1.msra.mxu0 %v1741_v44  ;;  %v1732_v44 = vld [vmem:[%s7593_s18 + $0x48] sm:$0xff]  ;;  %4819 = vrsqrt.f32 %v2089_v41  ;;  %v1726_v41 = vld [vmem:[%s7593_s18 + $0x18] sm:$0xff] }
 0x3b7   :  { %1769 = vmatprep.subr.mxu0 %v1740_v11  ;;  %v1731_v11 = vld [vmem:[%s7593_s18 + $0x40] sm:$0xff]  ;;  %v6082_v14 = vpop.xlane.xlu0 %1935  ;;  %4821 = vrsqrt.f32 %v2088_v8  ;;  %v2086_v8 = vadd.f32 1e-24, %v6028_v42  ;;  %v2085_v42 = vadd.f32 1e-24, %v5970_v19 }
 0x3b8   :  { %1770 = vmatpush1.msra.mxu0 %v1739_v63  ;;  %v1730_v63 = vld [vmem:[%s7593_s18 + $0x38] sm:$0xff] }
 0x3b9   :  { %4581 = vmatmul.mubr.msk.f32.gmra.mxu0 %vm341_vm3, %v5477_v4  ;;  %1771 = vmatprep.subr.mxu0 %v1738_v17  ;;  %v1728_v17 = vld [vmem:[%s7593_s18 + $0x28] sm:$0xff] }
 0x3ba   :  { %4583 = vmatprep.mubr.msk.f32.mxu0 %vm341_vm3, %v5492_v16  ;;  %1772 = vmatpush1.msra.mxu0 %v1737_v25  ;;  %v2087_v25 = vadd.f32 1e-24, %v5951_v3  ;;  %v1725_v3 = vld [vmem:[%s7593_s18 + $0x10] sm:$0xff] }
 0x3bb   :  { %1773 = vmatprep.subr.mxu0 %v1736_v32  ;;  %v1727_v32 = vld [vmem:[%s7593_s18 + $0x20] sm:$0xff] }
 0x3bc   :  { %1774 = vmatpush1.msra.mxu0 %v1735_v43  ;;  %v4814_v43 = vpop.eup %4813  ;;  %4823 = vrsqrt.f32 %v2087_v25 }
 0x3bd   :  { %4584 = vmatmul.mubr.msk.f32.gmra.mxu0 %vm341_vm3, %v5490_v15  ;;  %1775 = vmatprep.subr.mxu0 %v1734_v22  ;;  %v2054_v22 = vpop.xlane.xlu0 %2053  ;;  %4825 = vrsqrt.f32 %v2086_v8 }
 0x3be   :  { %4586 = vmatprep.mubr.msk.f32.mxu0 %vm341_vm3, %v5497_v21  ;;  %1776 = vmatpush1.msra.mxu0 %v1733_v6  ;;  %v1724_v6 = vld [vmem:[%s7593_s18 + $0x8] sm:$0xff]  ;;  %4827 = vrsqrt.f32 %v2085_v42 }
 0x3bf   :  { %1777 = vmatprep.subr.mxu0 %v1732_v44  ;;  %v4816_v44 = vpop.eup %4815 }
 0x3c0   :  { %1778 = vmatpush1.msra.mxu0 %v1731_v11  ;;  %v1723_v11 = vld [vmem:[%s7593_s18] sm:$0xff] }
 0x3c1   :  { %4587 = vmatmul.mubr.msk.f32.gmra.mxu0 %vm341_vm3, %v5502_v27  ;;  %1779 = vmatprep.subr.mxu0 %v1730_v63  ;;  %v4818_v63 = vpop.eup %4817 }
 0x3c2   :  { %4589 = vmatprep.mubr.msk.f32.mxu0 %vm341_vm3, %v5507_v33  ;;  %1780 = vmatpush1.msra.mxu0 %v1729_v50  ;;  %v2123_v50 = vmul.f32 %v4814_v43, %v5798_v12  ;;  %v2122_v25 = vmul.f32 %v4818_v63, %v5808_v26  ;;  %v2084_v12 = vadd.f32 1e-24, %v2054_v22 }
 0x3c3   :  { %1781 = vmatprep.subr.mxu0 %v1728_v17  ;;  %v2004_v17 = vmul.f32 %v4816_v44, %v5479_v5  ;;  %v1948_v5 = vpop.xlane.xlu1 %1947 }
 0x3c4   :  { %1782 = vmatpush1.msra.mxu0 %v1727_v32  ;;  %v4820_v32 = vpop.eup %4819  ;;  %4829 = vrsqrt.f32 %v2084_v12  ;;  %v1974_v22 = vadd.f32 1e-24, %v1948_v5 }
 0x3c5   :  { %4590 = vmatmul.mubr.msk.f32.gmra.mxu0 %vm341_vm3, %v5511_v39  ;;  %1783 = vmatprep.subr.mxu0 %v1726_v41  ;;  %v1945_v41 = vpop.xlane.xlu0 %1944  ;;  %v4822_v19 = vpop.eup %4821 }
 0x3c6   :  { %1784 = vmatpush1.msra.mxu0 %v1725_v3  ;;  %1819 = vmatprep.mubr.f32.mxu0 %v7607_v18  ;;  %v2121_v3 = vmul.f32 %v4820_v32, %v5781_v53  ;;  %v2120_v26 = vmul.f32 %v4822_v19, %v5789_v2  ;;  %v1973_v44 = vadd.f32 1e-24, %v1945_v41 }
 0x3c7   :  { %1785 = vmatprep.subr.mxu0 %v1724_v6  ;;  %v1954_v8 = vpop.xlane.xlu1 %1953 }
 0x3c8   :  { %1786 = vmatpush1.msra.mxu0 %v1723_v11  ;;  %4831 = vrsqrt.f32 %v1973_v44  ;;  %v1976_v2 = vadd.f32 1e-24, %v1954_v8 }
 0x3c9   :  { %1820 = vmatmul.mubr.f32.vlgmr.msra.gmra.mxu0 %v5936_v49  ;;  %4700 = vmatprep.subr.msk.mxu0 %vm341_vm3, %v2123_v50  ;;  %v1951_v43 = vpop.xlane.xlu0 %1950  ;;  %v4824_v6 = vpop.eup %4823  ;;  %4833 = vrsqrt.f32 %v1974_v22 }
 0x3ca   :  { %4701 = vmatpush3.xpose.msk.msra.mxu0 %vm341_vm3, %v2123_v50  ;;  %4716 = vmatprep.mubr.msk.f32.mxu0 %vm341_vm3, %v2004_v17  ;;  %v2119_v11 = vmul.f32 %v4824_v6, %v5771_v34  ;;  %v4826_v53 = vpop.eup %4825  ;;  %v1975_v50 = vadd.f32 1e-24, %v1951_v43 }
 0x3cb   :  { %4702 = vmatprep.subr.msk.mxu0 %vm341_vm3, %v2122_v25  ;;  %v1960_v17 = vpop.xlane.xlu1 %1959  ;;  %v2118_v42 = vmul.f32 %v4826_v53, %v5773_v38 }
 0x3cc   :  { %4835 = vrsqrt.f32 %v1975_v50  ;;  %v1978_v41 = vadd.f32 1e-24, %v1960_v17  ;;  %v2079_v17 = vadd.f32 1e-24, %v5926_v52 }
 0x3cd   :  { %v1957_v63 = vpop.xlane.xlu0 %1956  ;;  %4837 = vrsqrt.f32 %v1976_v2  ;;  %v6167_v2 = vpop.f32.mrf.mxu1 }
 0x3ce   :  { %4703 = vmatpush3.xpose.msk.msra.mxu0 %vm341_vm3, %v2122_v25  ;;  %v4828_v25 = vpop.eup %4827  ;;  %v1977_v32 = vadd.f32 1e-24, %v1957_v63 }
 0x3cf   :  { %4704 = vmatprep.subr.msk.mxu0 %vm341_vm3, %v2121_v3  ;;  %v2117_v12 = vmul.f32 %v4828_v25, %v5749_v9 }
 0x3d0   :  { %4839 = vrsqrt.f32 %v1977_v32 }
 0x3d1   :  { %v1963_v34 = vpop.xlane.xlu0 %1962  ;;  %v4830_v5 = vpop.eup %4829  ;;  %4841 = vrsqrt.f32 %v1978_v41 }
 0x3d2   :  { %4705 = vmatpush3.xpose.msk.msra.mxu0 %vm341_vm3, %v2121_v3  ;;  %v1979_v3 = vadd.f32 1e-24, %v1963_v34  ;;  %v2116_v38 = vmul.f32 %v4830_v5, %v5751_v10 }
 0x3d3   :  { %4706 = vmatprep.subr.msk.mxu0 %vm341_vm3, %v2120_v26 }
 0x3d4   :  { %4843 = vrsqrt.f32 %v1979_v3 }
 0x3d5   :  { %v4832_v19 = vpop.eup %4831 }
 0x3d6   :  { %4707 = vmatpush3.xpose.msk.msra.mxu0 %vm341_vm3, %v2120_v26  ;;  %v4834_v43 = vpop.eup %4833  ;;  %v2005_v9 = vmul.f32 %v4832_v19, %v5477_v4 }
 0x3d7   :  { %4708 = vmatprep.subr.msk.mxu0 %vm341_vm3, %v2119_v11  ;;  %v2006_v6 = vmul.f32 %v4834_v43, %v5492_v16  ;;  %v2077_v43 = vadd.f32 1e-24, %v5945_v61 }
 0x3d9   :  { %v4836_v26 = vpop.eup %4835 }
 0x3da   :  { %4709 = vmatpush3.xpose.msk.msra.mxu0 %vm341_vm3, %v2119_v11  ;;  %v4838_v44 = vpop.eup %4837  ;;  %v2007_v10 = vmul.f32 %v4836_v26, %v5490_v15  ;;  %v2082_v15 = vadd.f32 1e-24, %v5928_v30  ;;  %v6175_v30 = vld [vmem:[%s7590_s15] ss:$0 sm:$0xff] }
 0x3db   :  { %4710 = vmatprep.subr.msk.mxu0 %vm341_vm3, %v2118_v42  ;;  %v2008_v22 = vmul.f32 %v4838_v44, %v5497_v21  ;;  %v2081_v21 = vadd.f32 1e-24, %v5939_v54 }
 0x3dc   :  { %4845 = vrsqrt.f32 %v2082_v15 }
 0x3dd   :  { %v4840_v8 = vpop.eup %4839  ;;  %4847 = vrsqrt.f32 %v2081_v21 }
 0x3de   :  { %4711 = vmatpush3.xpose.msk.msra.mxu0 %vm341_vm3, %v2118_v42  ;;  %v4842_v11 = vpop.eup %4841  ;;  %v2009_v4 = vmul.f32 %v4840_v8, %v5502_v27 }
 0x3df   :  { %4712 = vmatprep.subr.msk.mxu0 %vm341_vm3, %v2117_v12  ;;  %v2010_v16 = vmul.f32 %v4842_v11, %v5507_v33  ;;  %v2080_v33 = vadd.f32 1e-24, %v5941_v56  ;;  %v2078_v56 = vadd.f32 1e-24, %v5943_v57  ;;  %v2076_v11 = vadd.f32 1e-24, %v5947_v35 }
 0x3e1   :  { %v4844_v53 = vpop.eup %4843  ;;  %4849 = vrsqrt.f32 %v2080_v33 }
 0x3e2   :  { %4713 = vmatpush3.xpose.msk.msra.mxu0 %vm341_vm3, %v2117_v12  ;;  %v2011_v63 = vmul.f32 %v4844_v53, %v5511_v39  ;;  %v6170_v39 = vpop.f32.mrf.mxu1  ;;  %4851 = vrsqrt.f32 %v2079_v17 }
 0x3e3   :  { %4714 = vmatprep.subr.msk.mxu0 %vm341_vm3, %v2116_v38  ;;  %4853 = vrsqrt.f32 %v2078_v56 }
 0x3e4   :  { %v6180_v34 = vpop.f32.mrf.mxu1  ;;  %4855 = vrsqrt.f32 %v2077_v43 }
 0x3e5   :  { %4857 = vrsqrt.f32 %v2076_v11 }
 0x3e6   :  { %4715 = vmatpush3.xpose.msk.msra.mxu0 %vm341_vm3, %v2116_v38 }
 0x3e9   :  { %4717 = vmatmul.mubr.msk.f32.vlgmr.msra.gmra.mxu0 %vm341_vm3, %v2005_v9  ;;  %v4846_v41 = vpop.eup %4845  ;;  %v6186_v9 = vpop.f32.mrf.mxu1 }
 0x3ea   :  { %4719 = vmatprep.mubr.msk.f32.mxu0 %vm341_vm3, %v2006_v6  ;;  %v2114_v57 = vmul.f32 %v4846_v41, %v5731_v51  ;;  %v4848_v6 = vpop.eup %4847 }
 0x3ed   :  { %4720 = vmatmul.mubr.msk.f32.gmra.mxu0 %vm341_vm3, %v2007_v10 }
 0x3ee   :  { %4722 = vmatprep.mubr.msk.f32.mxu0 %vm341_vm3, %v2008_v22  ;;  %v4850_v53 = vpop.eup %4849 }
 0x3ef   :  { %v4852_v17 = vpop.eup %4851 }
 0x3f1   :  { %4723 = vmatmul.mubr.msk.f32.gmra.mxu0 %vm341_vm3, %v2009_v4  ;;  %v6197_v4 = vpop.f32.mrf.mxu1 }
 0x3f2   :  { %4725 = vmatprep.mubr.msk.f32.mxu0 %vm341_vm3, %v2010_v16 }
 0x3f3   :  { %v6206_v35 = vpop.f32.mrf.mxu1 }
 0x3f5   :  { %4726 = vmatmul.mubr.msk.f32.gmra.mxu0 %vm341_vm3, %v2011_v63 }
 0x3f6   :  { %3442 = vmatprep.mubr.f32.mxu0 %v7607_v18 }
 0x461   :  { %v6164_v50 = vpop.f32.mrf.mxu0 }
 0x462   :  { %7669 = vst [vmem:[#allocation16_spill] sm:$0xff] %v6164_v50 }
 0x463   :  { %v4559_v27 = vpop.f32.mrf.mxu0 }
 0x469   :  { %v4570_v42 = vpop.f32.mrf.mxu0 }
 0x46a   :  { %v1184_v54 = vadd.f32 %v4570_v42, %v6175_v30 }
 0x46b   :  { %v1178_v25 = vpop.f32.mrf.mxu0 }
 0x46c   :  { %v1179_v32 = vadd.f32 %v6175_v30, %v1178_v25  ;;  %v1338_v5 = vmax.f32 %v1184_v54, 0.0 }
 0x46d   :  { %v4573_v52 = vpop.f32.mrf.mxu0 }
 0x46e   :  { %v1337_v12 = vmax.f32 %v1179_v32, 0.0  ;;  %v1194_v3 = vadd.f32 %v4573_v52, %v6175_v30  ;;  %v6215_v52 = vpop.f32.mrf.mxu1 }
 0x46f   :  { %v1188_v38 = vpop.f32.mrf.mxu0 }
 0x470   :  { %v1189_v19 = vadd.f32 %v6175_v30, %v1188_v38  ;;  %4624 = vmatprep.mubr.msk.f32.mxu1 %vm341_vm3, %v1337_v12  ;;  %v1340_v10 = vmax.f32 %v1194_v3, 0.0  ;;  %v4854_v12 = vpop.eup %4853 }
 0x471   :  { %v4576_v26 = vpop.f32.mrf.mxu0  ;;  %4625 = vmatmul.mubr.msk.f32.vlgmr.msra.gmra.mxu1 %vm341_vm3, %v1338_v5 }
 0x472   :  { %v1339_v44 = vmax.f32 %v1189_v19, 0.0  ;;  %4673 = vmatpush3.xpose.msk.msra.mxu1 %vm341_vm3, %v5931_v45  ;;  %v1204_v8 = vadd.f32 %v4576_v26, %v6175_v30  ;;  %v2113_v45 = vmul.f32 %v4848_v6, %v5699_v13  ;;  %v2112_v13 = vmul.f32 %v4850_v53, %v5709_v24  ;;  %v1288_v26 = vpop.f32.mrf.mxu1  ;;  %v4856_v6 = vpop.eup %4855 }
 0x473   :  { %4674 = vmatprep.subr.msk.mxu1 %vm341_vm3, %v2114_v57  ;;  %v1198_v22 = vpop.f32.mrf.mxu0  ;;  %v2111_v24 = vmul.f32 %v4852_v17, %v5683_v1  ;;  %v2110_v1 = vmul.f32 %v4854_v12, %v5692_v7  ;;  %v2109_v7 = vmul.f32 %v4856_v6, %v5676_v59  ;;  %v1264_v17 = vadd.f32 %v6167_v2, %v6175_v30 }
 0x474   :  { %v1199_v61 = vadd.f32 %v6175_v30, %v1198_v22  ;;  %4627 = vmatprep.mubr.msk.f32.mxu1 %vm341_vm3, %v1339_v44  ;;  %v1342_v63 = vmax.f32 %v1204_v8, 0.0  ;;  %v4606_v11 = vpop.f32.mrf.mxu1  ;;  %v1274_v2 = vadd.f32 %v6180_v34, %v6175_v30  ;;  %v1966_v6 = vadd.f32 1e-24, %v6002_v46 }
 0x475   :  { %v4579_v51 = vpop.f32.mrf.mxu0  ;;  %4628 = vmatmul.mubr.msk.f32.gmra.mxu1 %vm341_vm3, %v1340_v10 }
 0x476   :  { %v1341_v16 = vmax.f32 %v1199_v61, 0.0  ;;  %4675 = vmatpush3.xpose.msk.msra.mxu1 %vm341_vm3, %v2114_v57  ;;  %v1214_v15 = vadd.f32 %v4579_v51, %v6175_v30 }
 0x477   :  { %4676 = vmatprep.subr.msk.mxu1 %vm341_vm3, %v2113_v45  ;;  %v1208_v21 = vpop.f32.mrf.mxu0 }
 0x478   :  { %v1209_v27 = vadd.f32 %v6175_v30, %v1208_v21  ;;  %4630 = vmatprep.mubr.msk.f32.mxu1 %vm341_vm3, %v1341_v16  ;;  %v1344_v54 = vmax.f32 %v1214_v15, 0.0  ;;  %v1259_v21 = vadd.f32 %v6175_v30, %v6170_v39  ;;  %v1269_v39 = vadd.f32 %v6175_v30, %v6186_v9 }
 0x479   :  { %v4582_v33 = vpop.f32.mrf.mxu0  ;;  %4631 = vmatmul.mubr.msk.f32.gmra.mxu1 %vm341_vm3, %v1342_v63  ;;  %v1356_v9 = vmax.f32 %v1274_v2, 0.0 }
 0x47a   :  { %v1343_v42 = vmax.f32 %v1209_v27, 0.0  ;;  %4677 = vmatpush3.xpose.msk.msra.mxu1 %vm341_vm3, %v2113_v45  ;;  %v1224_v25 = vadd.f32 %v4582_v33, %v6175_v30  ;;  %v4858_v45 = vpop.eup %4857  ;;  %v1298_v33 = vpop.f32.mrf.mxu1 }
 0x47b   :  { %4678 = vmatprep.subr.msk.mxu1 %vm341_vm3, %v2112_v13  ;;  %v1218_v32 = vpop.f32.mrf.mxu0  ;;  %v2108_v59 = vmul.f32 %v4858_v45, %v5678_v60  ;;  %v1354_v60 = vmax.f32 %v1264_v17, 0.0  ;;  %v1970_v45 = vadd.f32 1e-24, %v6082_v14 }
 0x47c   :  { %v1219_v56 = vadd.f32 %v6175_v30, %v1218_v32  ;;  %4633 = vmatprep.mubr.msk.f32.mxu1 %vm341_vm3, %v1343_v42  ;;  %v1346_v3 = vmax.f32 %v1224_v25, 0.0  ;;  %v4609_v25 = vpop.f32.mrf.mxu1  ;;  %v1355_v32 = vmax.f32 %v1269_v39, 0.0 }
 0x47d   :  { %v4585_v41 = vpop.f32.mrf.mxu0  ;;  %4634 = vmatmul.mubr.msk.f32.gmra.mxu1 %vm341_vm3, %v1344_v54  ;;  %v1353_v54 = vmax.f32 %v1259_v21, 0.0 }
 0x47e   :  { %v1345_v5 = vmax.f32 %v1219_v56, 0.0  ;;  %4679 = vmatpush3.xpose.msk.msra.mxu1 %vm341_vm3, %v2112_v13  ;;  %v1234_v38 = vadd.f32 %v4585_v41, %v6175_v30  ;;  %v1279_v56 = vadd.f32 %v6175_v30, %v6206_v35  ;;  %v1308_v41 = vpop.f32.mrf.mxu1  ;;  %v1294_v35 = vadd.f32 %v6215_v52, %v6175_v30 }
 0x47f   :  { %4680 = vmatprep.subr.msk.mxu1 %vm341_vm3, %v2111_v24  ;;  %v1228_v19 = vpop.f32.mrf.mxu0  ;;  %v1309_v52 = vadd.f32 %v6175_v30, %v1308_v41 }
 0x480   :  { %v1229_v43 = vadd.f32 %v6175_v30, %v1228_v19  ;;  %4636 = vmatprep.mubr.msk.f32.mxu1 %vm341_vm3, %v1345_v5  ;;  %v1348_v10 = vmax.f32 %v1234_v38, 0.0  ;;  %v1357_v12 = vmax.f32 %v1279_v56, 0.0  ;;  %v1289_v5 = vadd.f32 %v6175_v30, %v1288_v26 }
 0x481   :  { %v4588_v57 = vpop.f32.mrf.mxu0  ;;  %4637 = vmatmul.mubr.msk.f32.gmra.mxu1 %vm341_vm3, %v1346_v3  ;;  %v4612_v3 = vpop.f32.mrf.mxu1  ;;  %v1964_v38 = vadd.f32 1e-24, %v5949_v0  ;;  %v1360_v26 = vmax.f32 %v1294_v35, 0.0 }
 0x482   :  { %v1347_v44 = vmax.f32 %v1229_v43, 0.0  ;;  %4681 = vmatpush3.xpose.msk.msra.mxu1 %vm341_vm3, %v2111_v24  ;;  %v1244_v8 = vadd.f32 %v4588_v57, %v6175_v30  ;;  %v1284_v24 = vadd.f32 %v6197_v4, %v6175_v30  ;;  %v1359_v19 = vmax.f32 %v1289_v5, 0.0 }
 0x483   :  { %4682 = vmatprep.subr.msk.mxu1 %vm341_vm3, %v2110_v1  ;;  %v1238_v22 = vpop.f32.mrf.mxu0  ;;  %v1299_v43 = vadd.f32 %v6175_v30, %v1298_v33  ;;  %v1318_v57 = vpop.f32.mrf.mxu1  ;;  %v1965_v4 = vadd.f32 1e-24, %v5973_v31  ;;  %4859 = vrsqrt.f32 %v1964_v38  ;;  %v1314_v31 = vadd.f32 %v4609_v25, %v6175_v30 }
 0x484   :  { %v1239_v61 = vadd.f32 %v6175_v30, %v1238_v22  ;;  %4639 = vmatprep.mubr.msk.f32.mxu1 %vm341_vm3, %v1347_v44  ;;  %v1350_v16 = vmax.f32 %v1244_v8, 0.0  ;;  %v1358_v34 = vmax.f32 %v1284_v24, 0.0  ;;  %v1968_v22 = vadd.f32 1e-24, %v5962_v20  ;;  %v6331_v24 = vld [vmem:[%s7592_s17] ss:$0 sm:$0xff] }
 0x485   :  { %v4591_v51 = vpop.f32.mrf.mxu0  ;;  %4640 = vmatmul.mubr.msk.f32.gmra.mxu1 %vm341_vm3, %v1348_v10  ;;  %v1361_v44 = vmax.f32 %v1299_v43, 0.0  ;;  %v4615_v0 = vpop.f32.mrf.mxu1  ;;  %4861 = vrsqrt.f32 %v1965_v4  ;;  %v1967_v10 = vadd.f32 1e-24, %v5955_v55  ;;  %v1319_v46 = vadd.f32 %v6175_v30, %v1318_v57 }
 0x486   :  { %v1349_v53 = vmax.f32 %v1239_v61, 0.0  ;;  %4683 = vmatpush3.xpose.msk.msra.mxu1 %vm341_vm3, %v2110_v1  ;;  %v1254_v63 = vadd.f32 %v4591_v51, %v6175_v30  ;;  %v1304_v1 = vadd.f32 %v4606_v11, %v6175_v30  ;;  %4863 = vrsqrt.f32 %v1966_v6 }
 0x487   :  { %4684 = vmatprep.subr.msk.mxu1 %vm341_vm3, %v2109_v7  ;;  %v1248_v15 = vpop.f32.mrf.mxu0  ;;  %v1363_v61 = vmax.f32 %v1309_v52, 0.0  ;;  %v1328_v11 = vpop.f32.mrf.mxu1  ;;  %4865 = vrsqrt.f32 %v1967_v10  ;;  %v1969_v51 = vadd.f32 1e-24, %v6054_v23  ;;  %v1324_v55 = vadd.f32 %v4612_v3, %v6175_v30 }
 0x488   :  { %v1249_v27 = vadd.f32 %v6175_v30, %v1248_v15  ;;  %4642 = vmatprep.mubr.msk.f32.mxu1 %vm341_vm3, %v1349_v53  ;;  %v1352_v42 = vmax.f32 %v1254_v63, 0.0  ;;  %v1362_v8 = vmax.f32 %v1304_v1, 0.0  ;;  %4867 = vrsqrt.f32 %v1968_v22 }
 0x489   :  { %4643 = vmatmul.mubr.msk.f32.gmra.mxu1 %vm341_vm3, %v1350_v16  ;;  %v1365_v53 = vmax.f32 %v1319_v46, 0.0  ;;  %v1329_v20 = vadd.f32 %v6175_v30, %v1328_v11  ;;  %4869 = vrsqrt.f32 %v1969_v51  ;;  %v1971_v16 = vadd.f32 1e-24, %v5997_v40 }
 0x48a   :  { %v1351_v13 = vmax.f32 %v1249_v27, 0.0  ;;  %4685 = vmatpush3.xpose.msk.msra.mxu1 %vm341_vm3, %v2109_v7  ;;  %v1364_v7 = vmax.f32 %v1314_v31, 0.0  ;;  %v1366_v63 = vmax.f32 %v1324_v55, 0.0  ;;  %v1334_v15 = vadd.f32 %v4615_v0, %v6175_v30 }
 0x48b   :  { %4686 = vmatprep.subr.msk.mxu1 %vm341_vm3, %v2108_v59  ;;  %4871 = vrsqrt.f32 %v1970_v45  ;;  %v1367_v23 = vmax.f32 %v1329_v20, 0.0 }
 0x48c   :  { %4645 = vmatprep.mubr.msk.f32.mxu1 %vm341_vm3, %v1351_v13  ;;  %4873 = vrsqrt.f32 %v1971_v16  ;;  %v1368_v14 = vmax.f32 %v1334_v15, 0.0 }
 0x48d   :  { %4646 = vmatmul.mubr.msk.f32.gmra.mxu1 %vm341_vm3, %v1352_v42 }
 0x48e   :  { %4687 = vmatpush3.xpose.msk.msra.mxu1 %vm341_vm3, %v2108_v59  ;;  %4648 = vmatprep.mubr.msk.f32.mxu1 %vm341_vm3, %v1353_v54 }
 0x490   :  { %v4860_v21 = vpop.eup %4859 }
 0x491   :  { %4649 = vmatmul.mubr.msk.f32.gmra.mxu1 %vm341_vm3, %v1354_v60  ;;  %v1996_v33 = vmul.f32 %v4860_v21, %v5441_v29 }
 0x492   :  { %4651 = vmatprep.mubr.msk.f32.mxu1 %vm341_vm3, %v1355_v32  ;;  %v4862_v27 = vpop.eup %4861 }
 0x493   :  { %v4864_v59 = vpop.eup %4863  ;;  %v1997_v40 = vmul.f32 %v4862_v27, %v5439_v28 }
 0x494   :  { %v4866_v30 = vpop.eup %4865  ;;  %v1998_v13 = vmul.f32 %v4864_v59, %v5451_v37 }
 0x495   :  { %4652 = vmatmul.mubr.msk.f32.gmra.mxu1 %vm341_vm3, %v1356_v9  ;;  %v4868_v17 = vpop.eup %4867  ;;  %v1999_v42 = vmul.f32 %v4866_v30, %v5449_v36 }
 0x496   :  { %4654 = vmatprep.mubr.msk.f32.mxu1 %vm341_vm3, %v1357_v12  ;;  %v4870_v54 = vpop.eup %4869  ;;  %v2000_v29 = vmul.f32 %v4868_v17, %v5461_v48 }
 0x497   :  { %v2001_v28 = vmul.f32 %v4870_v54, %v5459_v47 }
 0x498   :  { %v4872_v39 = vpop.eup %4871 }
 0x499   :  { %4655 = vmatmul.mubr.msk.f32.gmra.mxu1 %vm341_vm3, %v1358_v34  ;;  %v4874_v25 = vpop.eup %4873  ;;  %v2002_v37 = vmul.f32 %v4872_v39, %v5469_v58 }
 0x49a   :  { %4657 = vmatprep.mubr.msk.f32.mxu1 %vm341_vm3, %v1359_v19  ;;  %v2003_v60 = vmul.f32 %v4874_v25, %v5472_v62 }
 0x49d   :  { %4658 = vmatmul.mubr.msk.f32.gmra.mxu1 %vm341_vm3, %v1360_v26 }
 0x49e   :  { %4660 = vmatprep.mubr.msk.f32.mxu1 %vm341_vm3, %v1361_v44 }
 0x4a1   :  { %4661 = vmatmul.mubr.msk.f32.gmra.mxu1 %vm341_vm3, %v1362_v8 }
 0x4a2   :  { %4663 = vmatprep.mubr.msk.f32.mxu1 %vm341_vm3, %v1363_v61 }
 0x4a5   :  { %4664 = vmatmul.mubr.msk.f32.gmra.mxu1 %vm341_vm3, %v1364_v7 }
 0x4a6   :  { %4666 = vmatprep.mubr.msk.f32.mxu1 %vm341_vm3, %v1365_v53  ;;  %v6379_v53 = vpop.f32.mrf.mxu0 }
 0x4a7   :  { %7678 = vst [vmem:[#allocation25_spill] sm:$0xff] %v6379_v53 }
 0x4a9   :  { %4667 = vmatmul.mubr.msk.f32.gmra.mxu1 %vm341_vm3, %v1366_v63  ;;  %v6385_v63 = vpop.f32.mrf.mxu0 }
 0x4aa   :  { %4669 = vmatprep.mubr.msk.f32.mxu1 %vm341_vm3, %v1367_v23  ;;  %7679 = vst [vmem:[#allocation26_spill] sm:$0xff] %v6385_v63 }
 0x4ab   :  { %v4718_v23 = vpop.f32.mrf.mxu0 }
 0x4ad   :  { %4670 = vmatmul.mubr.msk.f32.gmra.mxu1 %vm341_vm3, %v1368_v14  ;;  %v2391_v59 = vpop.f32.mrf.mxu0 }
 0x4ae   :  { %4688 = vmatprep.mubr.msk.f32.mxu1 %vm341_vm3, %v1996_v33 }
 0x4b1   :  { %4689 = vmatmul.mubr.msk.f32.vlgmr.msra.gmra.mxu1 %vm341_vm3, %v1997_v40 }
 0x4b2   :  { %4691 = vmatprep.mubr.msk.f32.mxu1 %vm341_vm3, %v1998_v13 }
 0x4b5   :  { %4692 = vmatmul.mubr.msk.f32.gmra.mxu1 %vm341_vm3, %v1999_v42  ;;  %v4721_v42 = vpop.f32.mrf.mxu0 }
 0x4b6   :  { %4694 = vmatprep.mubr.msk.f32.mxu1 %vm341_vm3, %v2000_v29 }
 0x4b7   :  { %v2401_v25 = vpop.f32.mrf.mxu0 }
 0x4b9   :  { %4695 = vmatmul.mubr.msk.f32.gmra.mxu1 %vm341_vm3, %v2001_v28 }
 0x4ba   :  { %4697 = vmatprep.mubr.msk.f32.mxu1 %vm341_vm3, %v2002_v37 }
 0x4bd   :  { %4698 = vmatmul.mubr.msk.f32.gmra.mxu1 %vm341_vm3, %v2003_v60 }
 0x531   :  { %v6308_v36 = vpop.f32.mrf.mxu1 }
 0x533   :  { %v6310_v48 = vpop.f32.mrf.mxu1 }
 0x535   :  { %v6312_v2 = vpop.f32.mrf.mxu1 }
 0x537   :  { %v6314_v32 = vpop.f32.mrf.mxu1 }
 0x539   :  { %v6316_v47 = vpop.f32.mrf.mxu1 }
 0x53b   :  { %v6318_v56 = vpop.f32.mrf.mxu1 }
 0x53d   :  { %v6320_v58 = vpop.f32.mrf.mxu1 }
 0x53f   :  { %v6322_v41 = vpop.f32.mrf.mxu1 }
 0x541   :  { %v6324_v9 = vpop.f32.mrf.mxu1 }
 0x543   :  { %v6326_v62 = vpop.f32.mrf.mxu1 }
 0x545   :  { %v4641_v12 = vpop.f32.mrf.mxu1 }
 0x546   :  { %v6334_v5 = vadd.f32 %v4641_v12, %v6331_v24 }
 0x547   :  { %v6336_v3 = vpop.f32.mrf.mxu1 }
 0x548   :  { %7670 = vst [vmem:[#allocation17_spill] sm:$0xff] %v6334_v5 }
 0x549   :  { %v4644_v34 = vpop.f32.mrf.mxu1 }
 0x54a   :  { %v6339_v35 = vadd.f32 %v4644_v34, %v6331_v24 }
 0x54b   :  { %v1602_v38 = vpop.f32.mrf.mxu1 }
 0x54c   :  { %7671 = vst [vmem:[#allocation18_spill] sm:$0xff] %v6339_v35  ;;  %v6342_v19 = vadd.f32 %v6331_v24, %v1602_v38  ;;  %v4724_v38 = vpop.f32.mrf.mxu0 }
 0x54d   :  { %v4647_v43 = vpop.f32.mrf.mxu1 }
 0x54e   :  { %7672 = vst [vmem:[#allocation19_spill] sm:$0xff] %v6342_v19  ;;  %v6345_v57 = vadd.f32 %v4647_v43, %v6331_v24  ;;  %v2457_v43 = vsel %vm476_vm5, %v4718_v23, -inf }
 0x54f   :  { %v1612_v4 = vpop.f32.mrf.mxu1 }
 0x550   :  { %7673 = vst [vmem:[#allocation20_spill] sm:$0xff] %v6345_v57  ;;  %v6348_v26 = vadd.f32 %v6331_v24, %v1612_v4  ;;  %v2454_v4 = vsel %vm476_vm5, %v2391_v59, -inf }
 0x551   :  { %v6350_v1 = vpop.f32.mrf.mxu1 }
 0x552   :  { %7674 = vst [vmem:[#allocation21_spill] sm:$0xff] %v6348_v26 }
 0x553   :  { %v6352_v6 = vpop.f32.mrf.mxu1 }
 0x555   :  { %v6354_v44 = vpop.f32.mrf.mxu1 }
 0x557   :  { %v6356_v52 = vpop.f32.mrf.mxu1 }
 0x559   :  { %v6358_v0 = vpop.f32.mrf.mxu1 }
 0x55b   :  { %v6360_v10 = vpop.f32.mrf.mxu1 }
 0x55d   :  { %v6362_v8 = vpop.f32.mrf.mxu1 }
 0x55f   :  { %v6364_v31 = vpop.f32.mrf.mxu1 }
 0x561   :  { %v4662_v22 = vpop.f32.mrf.mxu1 }
 0x562   :  { %v6367_v61 = vadd.f32 %v4662_v22, %v6331_v24  ;;  %v2411_v22 = vpop.f32.mrf.mxu0 }
 0x563   :  { %v1662_v46 = vpop.f32.mrf.mxu1 }
 0x564   :  { %7675 = vst [vmem:[#allocation22_spill] sm:$0xff] %v6367_v61  ;;  %v6370_v11 = vadd.f32 %v6331_v24, %v1662_v46  ;;  %v2463_v46 = vsel %vm476_vm5, %v4721_v42, -inf }
 0x565   :  { %v6372_v51 = vpop.f32.mrf.mxu1 }
 0x566   :  { %7676 = vst [vmem:[#allocation23_spill] sm:$0xff] %v6370_v11 }
 0x567   :  { %v1672_v7 = vpop.f32.mrf.mxu1 }
 0x568   :  { %v6375_v55 = vadd.f32 %v6331_v24, %v1672_v7  ;;  %v2460_v7 = vsel %vm476_vm5, %v2401_v25, -inf }
 0x569   :  { %v6377_v45 = vpop.f32.mrf.mxu1 }
 0x56a   :  { %7677 = vst [vmem:[#allocation24_spill] sm:$0xff] %v6375_v55 }
 0x56b   :  { %v6381_v20 = vpop.f32.mrf.mxu1 }
 0x56d   :  { %v6383_v16 = vpop.f32.mrf.mxu1 }
 0x56f   :  { %v6387_v15 = vpop.f32.mrf.mxu1 }
 0x571   :  { %v6389_v21 = vpop.f32.mrf.mxu1 }
 0x572   :  { %v2433_v14 = vsel %vm476_vm5, %v6389_v21, -inf }
 0x573   :  { %2434 = vmax.xlane.f32.xlu0 %v2433_v14  ;;  %v6393_v27 = vpop.f32.mrf.mxu1  ;;  %v4727_v14 = vpop.f32.mrf.mxu0 }
 0x574   :  { %v2430_v33 = vsel %vm476_vm5, %v6393_v27, -inf }
 0x575   :  { %2431 = vmax.xlane.f32.xlu1 %v2430_v33  ;;  %v6397_v40 = vpop.f32.mrf.mxu1  ;;  %v2469_v33 = vsel %vm476_vm5, %v4724_v38, -inf }
 0x576   :  { %v2439_v30 = vsel %vm476_vm5, %v6397_v40, -inf }
 0x577   :  { %2440 = vmax.xlane.f32.xlu0 %v2439_v30  ;;  %v6401_v13 = vpop.f32.mrf.mxu1  ;;  %v2466_v30 = vsel %vm476_vm5, %v2411_v22, -inf }
 0x578   :  { %v2436_v17 = vsel %vm476_vm5, %v6401_v13, -inf }
 0x579   :  { %2437 = vmax.xlane.f32.xlu1 %v2436_v17  ;;  %v6405_v54 = vpop.f32.mrf.mxu1  ;;  %v2421_v17 = vpop.f32.mrf.mxu0 }
 0x57a   :  { %v2445_v29 = vsel %vm476_vm5, %v6405_v54, -inf }
 0x57b   :  { %2446 = vmax.xlane.f32.xlu0 %v2445_v29  ;;  %v6409_v39 = vpop.f32.mrf.mxu1  ;;  %v2475_v29 = vsel %vm476_vm5, %v4727_v14, -inf }
 0x57c   :  { %v2442_v28 = vsel %vm476_vm5, %v6409_v39, -inf }
 0x57d   :  { %2443 = vmax.xlane.f32.xlu1 %v2442_v28  ;;  %v6413_v37 = vpop.f32.mrf.mxu1  ;;  %v2472_v28 = vsel %vm476_vm5, %v2421_v17, -inf }
 0x57e   :  { %v2451_v60 = vsel %vm476_vm5, %v6413_v37, -inf }
 0x57f   :  { %2452 = vmax.xlane.f32.xlu0 %v2451_v60  ;;  %v6417_v12 = vpop.f32.mrf.mxu1 }
 0x580   :  { %v2448_v34 = vsel %vm476_vm5, %v6417_v12, -inf }
 0x581   :  { %2449 = vmax.xlane.f32.xlu1 %v2448_v34 }
 0x583   :  { %2458 = vmax.xlane.f32.xlu0 %v2457_v43 }
 0x585   :  { %2455 = vmax.xlane.f32.xlu1 %v2454_v4 }
 0x587   :  { %2464 = vmax.xlane.f32.xlu0 %v2463_v46 }
 0x589   :  { %2461 = vmax.xlane.f32.xlu1 %v2460_v7 }
 0x58b   :  { %2470 = vmax.xlane.f32.xlu0 %v2469_v33  ;;  %v7613_v33 = vlaneseq }
 0x58d   :  { %2467 = vmax.xlane.f32.xlu1 %v2466_v30 }
 0x58f   :  { %2476 = vmax.xlane.f32.xlu0 %v2475_v29  ;;  %v6446_v29 = vand.u32 127, %v7613_v33 }
 0x591   :  { %2473 = vmax.xlane.f32.xlu1 %v2472_v28  ;;  %7680 = vst [vmem:[#allocation27_spill] sm:$0xff] %v6446_v29 }
 0x5fc   :  { %v6429_v60 = vpop.xlane.xlu0 %2434 }
 0x5fd   :  { %vm2481_vm15 = vcmp.ge.f32.partialorder %v6389_v21, %v6429_v60 }
 0x5fe   :  { %v6431_v34 = vpop.xlane.xlu1 %2431  ;;  %v2497_v21 = vsel %vm2481_vm15, %v6446_v29, 64 }
 0x5ff   :  { %vm2480_vm0 = vcmp.ge.f32.partialorder %v6393_v27, %v6431_v34  ;;  %v3377_v27 = vld [vmem:[%s7594_s19 + $0xf8] sm:$0xff]  ;;  %v6547_v34 = vadd.f32 %v6331_v24, %v6314_v32  ;;  %v3374_v32 = vld [vmem:[%s7594_s19 + $0xe0] sm:$0xff] }
 0x600   :  { %v6433_v43 = vpop.xlane.xlu0 %2440  ;;  %3378 = vmatprep.subr.mxu0 %v3377_v27 }
 0x601   :  { %vm2483_vm1 = vcmp.ge.f32.partialorder %v6397_v40, %v6433_v43  ;;  %v6540_v40 = vsel %vm476_vm5, %v2497_v21, 2147483647  ;;  %v2802_v27 = vmul.f32 %v6547_v34, %v6547_v34 }
 0x602   :  { %v6435_v4 = vpop.xlane.xlu1 %2437  ;;  %v2499_v43 = vsel %vm2483_vm1, %v6446_v29, 64  ;;  %v2529_v21 = vshra.s32 %v6540_v40, 16 }
 0x603   :  { %vm2482_vm2 = vcmp.ge.f32.partialorder %v6401_v13, %v6435_v4  ;;  %v3375_v13 = vld [vmem:[%s7594_s19 + $0xe8] sm:$0xff] }
 0x604   :  { %v6437_v46 = vpop.xlane.xlu0 %2446 }
 0x605   :  { %vm2485_vm3 = vcmp.ge.f32.partialorder %v6405_v54, %v6437_v46  ;;  %v3373_v54 = vld [vmem:[%s7594_s19 + $0xd8] sm:$0xff]  ;;  %v6573_v46 = vsel %vm476_vm5, %v2499_v43, 2147483647  ;;  %v3370_v43 = vld [vmem:[%s7594_s19 + $0xc0] sm:$0xff] }
 0x606   :  { %v6439_v7 = vpop.xlane.xlu1 %2443 }
 0x608   :  { %v6441_v30 = vpop.xlane.xlu0 %2452 }
 0x60a   :  { %v6443_v18 = vpop.xlane.xlu1 %2449 }
 0x60c   :  { %v2459_v28 = vpop.xlane.xlu0 %2458 }
 0x60d   :  { %vm2489_vm7 = vcmp.ge.f32.partialorder %v4718_v23, %v2459_v28 }
 0x60e   :  { %v2505_v53 = vsel %vm2489_vm7, %v6446_v29, 64  ;;  %v2456_v49 = vpop.xlane.xlu1 %2455  ;;  %vm2484_vm7 = vcmp.ge.f32.partialorder %v6409_v39, %v6439_v7  ;;  %v3371_v39 = vld [vmem:[%s7594_s19 + $0xc8] sm:$0xff] }
 0x60f   :  { %vm2488_vm8 = vcmp.ge.f32.partialorder %v2391_v59, %v2456_v49  ;;  %v6450_v63 = vsel %vm476_vm5, %v2505_v53, 2147483647 }
 0x610   :  { %v2504_v50 = vsel %vm2488_vm8, %v6446_v29, 64  ;;  %v2465_v57 = vpop.xlane.xlu0 %2464  ;;  %v2649_v26 = vshra.s32 %v6450_v63, 16  ;;  %vm2487_vm8 = vcmp.ge.f32.partialorder %v6413_v37, %v6441_v30  ;;  %v3369_v37 = vld [vmem:[%s7594_s19 + $0xb8] sm:$0xff] }
 0x611   :  { %vm2491_vm9 = vcmp.ge.f32.partialorder %v4721_v42, %v2465_v57  ;;  %v6455_v19 = vsel %vm476_vm5, %v2504_v50, 2147483647 }
 0x612   :  { %v2507_v33 = vsel %vm2491_vm9, %v6446_v29, 64  ;;  %v2462_v35 = vpop.xlane.xlu1 %2461  ;;  %v6458_v23 = vcvt.s32.f32 %v2649_v26  ;;  %v2634_v28 = vshra.s32 %v6455_v19, 16  ;;  %vm2486_vm9 = vcmp.ge.f32.partialorder %v6417_v12, %v6443_v18  ;;  %v3367_v18 = vld [vmem:[%s7594_s19 + $0xa8] sm:$0xff] }
 0x613   :  { %vm2490_vm10 = vcmp.ge.f32.partialorder %v2401_v25, %v2462_v35  ;;  %v6462_v49 = vsel %vm476_vm5, %v2507_v33, 2147483647 }
 0x614   :  { %7681 = vst [vmem:[#allocation28_spill] sm:$0xff] %v6458_v23  ;;  %7682 = vst [vmem:[#allocation29_spill] sm:$0xff] %v6462_v49  ;;  %v2506_v53 = vsel %vm2490_vm10, %v6446_v29, 64  ;;  %2652 = vmin.xlane.f32.xlu0 %v6458_v23  ;;  %v2471_v59 = vpop.xlane.xlu0 %2470  ;;  %v6466_v57 = vcvt.s32.f32 %v2634_v28  ;;  %v2679_v50 = vshra.s32 %v6462_v49, 16 }
 0x615   :  { %vm2493_vm11 = vcmp.ge.f32.partialorder %v4724_v38, %v2471_v59  ;;  %v6470_v42 = vsel %vm476_vm5, %v2506_v53, 2147483647 }
 0x616   :  { %v2509_v26 = vsel %vm2493_vm11, %v6446_v29, 64  ;;  %2637 = vmin.xlane.f32.xlu1 %v6466_v57  ;;  %v2468_v35 = vpop.xlane.xlu1 %2467  ;;  %v6474_v25 = vcvt.s32.f32 %v2679_v50  ;;  %v2664_v33 = vshra.s32 %v6470_v42, 16 }
 0x617   :  { %vm2492_vm12 = vcmp.ge.f32.partialorder %v2411_v22, %v2468_v35  ;;  %v6478_v23 = vsel %vm476_vm5, %v2509_v26, 2147483647 }
 0x618   :  { %7683 = vst [vmem:[#allocation30_spill] sm:$0xff] %v6474_v25  ;;  %v2508_v28 = vsel %vm2492_vm12, %v6446_v29, 64  ;;  %2682 = vmin.xlane.f32.xlu0 %v6474_v25  ;;  %v2477_v38 = vpop.xlane.xlu0 %2476  ;;  %v6482_v53 = vcvt.s32.f32 %v2664_v33  ;;  %v2709_v59 = vshra.s32 %v6478_v23, 16 }
 0x619   :  { %vm2495_vm13 = vcmp.ge.f32.partialorder %v4727_v14, %v2477_v38  ;;  %v6486_v49 = vsel %vm476_vm5, %v2508_v28, 2147483647 }
 0x61a   :  { %v2511_v50 = vsel %vm2495_vm13, %v6446_v29, 64  ;;  %2667 = vmin.xlane.f32.xlu1 %v6482_v53  ;;  %v2474_v22 = vpop.xlane.xlu1 %2473  ;;  %v6490_v26 = vcvt.s32.f32 %v2709_v59  ;;  %v2694_v35 = vshra.s32 %v6486_v49, 16 }
 0x61b   :  { %vm2494_vm14 = vcmp.ge.f32.partialorder %v2421_v17, %v2474_v22  ;;  %v6494_v25 = vsel %vm476_vm5, %v2511_v50, 2147483647  ;;  %v6508_v17 = vadd.f32 %v6308_v36, %v6331_v24  ;;  %v6518_v22 = vadd.f32 %v6331_v24, %v6310_v48 }
 0x61c   :  { %v2510_v33 = vsel %vm2494_vm14, %v6446_v29, 64  ;;  %2712 = vmin.xlane.f32.xlu0 %v6490_v26  ;;  %v6498_v14 = vcvt.s32.f32 %v2694_v35  ;;  %v2739_v28 = vshra.s32 %v6494_v25, 16  ;;  %v6528_v36 = vadd.f32 %v6312_v2, %v6331_v24  ;;  %v3376_v2 = vld [vmem:[%s7594_s19 + $0xf0] sm:$0xff] }
 0x61d   :  { %v6504_v38 = vsel %vm476_vm5, %v2510_v33, 2147483647  ;;  %v2496_v35 = vsel %vm2480_vm0, %v6446_v29, 64  ;;  %v2801_v48 = vmul.f32 %v6508_v17, %v6508_v17  ;;  %v2800_v33 = vmul.f32 %v6518_v22, %v6518_v22  ;;  %3379 = vmatpush1.msra.mxu0 %v3376_v2 }
 0x61e   :  { %2697 = vmin.xlane.f32.xlu1 %v6498_v14  ;;  %v6511_v59 = vcvt.s32.f32 %v2739_v28  ;;  %v2724_v50 = vshra.s32 %v6504_v38, 16  ;;  %v6558_v4 = vsel %vm476_vm5, %v2496_v35, 2147483647  ;;  %3380 = vmatprep.subr.mxu0 %v3375_v13  ;;  %v2498_v28 = vsel %vm2482_vm2, %v6446_v29, 64  ;;  %v3372_v35 = vld [vmem:[%s7594_s19 + $0xd0] sm:$0xff] }
 0x61f   :  { %3381 = vmatpush1.msra.mxu0 %v3374_v32  ;;  %v2514_v2 = vshra.s32 %v6558_v4, 16  ;;  %v6588_v7 = vsel %vm476_vm5, %v2498_v28, 2147483647  ;;  %v6594_v13 = vcvt.s32.f32 %v2529_v21  ;;  %v2559_v32 = vshra.s32 %v6573_v46, 16  ;;  %v3368_v28 = vld [vmem:[%s7594_s19 + $0xb0] sm:$0xff] }
 0x620   :  { %7684 = vst [vmem:[#allocation31_spill] sm:$0xff] %v6511_v59  ;;  %2742 = vmin.xlane.f32.xlu0 %v6511_v59  ;;  %v6522_v60 = vcvt.s32.f32 %v2724_v50  ;;  %v2803_v50 = vmul.f32 %v6528_v36, %v6528_v36  ;;  %3382 = vmatprep.subr.mxu0 %v3373_v54  ;;  %v2544_v54 = vshra.s32 %v6588_v7, 16  ;;  %v6722_v59 = vadd.f32 %v6331_v24, %v6360_v10 }
 0x621   :  { %3383 = vmatpush1.msra.mxu0 %v3372_v35  ;;  %v6610_v21 = vcvt.s32.f32 %v2514_v2  ;;  %v3366_v35 = vld [vmem:[%s7594_s19 + $0xa0] sm:$0xff] }
 0x622   :  { %2727 = vmin.xlane.f32.xlu1 %v6522_v60  ;;  %3384 = vmatprep.subr.mxu0 %v3371_v39  ;;  %v3365_v39 = vld [vmem:[%s7594_s19 + $0x98] sm:$0xff]  ;;  %7688 = vst [vmem:[#allocation35_spill] sm:$0xff] %v6722_v59 }
 0x623   :  { %3385 = vmatpush1.msra.mxu0 %v3370_v43 }
 0x624   :  { %2818 = vadd.xlane.f32.xlu0 %v2801_v48  ;;  %v2501_v48 = vsel %vm2485_vm3, %v6446_v29, 64  ;;  %3386 = vmatprep.subr.mxu0 %v3369_v37  ;;  %v6637_v37 = vcvt.s32.f32 %v2544_v54 }
 0x625   :  { %v6603_v30 = vsel %vm476_vm5, %v2501_v48, 2147483647  ;;  %3387 = vmatpush1.msra.mxu0 %v3368_v28  ;;  %v2502_v48 = vsel %vm2486_vm9, %v6446_v29, 64  ;;  %v3363_v28 = vld [vmem:[%s7594_s19 + $0x88] sm:$0xff] }
 0x626   :  { %2816 = vadd.xlane.f32.xlu1 %v2800_v33  ;;  %v2500_v33 = vsel %vm2484_vm7, %v6446_v29, 64  ;;  %3388 = vmatprep.subr.mxu0 %v3367_v18  ;;  %v2589_v2 = vshra.s32 %v6603_v30, 16  ;;  %v6644_v18 = vsel %vm476_vm5, %v2502_v48, 2147483647  ;;  %v3360_v48 = vld [vmem:[%s7594_s19 + $0x70] sm:$0xff] }
 0x627   :  { %v6617_v12 = vsel %vm476_vm5, %v2500_v33, 2147483647  ;;  %3389 = vmatpush1.msra.mxu0 %v3366_v35  ;;  %v3364_v33 = vld [vmem:[%s7594_s19 + $0x90] sm:$0xff] }
 0x628   :  { %2822 = vadd.xlane.f32.xlu0 %v2803_v50  ;;  %v2503_v50 = vsel %vm2487_vm8, %v6446_v29, 64  ;;  %3390 = vmatprep.subr.mxu0 %v3365_v39  ;;  %v6650_v35 = vcvt.s32.f32 %v2589_v2  ;;  %v3361_v39 = vld [vmem:[%s7594_s19 + $0x78] sm:$0xff]  ;;  %v3359_v2 = vld [vmem:[%s7594_s19 + $0x68] sm:$0xff]  ;;  %v6684_v29 = vadd.f32 %v6362_v8, %v6331_v24 }
 0x629   :  { %v6631_v43 = vsel %vm476_vm5, %v2503_v50, 2147483647  ;;  %3391 = vmatpush1.msra.mxu0 %v3364_v33  ;;  %v3362_v50 = vld [vmem:[%s7594_s19 + $0x80] sm:$0xff] }
 0x62a   :  { %2820 = vadd.xlane.f32.xlu1 %v2802_v27  ;;  %v6624_v27 = vcvt.s32.f32 %v2559_v32  ;;  %v2574_v32 = vshra.s32 %v6617_v12, 16  ;;  %3392 = vmatprep.subr.mxu0 %v3363_v28  ;;  %v2619_v54 = vshra.s32 %v6631_v43, 16  ;;  %v2604_v28 = vshra.s32 %v6644_v18, 16  ;;  %7685 = vst [vmem:[#allocation32_spill] sm:$0xff] %v6684_v29 }
 0x62b   :  { %3393 = vmatpush1.msra.mxu0 %v3362_v50  ;;  %v3358_v50 = vld [vmem:[%s7594_s19 + $0x60] sm:$0xff] }
 0x62c   :  { %2532 = vmin.xlane.f32.xlu0 %v6594_v13  ;;  %3394 = vmatprep.subr.mxu0 %v3361_v39  ;;  %v6660_v33 = vcvt.s32.f32 %v2574_v32  ;;  %v6671_v39 = vadd.f32 %v6331_v24, %v6318_v56  ;;  %v6674_v32 = vcvt.s32.f32 %v2619_v54  ;;  %v6687_v56 = vcvt.s32.f32 %v2604_v28  ;;  %v3355_v54 = vld [vmem:[%s7594_s19 + $0x48] sm:$0xff]  ;;  %v3353_v28 = vld [vmem:[%s7594_s19 + $0x38] sm:$0xff] }
 0x62d   :  { %3395 = vmatpush1.msra.mxu0 %v3360_v48  ;;  %v3357_v48 = vld [vmem:[%s7594_s19 + $0x58] sm:$0xff] }
 0x62e   :  { %2517 = vmin.xlane.f32.xlu1 %v6610_v21  ;;  %3396 = vmatprep.subr.mxu0 %v3359_v2  ;;  %v3356_v2 = vld [vmem:[%s7594_s19 + $0x50] sm:$0xff]  ;;  %v2804_v8 = vmul.f32 %v6671_v39, %v6671_v39 }
 0x62f   :  { %3397 = vmatpush1.msra.mxu0 %v3358_v50  ;;  %v3354_v50 = vld [vmem:[%s7594_s19 + $0x40] sm:$0xff] }
 0x630   :  { %2562 = vmin.xlane.f32.xlu0 %v6624_v27  ;;  %3398 = vmatprep.subr.mxu0 %v3357_v48  ;;  %v6697_v48 = vadd.f32 %v6358_v0, %v6331_v24  ;;  %v2903_v0 = vmul.f32 %v6684_v29, %v6684_v29 }
 0x631   :  { %3399 = vmatpush1.msra.mxu0 %v3356_v2  ;;  %v3352_v2 = vld [vmem:[%s7594_s19 + $0x30] sm:$0xff] }
 0x632   :  { %2547 = vmin.xlane.f32.xlu1 %v6637_v37  ;;  %3400 = vmatprep.subr.mxu0 %v3355_v54  ;;  %7686 = vst [vmem:[#allocation33_spill] sm:$0xff] %v6697_v48  ;;  %v6710_v54 = vadd.f32 %v6331_v24, %v6364_v31  ;;  %v2901_v31 = vmul.f32 %v6697_v48, %v6697_v48 }
 0x633   :  { %3401 = vmatpush1.msra.mxu0 %v3354_v50  ;;  %v3351_v50 = vld [vmem:[%s7594_s19 + $0x28] sm:$0xff] }
 0x634   :  { %2592 = vmin.xlane.f32.xlu0 %v6650_v35  ;;  %3402 = vmatprep.subr.mxu0 %v3353_v28  ;;  %7687 = vst [vmem:[#allocation34_spill] sm:$0xff] %v6710_v54  ;;  %v3350_v28 = vld [vmem:[%s7594_s19 + $0x20] sm:$0xff]  ;;  %v2902_v10 = vmul.f32 %v6710_v54, %v6710_v54 }
 0x635   :  { %3403 = vmatpush1.msra.mxu0 %v3352_v2  ;;  %v3348_v2 = vld [vmem:[%s7594_s19 + $0x10] sm:$0xff] }
 0x636   :  { %2577 = vmin.xlane.f32.xlu1 %v6660_v33  ;;  %3404 = vmatprep.subr.mxu0 %v3351_v50  ;;  %v6734_v50 = vadd.f32 %v6316_v47, %v6331_v24  ;;  %v2900_v47 = vmul.f32 %v6722_v59, %v6722_v59 }
 0x637   :  { %3405 = vmatpush1.msra.mxu0 %v3350_v28  ;;  %v3346_v28 = vld [vmem:[%s7594_s19] sm:$0xff] }
 0x638   :  { %2622 = vmin.xlane.f32.xlu0 %v6674_v32 }
 0x63a   :  { %2607 = vmin.xlane.f32.xlu1 %v6687_v56 }
 0x63c   :  { %2824 = vadd.xlane.f32.xlu0 %v2804_v8  ;;  %v3349_v8 = vld [vmem:[%s7594_s19 + $0x18] sm:$0xff] }
 0x63d   :  { %3406 = vmatprep.subr.mxu0 %v3349_v8  ;;  %v6746_v8 = vadd.f32 %v6331_v24, %v6322_v41 }
 0x63e   :  { %2926 = vadd.xlane.f32.xlu1 %v2903_v0  ;;  %3407 = vmatpush1.msra.mxu0 %v3348_v2  ;;  %v3347_v0 = vld [vmem:[%s7594_s19 + $0x8] sm:$0xff]  ;;  %v2805_v2 = vmul.f32 %v6734_v50, %v6734_v50 }
 0x63f   :  { %3408 = vmatprep.subr.mxu0 %v3347_v0  ;;  %v6758_v0 = vadd.f32 %v6350_v1, %v6331_v24  ;;  %v2806_v41 = vmul.f32 %v6746_v8, %v6746_v8 }
 0x640   :  { %2922 = vadd.xlane.f32.xlu0 %v2901_v31  ;;  %3409 = vmatpush1.msra.mxu0 %v3346_v28  ;;  %v6752_v31 = vadd.f32 %v6354_v44, %v6331_v24  ;;  %v6770_v28 = vadd.f32 %v6331_v24, %v6352_v6 }
 0x641   :  { %v2897_v1 = vmul.f32 %v6758_v0, %v6758_v0 }
 0x642   :  { %2924 = vadd.xlane.f32.xlu1 %v2902_v10  ;;  %7689 = vst [vmem:[#allocation36_spill] sm:$0xff] %v6752_v31  ;;  %v6764_v10 = vadd.f32 %v6331_v24, %v6356_v52  ;;  %v2899_v44 = vmul.f32 %v6752_v31, %v6752_v31  ;;  %v2896_v6 = vmul.f32 %v6770_v28, %v6770_v28 }
 0x644   :  { %2920 = vadd.xlane.f32.xlu0 %v2900_v47  ;;  %v6776_v47 = vadd.f32 %v6320_v58, %v6331_v24  ;;  %v2898_v52 = vmul.f32 %v6764_v10, %v6764_v10 }
 0x646   :  { %2826 = vadd.xlane.f32.xlu1 %v2805_v2  ;;  %v6782_v2 = vadd.f32 %v6331_v24, %v6326_v62  ;;  %v2807_v58 = vmul.f32 %v6776_v47, %v6776_v47 }
 0x648   :  { %2828 = vadd.xlane.f32.xlu0 %v2806_v41  ;;  %7690 = vst [vmem:[#allocation37_spill] sm:$0xff] %v6782_v2  ;;  %v6788_v41 = vadd.f32 %v6383_v16, %v6331_v24  ;;  %v2808_v62 = vmul.f32 %v6782_v2, %v6782_v2 }
 0x64a   :  { %2918 = vadd.xlane.f32.xlu1 %v2899_v44  ;;  %7691 = vst [vmem:[#allocation38_spill] sm:$0xff] %v6788_v41  ;;  %v6794_v44 = vadd.f32 %v6377_v45, %v6331_v24  ;;  %v2911_v16 = vmul.f32 %v6788_v41, %v6788_v41 }
 0x64c   :  { %2914 = vadd.xlane.f32.xlu0 %v2897_v1  ;;  %7692 = vst [vmem:[#allocation39_spill] sm:$0xff] %v6794_v44  ;;  %v6800_v1 = vadd.f32 %v6331_v24, %v6387_v15  ;;  %v2909_v45 = vmul.f32 %v6794_v44, %v6794_v44 }
 0x64e   :  { %2916 = vadd.xlane.f32.xlu1 %v2898_v52  ;;  %7693 = vst [vmem:[#allocation40_spill] sm:$0xff] %v6800_v1  ;;  %v6806_v52 = vadd.f32 %v6331_v24, %v6381_v20  ;;  %v2910_v15 = vmul.f32 %v6800_v1, %v6800_v1 }
 0x650   :  { %2912 = vadd.xlane.f32.xlu0 %v2896_v6  ;;  %7694 = vst [vmem:[#allocation41_spill] sm:$0xff] %v6806_v52  ;;  %v6812_v6 = vadd.f32 %v6324_v9, %v6331_v24  ;;  %v2908_v20 = vmul.f32 %v6806_v52, %v6806_v52 }
 0x652   :  { %2830 = vadd.xlane.f32.xlu1 %v2807_v58  ;;  %7695 = vst [vmem:[#allocation42_spill] sm:$0xff] %v6812_v6  ;;  %v6818_v58 = vadd.f32 %v6331_v24, %v6336_v3  ;;  %v2809_v9 = vmul.f32 %v6812_v6, %v6812_v6 }
 0x654   :  { %2832 = vadd.xlane.f32.xlu0 %v2808_v62  ;;  %7696 = vst [vmem:[#allocation43_spill] sm:$0xff] %v6818_v58  ;;  %v6824_v62 = vadd.f32 %v6372_v51, %v6331_v24  ;;  %v2906_v24 = vmul.f32 %v6375_v55, %v6375_v55  ;;  %v2904_v51 = vmul.f32 %v6370_v11, %v6370_v11 }
 0x656   :  { %2942 = vadd.xlane.f32.xlu1 %v2911_v16  ;;  %7697 = vst [vmem:[#allocation44_spill] sm:$0xff] %v6824_v62  ;;  %v2810_v16 = vmul.f32 %v6818_v58, %v6818_v58  ;;  %v2907_v3 = vmul.f32 %v6824_v62, %v6824_v62  ;;  %v2513_v58 = vand.u32 65535, %v6558_v4 }
 0x658   :  { %2938 = vadd.xlane.f32.xlu0 %v2909_v45  ;;  %v2905_v45 = vmul.f32 %v6367_v61, %v6367_v61 }
 0x65a   :  { %2940 = vadd.xlane.f32.xlu1 %v2910_v15  ;;  %v2811_v15 = vmul.f32 %v6334_v5, %v6334_v5 }
 0x65c   :  { %2936 = vadd.xlane.f32.xlu0 %v2908_v20  ;;  %v7698_v20 = vld [vmem:[#allocation18_spill] sm:$0xff] }
 0x65e   :  { %2834 = vadd.xlane.f32.xlu1 %v2809_v9  ;;  %v2813_v9 = vmul.f32 %v7698_v20, %v7698_v20 }
 0x660   :  { %2836 = vadd.xlane.f32.xlu0 %v2810_v16  ;;  %v7699_v16 = vld [vmem:[#allocation19_spill] sm:$0xff] }
 0x662   :  { %2934 = vadd.xlane.f32.xlu1 %v2907_v3  ;;  %v2812_v3 = vmul.f32 %v7699_v16, %v7699_v16  ;;  %v2528_v16 = vand.u32 65535, %v6540_v40 }
 0x664   :  { %2930 = vadd.xlane.f32.xlu0 %v2905_v45  ;;  %v7700_v45 = vld [vmem:[#allocation21_spill] sm:$0xff]  ;;  %v2530_v2 = vcvt.s32.f32 %v2528_v16 }
 0x665   :  { %v2814_v61 = vmul.f32 %v7700_v45, %v7700_v45 }
 0x666   :  { %2932 = vadd.xlane.f32.xlu1 %v2906_v24 }
 0x668   :  { %2928 = vadd.xlane.f32.xlu0 %v2904_v51 }
 0x66a   :  { %2838 = vadd.xlane.f32.xlu1 %v2811_v15 }
 0x66c   :  { %2842 = vadd.xlane.f32.xlu0 %v2813_v9 }
 0x66e   :  { %2840 = vadd.xlane.f32.xlu1 %v2812_v3 }
 0x672   :  { %2844 = vadd.xlane.f32.xlu1 %v2814_v61 }
 0x69d   :  { %v6846_v24 = vpop.xlane.xlu0 %2652 }
 0x69f   :  { %v6848_v11 = vpop.xlane.xlu1 %2637 }
 0x6a0   :  { %vm2639_vm0 = vcmp.eq.f32.partialorder %v6466_v57, %v6848_v11  ;;  %v7702_v57 = vld [vmem:[#allocation28_spill] sm:$0xff] }
 0x6a1   :  { %v6850_v51 = vpop.xlane.xlu0 %2682  ;;  %vm2654_vm2 = vcmp.eq.f32.partialorder %v7702_v57, %v6846_v24 }
 0x6a3   :  { %v6852_v55 = vpop.xlane.xlu1 %2667 }
 0x6a4   :  { %vm2669_vm7 = vcmp.eq.f32.partialorder %v6482_v53, %v6852_v55  ;;  %v4118_v53 = vld [vmem:[%s7588_s13] ss:$0 sm:$0xff] }
 0x6a5   :  { %v6854_v15 = vpop.xlane.xlu0 %2712 }
 0x6a7   :  { %v6856_v62 = vpop.xlane.xlu1 %2697 }
 0x6a8   :  { %vm2699_vm8 = vcmp.eq.f32.partialorder %v6498_v14, %v6856_v62 }
 0x6a9   :  { %v6858_v9 = vpop.xlane.xlu0 %2742 }
 0x6ab   :  { %v6860_v52 = vpop.xlane.xlu1 %2727 }
 0x6ad   :  { %v2819_v3 = vpop.xlane.xlu0 %2818 }
 0x6ae   :  { %v2849_v44 = vadd.f32 1e-24, %v2819_v3 }
 0x6af   :  { %v2817_v1 = vpop.xlane.xlu1 %2816 }
 0x6b0   :  { %4875 = vrsqrt.f32 %v2849_v44  ;;  %v2848_v61 = vadd.f32 1e-24, %v2817_v1  ;;  %v2558_v44 = vand.u32 65535, %v6573_v46  ;;  %v2543_v1 = vand.u32 65535, %v6588_v7 }
 0x6b1   :  { %v2823_v45 = vpop.xlane.xlu0 %2822  ;;  %v2573_v46 = vand.u32 65535, %v6617_v12 }
 0x6b2   :  { %4877 = vrsqrt.f32 %v2848_v61  ;;  %v2851_v20 = vadd.f32 1e-24, %v2823_v45  ;;  %v2515_v45 = vcvt.s32.f32 %v2513_v58 }
 0x6b3   :  { %v2821_v5 = vpop.xlane.xlu1 %2820 }
 0x6b4   :  { %4879 = vrsqrt.f32 %v2851_v20  ;;  %v2850_v6 = vadd.f32 1e-24, %v2821_v5 }
 0x6b5   :  { %v6864_v41 = vpop.xlane.xlu0 %2532 }
 0x6b6   :  { %4881 = vrsqrt.f32 %v2850_v6  ;;  %vm2534_vm10 = vcmp.eq.f32.partialorder %v6594_v13, %v6864_v41  ;;  %v2588_v13 = vand.u32 65535, %v6603_v30  ;;  %v2560_v6 = vcvt.s32.f32 %v2558_v44 }
 0x6b7   :  { %v6870_v3 = vpop.xlane.xlu1 %2517  ;;  %v2535_v40 = vsel %vm2534_vm10, %v2530_v2, inf  ;;  %v2545_v2 = vcvt.s32.f32 %v2543_v1  ;;  %v2633_v1 = vand.u32 65535, %v6455_v19  ;;  %vm2729_vm10 = vcmp.eq.f32.partialorder %v6522_v60, %v6860_v52 }
 0x6b8   :  { %2536 = vmin.xlane.f32.xlu1 %v2535_v40  ;;  %vm2519_vm11 = vcmp.eq.f32.partialorder %v6610_v21, %v6870_v3  ;;  %v2590_v44 = vcvt.s32.f32 %v2588_v13  ;;  %v7701_v13 = vmov 0.0  }
 0x6b9   :  { %v6874_v5 = vpop.xlane.xlu0 %2562  ;;  %v2520_v4 = vsel %vm2519_vm11, %v2515_v45, inf  ;;  %vm2714_vm11 = vcmp.eq.f32.partialorder %v6490_v26, %v6854_v15 }
 0x6ba   :  { %2521 = vmin.xlane.f32.xlu0 %v2520_v4  ;;  %vm2564_vm12 = vcmp.eq.f32.partialorder %v6624_v27, %v6874_v5  ;;  %v2603_v27 = vand.u32 65535, %v6644_v18  ;;  %v2648_v18 = vand.u32 65535, %v6450_v63 }
 0x6bb   :  { %v6880_v7 = vpop.xlane.xlu1 %2547  ;;  %v2565_v20 = vsel %vm2564_vm12, %v2560_v6, inf  ;;  %v2618_v6 = vand.u32 65535, %v6631_v43  ;;  %v2663_v43 = vand.u32 65535, %v6470_v42  ;;  %v2693_v42 = vand.u32 65535, %v6486_v49 }
 0x6bc   :  { %vm2549_vm13 = vcmp.eq.f32.partialorder %v6637_v37, %v6880_v7  ;;  %v2575_v37 = vcvt.s32.f32 %v2573_v46  ;;  %v2605_v46 = vcvt.s32.f32 %v2603_v27 }
 0x6bd   :  { %v4876_v58 = vpop.eup %4875  ;;  %v6884_v21 = vpop.xlane.xlu0 %2592  ;;  %v2550_v16 = vsel %vm2549_vm13, %v2545_v2, inf  ;;  %v2635_v2 = vcvt.s32.f32 %v2633_v1  ;;  %v2620_v27 = vcvt.s32.f32 %v2618_v6  ;;  %v2695_v57 = vcvt.s32.f32 %v2693_v42 }
 0x6be   :  { %2566 = vmin.xlane.f32.xlu0 %v2565_v20  ;;  %2551 = vmin.xlane.f32.xlu1 %v2550_v16  ;;  %vm2594_vm14 = vcmp.eq.f32.partialorder %v6650_v35, %v6884_v21  ;;  %v6889_v30 = vmul.f32 %v4876_v58, %v6508_v17 }
 0x6bf   :  { %v4878_v12 = vpop.eup %4877  ;;  %v6892_v61 = vpop.xlane.xlu1 %2577  ;;  %v2595_v45 = vsel %vm2594_vm14, %v2590_v44, inf  ;;  %v2640_v16 = vsel %vm2639_vm0, %v2635_v2, inf  ;;  %v2700_v14 = vsel %vm2699_vm8, %v2695_v57, inf }
 0x6c0   :  { %v6896_v40 = vmul.f32 %v4878_v12, %v6518_v22  ;;  %vm2579_vm15 = vcmp.eq.f32.partialorder %v6660_v33, %v6892_v61  ;;  %3251 = vst [vmem:[#allocation8 + $0x8] sm:$0xff] %v6889_v30 }
 0x6c1   :  { %v4880_v35 = vpop.eup %4879  ;;  %v6901_v17 = vpop.xlane.xlu0 %2622  ;;  %v2580_v4 = vsel %vm2579_vm15, %v2575_v37, inf }
 0x6c2   :  { %3250 = vst [vmem:[#allocation8] sm:$0xff] %v6896_v40  ;;  %3443 = vmatmul.mubr.f32.vlgmr.msra.gmra.mxu0 %v6896_v40  ;;  %2596 = vmin.xlane.f32.xlu1 %v2595_v45  ;;  %v6906_v19 = vmul.f32 %v4880_v35, %v6528_v36  ;;  %vm2624_vm3 = vcmp.eq.f32.partialorder %v6674_v32, %v6901_v17  ;;  %v2665_v32 = vcvt.s32.f32 %v2663_v43  ;;  %v2708_v43 = vand.u32 65535, %v6478_v23 }
 0x6c3   :  { %v4882_v22 = vpop.eup %4881  ;;  %2581 = vmin.xlane.f32.xlu0 %v2580_v4  ;;  %v6909_v33 = vpop.xlane.xlu1 %2607  ;;  %3448 = vmatprep.mubr.f32.mxu0 %v7701_v13  ;;  %v2625_v35 = vsel %vm2624_vm3, %v2620_v27, inf  ;;  %v7703_v4 = vld [vmem:[#allocation29_spill] sm:$0xff] }
 0x6c4   :  { %vm2609_vm1 = vcmp.eq.f32.partialorder %v6687_v56, %v6909_v33  ;;  %v6918_v36 = vmul.f32 %v4882_v22, %v6547_v34  ;;  %3253 = vst [vmem:[#allocation8 + $0x18] sm:$0xff] %v6906_v19  ;;  %v2650_v34 = vcvt.s32.f32 %v2648_v18  ;;  %v2678_v22 = vand.u32 65535, %v7703_v4 }
 0x6c5   :  { %v2825_v63 = vpop.xlane.xlu0 %2824  ;;  %v2610_v58 = vsel %vm2609_vm1, %v2605_v46, inf  ;;  %v7704_v46 = vld [vmem:[#allocation20_spill] sm:$0xff] }
 0x6c6   :  { %v2852_v20 = vadd.f32 1e-24, %v2825_v63  ;;  %3449 = vmatmul.mubr.f32.gmra.mxu0 %v6889_v30  ;;  %2611 = vmin.xlane.f32.xlu1 %v2610_v58  ;;  %3252 = vst [vmem:[#allocation8 + $0x10] sm:$0xff] %v6918_v36  ;;  %v2655_v37 = vsel %vm2654_vm2, %v2650_v34, inf  ;;  %v2815_v6 = vmul.f32 %v7704_v46, %v7704_v46  ;;  %v2670_v63 = vsel %vm2669_vm7, %v2665_v32, inf }
 0x6c7   :  { %2641 = vmin.xlane.f32.xlu0 %v2640_v16  ;;  %v2927_v56 = vpop.xlane.xlu1 %2926  ;;  %3454 = vmatprep.mubr.f32.mxu0 %v7701_v13  ;;  %v2723_v58 = vand.u32 65535, %v6504_v38  ;;  %v7705_v16 = vld [vmem:[#allocation30_spill] sm:$0xff]  ;;  %v2680_v34 = vcvt.s32.f32 %v2678_v22 }
 0x6c8   :  { %4883 = vrsqrt.f32 %v2852_v20  ;;  %v2951_v12 = vadd.f32 1e-24, %v2927_v56  ;;  %vm2684_vm9 = vcmp.eq.f32.partialorder %v7705_v16, %v6850_v51 }
 0x6c9   :  { %v2923_v44 = vpop.xlane.xlu0 %2922  ;;  %v2725_v23 = vcvt.s32.f32 %v2723_v58 }
 0x6ca   :  { %4885 = vrsqrt.f32 %v2951_v12  ;;  %v2949_v1 = vadd.f32 1e-24, %v2923_v44  ;;  %3455 = vmatmul.mubr.f32.gmra.mxu0 %v6918_v36  ;;  %2656 = vmin.xlane.f32.xlu1 %v2655_v37  ;;  %v7706_v12 = vld [vmem:[#allocation16_spill] sm:$0xff]  ;;  %v2685_v37 = vsel %vm2684_vm9, %v2680_v34, inf }
 0x6cb   :  { %2626 = vmin.xlane.f32.xlu0 %v2625_v35  ;;  %v2925_v45 = vpop.xlane.xlu1 %2924  ;;  %3460 = vmatprep.mubr.f32.mxu0 %v7701_v13  ;;  %v6949_v27 = vadd.f32 %v4118_v53, %v7706_v12  ;;  %v2738_v35 = vand.u32 65535, %v6494_v25  ;;  %v7707_v25 = vld [vmem:[#allocation31_spill] sm:$0xff] }
 0x6cc   :  { %v2950_v18 = vadd.f32 1e-24, %v2925_v45  ;;  %4887 = vrsqrt.f32 %v2949_v1  ;;  %v2710_v45 = vcvt.s32.f32 %v2708_v43  ;;  %vm2744_vm12 = vcmp.eq.f32.partialorder %v7707_v25, %v6858_v9 }
 0x6cd   :  { %v2921_v2 = vpop.xlane.xlu0 %2920  ;;  %v1709_v4 = vmul.f32 %v6949_v27, %v6949_v27 }
 0x6ce   :  { %4889 = vrsqrt.f32 %v2950_v18  ;;  %v2948_v49 = vadd.f32 1e-24, %v2921_v2  ;;  %3461 = vmatmul.mubr.f32.gmra.mxu0 %v6906_v19  ;;  %2671 = vmin.xlane.f32.xlu1 %v2670_v63  ;;  %v2730_v18 = vsel %vm2729_vm10, %v2725_v23, inf  ;;  %v2715_v60 = vsel %vm2714_vm11, %v2710_v45, inf }
 0x6cf   :  { %2846 = vadd.xlane.f32.xlu0 %v2815_v6  ;;  %v2827_v20 = vpop.xlane.xlu1 %2826  ;;  %3466 = vmatprep.mubr.f32.mxu0 %v7701_v13  ;;  %v1710_v16 = vsel %vm1702_vm6, %v1709_v4, 0.0 }
 0x6d0   :  { %4891 = vrsqrt.f32 %v2948_v49  ;;  %v2853_v56 = vadd.f32 1e-24, %v2827_v20  ;;  %v2740_v49 = vcvt.s32.f32 %v2738_v35 }
 0x6d1   :  { %v2829_v44 = vpop.xlane.xlu0 %2828 }
 0x6d2   :  { %4893 = vrsqrt.f32 %v2853_v56  ;;  %v2854_v38 = vadd.f32 1e-24, %v2829_v44  ;;  %2701 = vmin.xlane.f32.xlu1 %v2700_v14  ;;  %v2745_v43 = vsel %vm2744_vm12, %v2740_v49, inf }
 0x6d3   :  { %2686 = vmin.xlane.f32.xlu0 %v2685_v37  ;;  %v2919_v1 = vpop.xlane.xlu1 %2918 }
 0x6d4   :  { %4895 = vrsqrt.f32 %v2854_v38  ;;  %v2947_v42 = vadd.f32 1e-24, %v2919_v1 }
 0x6d5   :  { %v4884_v32 = vpop.eup %4883  ;;  %v2915_v22 = vpop.xlane.xlu0 %2914 }
 0x6d6   :  { %4897 = vrsqrt.f32 %v2947_v42  ;;  %v2945_v6 = vadd.f32 1e-24, %v2915_v22  ;;  %2731 = vmin.xlane.f32.xlu1 %v2730_v18  ;;  %v6959_v2 = vmul.f32 %v4884_v32, %v6671_v39 }
 0x6d7   :  { %v4886_v26 = vpop.eup %4885  ;;  %2716 = vmin.xlane.f32.xlu0 %v2715_v60  ;;  %v2917_v63 = vpop.xlane.xlu1 %2916 }
 0x6d8   :  { %v2946_v53 = vadd.f32 1e-24, %v2917_v63  ;;  %3254 = vst [vmem:[#allocation8 + $0x20] sm:$0xff] %v6959_v2  ;;  %3467 = vmatmul.mubr.f32.gmra.mxu0 %v6959_v2  ;;  %v2983_v58 = vmul.f32 %v4886_v26, %v6684_v29  ;;  %4899 = vrsqrt.f32 %v2945_v6 }
 0x6d9   :  { %v2913_v20 = vpop.xlane.xlu0 %2912  ;;  %3472 = vmatprep.mubr.f32.mxu0 %v7701_v13  ;;  %v4888_v39 = vpop.eup %4887 }
 0x6da   :  { %4901 = vrsqrt.f32 %v2946_v53  ;;  %v2944_v57 = vadd.f32 1e-24, %v2913_v20  ;;  %1711 = vadd.xlane.f32.xlu1 %v1710_v16  ;;  %4728 = vmatprep.subr.mxu1 %v2983_v58  ;;  %v2981_v1 = vmul.f32 %v4888_v39, %v6697_v48 }
 0x6db   :  { %v4890_v56 = vpop.eup %4889  ;;  %2746 = vmin.xlane.f32.xlu0 %v2745_v43  ;;  %4729 = vmatpush3.msra.mxu1 %v2983_v58  ;;  %v2831_v34 = vpop.xlane.xlu1 %2830 }
 0x6dc   :  { %4903 = vrsqrt.f32 %v2944_v57  ;;  %v2855_v12 = vadd.f32 1e-24, %v2831_v34  ;;  %v2982_v44 = vmul.f32 %v4890_v56, %v6710_v54 }
 0x6dd   :  { %v4892_v14 = vpop.eup %4891  ;;  %v2833_v38 = vpop.xlane.xlu0 %2832 }
 0x6de   :  { %4905 = vrsqrt.f32 %v2855_v12  ;;  %v2856_v37 = vadd.f32 1e-24, %v2833_v38  ;;  %4730 = vmatprep.subr.mxu1 %v2982_v44  ;;  %v2980_v45 = vmul.f32 %v4892_v14, %v6722_v59  ;;  %v7708_v14 = vld [vmem:[#allocation37_spill] sm:$0xff] }
 0x6df   :  { %v4894_v23 = vpop.eup %4893  ;;  %4731 = vmatpush3.msra.mxu1 %v2982_v44  ;;  %v2943_v35 = vpop.xlane.xlu1 %2942 }
 0x6e0   :  { %4907 = vrsqrt.f32 %v2856_v37  ;;  %v2959_v42 = vadd.f32 1e-24, %v2943_v35  ;;  %4732 = vmatprep.subr.mxu1 %v2981_v1  ;;  %v6972_v32 = vmul.f32 %v4894_v23, %v6734_v50  ;;  %v7709_v23 = vld [vmem:[#allocation38_spill] sm:$0xff] }
 0x6e1   :  { %v4896_v4 = vpop.eup %4895  ;;  %v6974_v22 = vpop.xlane.xlu0 %2938  ;;  %4733 = vmatpush3.msra.mxu1 %v2981_v1 }
 0x6e2   :  { %4909 = vrsqrt.f32 %v2959_v42  ;;  %4734 = vmatprep.subr.mxu1 %v2980_v45  ;;  %3255 = vst [vmem:[#allocation8 + $0x28] sm:$0xff] %v6972_v32  ;;  %3473 = vmatmul.mubr.f32.gmra.mxu0 %v6972_v32  ;;  %v6979_v18 = vmul.f32 %v4896_v4, %v6746_v8 }
 0x6e3   :  { %v4898_v6 = vpop.eup %4897  ;;  %4735 = vmatpush3.msra.mxu1 %v2980_v45  ;;  %v6981_v60 = vpop.xlane.xlu1 %2940  ;;  %3478 = vmatprep.mubr.f32.mxu0 %v7701_v13 }
 0x6e4   :  { %v2979_v50 = vmul.f32 %v4898_v6, %v6752_v31  ;;  %3256 = vst [vmem:[#allocation8 + $0x30] sm:$0xff] %v6979_v18 }
 0x6e5   :  { %v6986_v26 = vpop.xlane.xlu0 %2936  ;;  %v4900_v63 = vpop.eup %4899 }
 0x6e6   :  { %4736 = vmatprep.subr.mxu1 %v2979_v50  ;;  %3479 = vmatmul.mubr.f32.gmra.mxu0 %v6979_v18  ;;  %v2977_v39 = vmul.f32 %v4900_v63, %v6758_v0 }
 0x6e7   :  { %v4902_v25 = vpop.eup %4901  ;;  %4737 = vmatpush3.msra.mxu1 %v2979_v50  ;;  %v2835_v8 = vpop.xlane.xlu1 %2834  ;;  %3484 = vmatprep.mubr.f32.mxu0 %v7701_v13 }
 0x6e8   :  { %v2857_v53 = vadd.f32 1e-24, %v2835_v8  ;;  %v2978_v49 = vmul.f32 %v4902_v25, %v6764_v10  ;;  %v7710_v8 = vld [vmem:[#allocation42_spill] sm:$0xff] }
 0x6e9   :  { %v4904_v58 = vpop.eup %4903  ;;  %v2837_v20 = vpop.xlane.xlu0 %2836 }
 0x6ea   :  { %4911 = vrsqrt.f32 %v2857_v53  ;;  %v2858_v16 = vadd.f32 1e-24, %v2837_v20  ;;  %4738 = vmatprep.subr.mxu1 %v2978_v49  ;;  %v2976_v56 = vmul.f32 %v4904_v58, %v6770_v28  ;;  %v7711_v58 = vld [vmem:[#allocation43_spill] sm:$0xff] }
 0x6eb   :  { %v4906_v57 = vpop.eup %4905  ;;  %4739 = vmatpush3.msra.mxu1 %v2978_v49  ;;  %v6992_v43 = vpop.xlane.xlu1 %2934 }
 0x6ec   :  { %4913 = vrsqrt.f32 %v2858_v16  ;;  %4740 = vmatprep.subr.mxu1 %v2977_v39  ;;  %v6996_v34 = vmul.f32 %v4906_v57, %v6776_v47 }
 0x6ed   :  { %v4908_v12 = vpop.eup %4907  ;;  %v6998_v44 = vpop.xlane.xlu0 %2930  ;;  %4741 = vmatpush3.msra.mxu1 %v2977_v39 }
 0x6ee   :  { %4742 = vmatprep.subr.mxu1 %v2976_v56  ;;  %3257 = vst [vmem:[#allocation8 + $0x38] sm:$0xff] %v6996_v34  ;;  %3485 = vmatmul.mubr.f32.gmra.mxu0 %v6996_v34  ;;  %v7003_v38 = vmul.f32 %v4908_v12, %v7708_v14 }
 0x6ef   :  { %v4910_v37 = vpop.eup %4909  ;;  %4743 = vmatpush3.msra.mxu1 %v2976_v56  ;;  %v2933_v1 = vpop.xlane.xlu1 %2932  ;;  %3490 = vmatprep.mubr.f32.mxu0 %v7701_v13  ;;  %v7712_v56 = vld [vmem:[#allocation17_spill] sm:$0xff] }
 0x6f0   :  { %v7007_v47 = vmul.f32 %v4910_v37, %v7709_v23  ;;  %3258 = vst [vmem:[#allocation8 + $0x40] sm:$0xff] %v7003_v38  ;;  %v7713_v37 = vld [vmem:[#allocation18_spill] sm:$0xff] }
 0x6f1   :  { %v7010_v35 = vpop.xlane.xlu0 %2928 }
 0x6f2   :  { %4756 = vmatprep.subr.mxu1 %v7007_v47  ;;  %3491 = vmatmul.mubr.f32.gmra.mxu0 %v7003_v38 }
 0x6f3   :  { %v2839_v42 = vpop.xlane.xlu1 %2838  ;;  %3496 = vmatprep.mubr.f32.mxu0 %v7701_v13 }
 0x6f4   :  { %v2859_v45 = vadd.f32 1e-24, %v2839_v42 }
 0x6f5   :  { %v2843_v4 = vpop.xlane.xlu0 %2842 }
 0x6f6   :  { %4915 = vrsqrt.f32 %v2859_v45  ;;  %v2861_v6 = vadd.f32 1e-24, %v2843_v4  ;;  %v7714_v4 = vld [vmem:[#allocation19_spill] sm:$0xff] }
 0x6f7   :  { %v4912_v50 = vpop.eup %4911  ;;  %v2841_v63 = vpop.xlane.xlu1 %2840 }
 0x6f8   :  { %4917 = vrsqrt.f32 %v2861_v6  ;;  %v2860_v25 = vadd.f32 1e-24, %v2841_v63  ;;  %v7016_v53 = vmul.f32 %v4912_v50, %v7710_v8  ;;  %v7715_v63 = vld [vmem:[#allocation21_spill] sm:$0xff]  ;;  %v2958_v8 = vadd.f32 1e-24, %v6981_v60 }
 0x6f9   :  { %v4914_v49 = vpop.eup %4913  ;;  %v2953_v60 = vadd.f32 1e-24, %v6998_v44 }
 0x6fa   :  { %4919 = vrsqrt.f32 %v2860_v25  ;;  %3259 = vst [vmem:[#allocation8 + $0x48] sm:$0xff] %v7016_v53  ;;  %3497 = vmatmul.mubr.f32.gmra.mxu0 %v7016_v53  ;;  %v7021_v20 = vmul.f32 %v4914_v49, %v7711_v58  ;;  %v2957_v49 = vadd.f32 1e-24, %v6974_v22  ;;  %v2956_v58 = vadd.f32 1e-24, %v6986_v26 }
 0x6fb   :  { %v2845_v16 = vpop.xlane.xlu1 %2844  ;;  %3502 = vmatprep.mubr.f32.mxu0 %v7701_v13  ;;  %v2554_v26 = vcvt.f32.s32 %v6880_v7 }
 0x6fc   :  { %v2862_v39 = vadd.f32 1e-24, %v2845_v16  ;;  %3260 = vst [vmem:[#allocation8 + $0x50] sm:$0xff] %v7021_v20  ;;  %v2955_v16 = vadd.f32 1e-24, %v6992_v43 }
 0x6fd   :  { %v2952_v43 = vadd.f32 1e-24, %v7010_v35 }
 0x6fe   :  { %4921 = vrsqrt.f32 %v2862_v39  ;;  %3503 = vmatmul.mubr.f32.gmra.mxu0 %v7021_v20  ;;  %v2539_v39 = vcvt.f32.s32 %v6864_v41 }
 0x6ff   :  { %3508 = vmatprep.mubr.f32.mxu0 %v7701_v13  ;;  %4923 = vrsqrt.f32 %v2958_v8  ;;  %v2555_v8 = vshll.u32 %v2554_v26, 16 }
 0x700   :  { %4925 = vrsqrt.f32 %v2957_v49  ;;  %v2599_v49 = vcvt.f32.s32 %v6884_v21 }
 0x701   :  { %4927 = vrsqrt.f32 %v2956_v58  ;;  %v7716_v58 = vld [vmem:[#allocation27_spill] sm:$0xff] }
 0x702   :  { %4929 = vrsqrt.f32 %v2955_v16  ;;  %v2600_v21 = vshll.u32 %v2599_v49, 16 }
 0x703   :  { %v4916_v57 = vpop.eup %4915 }
 0x704   :  { %v7028_v12 = vmul.f32 %v4916_v57, %v7712_v56  ;;  %v2524_v57 = vcvt.f32.s32 %v6870_v3  ;;  %v2954_v56 = vadd.f32 1e-24, %v2933_v1 }
 0x705   :  { %v4918_v14 = vpop.eup %4917 }
 0x706   :  { %3261 = vst [vmem:[#allocation8 + $0x58] sm:$0xff] %v7028_v12  ;;  %3509 = vmatmul.mubr.f32.gmra.mxu0 %v7028_v12  ;;  %v7033_v42 = vmul.f32 %v4918_v14, %v7713_v37  ;;  %v2540_v37 = vshll.u32 %v2539_v39, 16  ;;  %4931 = vrsqrt.f32 %v2954_v56 }
 0x707   :  { %v4920_v45 = vpop.eup %4919  ;;  %3514 = vmatprep.mubr.f32.mxu0 %v7701_v13  ;;  %4933 = vrsqrt.f32 %v2953_v60 }
 0x708   :  { %v7037_v6 = vmul.f32 %v4920_v45, %v7714_v4  ;;  %3263 = vst [vmem:[#allocation8 + $0x68] sm:$0xff] %v7033_v42  ;;  %v2569_v45 = vcvt.f32.s32 %v6874_v5  ;;  %v2525_v4 = vshll.u32 %v2524_v57, 16  ;;  %v2584_v5 = vcvt.f32.s32 %v6892_v61 }
 0x709   :  { %4935 = vrsqrt.f32 %v2952_v43 }
 0x70a   :  { %3262 = vst [vmem:[#allocation8 + $0x60] sm:$0xff] %v7037_v6  ;;  %3515 = vmatmul.mubr.f32.gmra.mxu0 %v7037_v6  ;;  %v2570_v3 = vshll.u32 %v2569_v45, 16  ;;  %v2585_v61 = vshll.u32 %v2584_v5, 16 }
 0x70b   :  { %v4922_v50 = vpop.eup %4921  ;;  %3520 = vmatprep.mubr.f32.mxu0 %v7701_v13 }
 0x70c   :  { %v7044_v25 = vmul.f32 %v4922_v50, %v7715_v63  ;;  %v4924_v39 = vpop.eup %4923 }
 0x70d   :  { %v4926_v56 = vpop.eup %4925 }
 0x70e   :  { %3521 = vmatmul.mubr.f32.gmra.mxu0 %v7033_v42  ;;  %3264 = vst [vmem:[#allocation8 + $0x70] sm:$0xff] %v7044_v25  ;;  %v4928_v26 = vpop.eup %4927 }
 0x70f   :  { %3526 = vmatprep.mubr.f32.mxu0 %v7701_v13  ;;  %v4930_v5 = vpop.eup %4929 }
 0x712   :  { %3527 = vmatmul.mubr.f32.gmra.mxu0 %v7044_v25 }
 0x713   :  { %3532 = vmatprep.mubr.f32.mxu0 %v7701_v13 }
 0x741   :  { %v2537_v14 = vpop.xlane.xlu1 %2536 }
 0x742   :  { %v2538_v22 = vcvt.f32.s32 %v2537_v14 }
 0x743   :  { %v2522_v50 = vpop.xlane.xlu0 %2521 }
 0x744   :  { %v2541_v41 = vadd.s32 %v2540_v37, %v2538_v22  ;;  %v2523_v63 = vcvt.f32.s32 %v2522_v50  ;;  %v7717_v22 = vld [vmem:[#allocation40_spill] sm:$0xff]  ;;  %v2614_v50 = vcvt.f32.s32 %v6909_v33  ;;  %v2644_v33 = vcvt.f32.s32 %v6848_v11 }
 0x745   :  { %v7720_v11 = vld [vmem:[#allocation44_spill] sm:$0xff] }
 0x746   :  { %v2526_v1 = vadd.s32 %v2525_v4, %v2523_v63  ;;  %vm2753_vm13 = vcmp.eq.s32.totalorder %v7716_v58, %v2541_v41  ;;  %v2990_v4 = vmul.f32 %v4924_v39, %v7717_v22  ;;  %v7719_v39 = vld [vmem:[#allocation41_spill] sm:$0xff] }
 0x747   :  { %v2567_v44 = vpop.xlane.xlu0 %2566  ;;  %v2552_v16 = vpop.xlane.xlu1 %2551  ;;  %v4219_v14 = vsel %vm2753_vm13, 1.0, %v7701_v13 }
 0x748   :  { %v2568_v7 = vcvt.f32.s32 %v2567_v44  ;;  %v2553_v57 = vcvt.f32.s32 %v2552_v16  ;;  %vm2752_vm14 = vcmp.eq.s32.totalorder %v7716_v58, %v2526_v1  ;;  %v7718_v1 = vld [vmem:[#allocation39_spill] sm:$0xff] }
 0x749   :  { %v4218_v35 = vsel %vm2752_vm14, 1.0, %v7701_v13 }
 0x74a   :  { %v2571_v37 = vadd.s32 %v2570_v3, %v2568_v7  ;;  %v2556_v45 = vadd.s32 %v2555_v8, %v2553_v57  ;;  %4744 = vmatprep.mubr.msk.f32.mxu1 %vm476_vm5, %v4218_v35  ;;  %v2989_v8 = vmul.f32 %v4926_v56, %v7718_v1  ;;  %v2988_v7 = vmul.f32 %v4928_v26, %v7719_v39 }
 0x74b   :  { %4745 = vmatmul.mubr.msk.f32.vlgmr.msra.gmra.mxu1 %vm476_vm5, %v4219_v14  ;;  %v2597_v60 = vpop.xlane.xlu1 %2596  ;;  %v2629_v57 = vcvt.f32.s32 %v6901_v17  ;;  %v2615_v35 = vshll.u32 %v2614_v50, 16  ;;  %v2645_v50 = vshll.u32 %v2644_v33, 16 }
 0x74c   :  { %v2582_v43 = vpop.xlane.xlu0 %2581  ;;  %4757 = vmatpush3.msra.mxu1 %v7007_v47  ;;  %v2598_v41 = vcvt.f32.s32 %v2597_v60  ;;  %vm2754_vm15 = vcmp.eq.s32.totalorder %v7716_v58, %v2556_v45  ;;  %vm2755_vm0 = vcmp.eq.s32.totalorder %v7716_v58, %v2571_v37  ;;  %v4932_v37 = vpop.eup %4931  ;;  %v2659_v60 = vcvt.f32.s32 %v6846_v24 }
 0x74d   :  { %v2583_v63 = vcvt.f32.s32 %v2582_v43  ;;  %4758 = vmatprep.subr.mxu1 %v2990_v4  ;;  %v4220_v3 = vsel %vm2754_vm15, 1.0, %v7701_v13  ;;  %v4221_v49 = vsel %vm2755_vm0, 1.0, %v7701_v13  ;;  %v4934_v26 = vpop.eup %4933  ;;  %vm1886_vm0 = vcmask 1024  }
 0x74e   :  { %v2601_v44 = vadd.s32 %v2600_v21, %v2598_v41  ;;  %4759 = vmatpush3.msra.mxu1 %v2990_v4  ;;  %4747 = vmatprep.mubr.msk.f32.mxu1 %vm476_vm5, %v4220_v3  ;;  %v2987_v21 = vmul.f32 %v4930_v5, %v7720_v11  ;;  %v2674_v41 = vcvt.f32.s32 %v6852_v55  ;;  %v4936_v24 = vpop.eup %4935  ;;  %v2630_v5 = vshll.u32 %v2629_v57, 16  ;;  %v7722_v55 = vld [vmem:[#allocation22_spill] sm:$0xff] }
 0x74f   :  { %v2586_v47 = vadd.s32 %v2585_v61, %v2583_v63  ;;  %4760 = vmatprep.subr.mxu1 %v2989_v8  ;;  %4748 = vmatmul.mubr.msk.f32.gmra.mxu1 %vm476_vm5, %v4221_v49  ;;  %v2612_v16 = vpop.xlane.xlu1 %2611 }
 0x750   :  { %v2642_v56 = vpop.xlane.xlu0 %2641  ;;  %4761 = vmatpush3.msra.mxu1 %v2989_v8  ;;  %v2613_v14 = vcvt.f32.s32 %v2612_v16  ;;  %vm2757_vm1 = vcmp.eq.s32.totalorder %v7716_v58, %v2601_v44  ;;  %v7721_v8 = vld [vmem:[#allocation24_spill] sm:$0xff]  ;;  %v2660_v16 = vshll.u32 %v2659_v60, 16 }
 0x751   :  { %v2643_v45 = vcvt.f32.s32 %v2642_v56  ;;  %4762 = vmatprep.subr.mxu1 %v2988_v7  ;;  %vm2756_vm2 = vcmp.eq.s32.totalorder %v7716_v58, %v2586_v47  ;;  %v4223_v61 = vsel %vm2757_vm1, 1.0, %v7701_v13  ;;  %v2986_v49 = vmul.f32 %v4932_v37, %v7721_v8 }
 0x752   :  { %v2616_v4 = vadd.s32 %v2615_v35, %v2613_v14  ;;  %4763 = vmatpush3.msra.mxu1 %v2988_v7  ;;  %v4222_v17 = vsel %vm2756_vm2, 1.0, %v7701_v13  ;;  %v2985_v7 = vmul.f32 %v4934_v26, %v7722_v55  ;;  %v2704_v35 = vcvt.f32.s32 %v6856_v62 }
 0x753   :  { %4750 = vmatprep.mubr.msk.f32.mxu1 %vm476_vm5, %v4222_v17  ;;  %4764 = vmatprep.subr.mxu1 %v2987_v21  ;;  %v2657_v43 = vpop.xlane.xlu1 %2656  ;;  %v2646_v44 = vadd.s32 %v2645_v50, %v2643_v45  ;;  %v2675_v37 = vshll.u32 %v2674_v41, 16  ;;  %v2689_v17 = vcvt.f32.s32 %v6850_v51 }
 0x754   :  { %v2627_v63 = vpop.xlane.xlu0 %2626  ;;  %4751 = vmatmul.mubr.msk.f32.gmra.mxu1 %vm476_vm5, %v4223_v61  ;;  %v2658_v3 = vcvt.f32.s32 %v2657_v43  ;;  %vm2758_vm3 = vcmp.eq.s32.totalorder %v7716_v58, %v2616_v4  ;;  %v7723_v4 = vld [vmem:[#allocation23_spill] sm:$0xff]  ;;  %v2705_v50 = vshll.u32 %v2704_v35, 16  ;;  %v2734_v43 = vcvt.f32.s32 %v6860_v52 }
 0x755   :  { %v2628_v47 = vcvt.f32.s32 %v2627_v63  ;;  %4765 = vmatpush3.msra.mxu1 %v2987_v21  ;;  %v4224_v33 = vsel %vm2758_vm3, 1.0, %v7701_v13  ;;  %v2984_v21 = vmul.f32 %v4936_v24, %v7723_v4  ;;  %vm2760_vm8 = vcmp.eq.s32.totalorder %v7716_v58, %v2646_v44 }
 0x756   :  { %4766 = vmatprep.subr.mxu1 %v2986_v49  ;;  %4753 = vmatprep.mubr.msk.f32.mxu1 %vm476_vm5, %v4224_v33  ;;  %v2661_v61 = vadd.s32 %v2660_v16, %v2658_v3  ;;  %v4226_v63 = vsel %vm2760_vm8, 1.0, %v7701_v13  ;;  %v2719_v24 = vcvt.f32.s32 %v6854_v15  ;;  %v2749_v15 = vcvt.f32.s32 %v6858_v9 }
 0x757   :  { %v2631_v56 = vadd.s32 %v2630_v5, %v2628_v47  ;;  %4767 = vmatpush3.msra.mxu1 %v2986_v49  ;;  %v2672_v14 = vpop.xlane.xlu1 %2671  ;;  %v2690_v49 = vshll.u32 %v2689_v17, 16 }
 0x758   :  { %4768 = vmatprep.subr.mxu1 %v2985_v7  ;;  %v2847_v57 = vpop.xlane.xlu0 %2846  ;;  %v2673_v45 = vcvt.f32.s32 %v2672_v14  ;;  %vm2761_vm9 = vcmp.eq.s32.totalorder %v7716_v58, %v2661_v61  ;;  %v2720_v14 = vshll.u32 %v2719_v24, 16 }
 0x759   :  { %v2863_v60 = vadd.f32 1e-24, %v2847_v57  ;;  %4769 = vmatpush3.msra.mxu1 %v2985_v7  ;;  %vm2759_vm7 = vcmp.eq.s32.totalorder %v7716_v58, %v2631_v56  ;;  %v4227_v47 = vsel %vm2761_vm9, 1.0, %v7701_v13  ;;  %v2735_v7 = vshll.u32 %v2734_v43, 16 }
 0x75a   :  { %v2676_v26 = vadd.s32 %v2675_v37, %v2673_v45  ;;  %4770 = vmatprep.subr.mxu1 %v2984_v21  ;;  %v4225_v62 = vsel %vm2759_vm7, 1.0, %v7701_v13 }
 0x75b   :  { %4937 = vrsqrt.f32 %v2863_v60  ;;  %4771 = vmatpush3.msra.mxu1 %v2984_v21  ;;  %v2702_v41 = vpop.xlane.xlu1 %2701 }
 0x75c   :  { %4754 = vmatmul.mubr.msk.f32.gmra.mxu1 %vm476_vm5, %v4225_v62  ;;  %v2687_v51 = vpop.xlane.xlu0 %2686  ;;  %v2703_v3 = vcvt.f32.s32 %v2702_v41  ;;  %vm2762_vm10 = vcmp.eq.s32.totalorder %v7716_v58, %v2676_v26  ;;  %v2750_v62 = vshll.u32 %v2749_v15, 16 }
 0x75d   :  { %v2688_v5 = vcvt.f32.s32 %v2687_v51  ;;  %4772 = vmatprep.mubr.msk.f32.mxu1 %vm476_vm5, %v4226_v63  ;;  %v4228_v44 = vsel %vm2762_vm10, 1.0, %v7701_v13 }
 0x75e   :  { %v2706_v52 = vadd.s32 %v2705_v50, %v2703_v3 }
 0x75f   :  { %v2691_v33 = vadd.s32 %v2690_v49, %v2688_v5  ;;  %v2732_v16 = vpop.xlane.xlu1 %2731 }
 0x760   :  { %4773 = vmatmul.mubr.msk.f32.vlgmr.msra.gmra.mxu1 %vm476_vm5, %v4227_v47  ;;  %v2717_v35 = vpop.xlane.xlu0 %2716  ;;  %v2733_v56 = vcvt.f32.s32 %v2732_v16  ;;  %vm2764_vm11 = vcmp.eq.s32.totalorder %v7716_v58, %v2706_v52 }
 0x761   :  { %v2718_v37 = vcvt.f32.s32 %v2717_v35  ;;  %4775 = vmatprep.mubr.msk.f32.mxu1 %vm476_vm5, %v4228_v44  ;;  %vm2763_vm12 = vcmp.eq.s32.totalorder %v7716_v58, %v2691_v33  ;;  %v4230_v45 = vsel %vm2764_vm11, 1.0, %v7701_v13 }
 0x762   :  { %v2736_v61 = vadd.s32 %v2735_v7, %v2733_v56  ;;  %v4229_v57 = vsel %vm2763_vm12, 1.0, %v7701_v13 }
 0x763   :  { %v2721_v21 = vadd.s32 %v2720_v14, %v2718_v37  ;;  %v1712_v17 = vpop.xlane.xlu1 %1711 }
 0x764   :  { %4776 = vmatmul.mubr.msk.f32.gmra.mxu1 %vm476_vm5, %v4229_v57  ;;  %v2747_v60 = vpop.xlane.xlu0 %2746  ;;  %v1713_v26 = vadd.f32 1e-24, %v1712_v17  ;;  %vm2766_vm13 = vcmp.eq.s32.totalorder %v7716_v58, %v2736_v61 }
 0x765   :  { %v2748_v9 = vcvt.f32.s32 %v2747_v60  ;;  %4778 = vmatprep.mubr.msk.f32.mxu1 %vm476_vm5, %v4230_v45  ;;  %vm2765_vm14 = vcmp.eq.s32.totalorder %v7716_v58, %v2721_v21  ;;  %v4232_v43 = vsel %vm2766_vm13, 1.0, %v7701_v13 }
 0x766   :  { %4939 = vrsqrt.f32 %v1713_v26  ;;  %v4231_v50 = vsel %vm2765_vm14, 1.0, %v7701_v13 }
 0x767   :  { %v2751_v41 = vadd.s32 %v2750_v62, %v2748_v9 }
 0x768   :  { %v4938_v51 = vpop.eup %4937  ;;  %4779 = vmatmul.mubr.msk.f32.gmra.mxu1 %vm476_vm5, %v4231_v50 }
 0x769   :  { %4781 = vmatprep.mubr.msk.f32.mxu1 %vm476_vm5, %v4232_v43  ;;  %vm2767_vm15 = vcmp.eq.s32.totalorder %v7716_v58, %v2751_v41  ;;  %v7128_v63 = vmul.f32 %v4938_v51, %v7704_v46 }
 0x76a   :  { %v4233_v3 = vsel %vm2767_vm15, 1.0, %v7701_v13 }
 0x76b   :  { %3265 = vst [vmem:[#allocation8 + $0x78] sm:$0xff] %v7128_v63  ;;  %3533 = vmatmul.mubr.f32.gmra.mxu0 %v7128_v63 }
 0x76c   :  { %4782 = vmatmul.mubr.msk.f32.gmra.mxu1 %vm476_vm5, %v4233_v3  ;;  %vm1834_vm5 = vcmask 7168  }
 0x773   :  { %v4940_v49 = vpop.eup %4939 }
 0x774   :  { %v7135_v24 = vmul.f32 %v4940_v49, %v6949_v27 }
 0x776   :  { %1717 = vst [vmem:[%s7596_s21] sm:$0x3] %v7135_v24  ;;  %s5192_s21 = smov 1  }
 0x782   :  { %v3444_v58 = vpop.f32.mrf.mxu0 }
 0x783   :  { %v7141_v5 = vmul.f32 14.285714, %v3444_v58 }
 0x784   :  { %v3446_v46 = vpop.f32.mrf.mxu0 }
 0x785   :  { %v7143_v13 = vmul.f32 14.285714, %v3446_v46 }
 0x786   :  { %v3450_v52 = vpop.f32.mrf.mxu0 }
 0x787   :  { %v3571_v44 = vmax.f32 %v7141_v5, %v7143_v13  ;;  %v7147_v33 = vmul.f32 14.285714, %v3450_v52 }
 0x788   :  { %v3452_v47 = vpop.f32.mrf.mxu0 }
 0x789   :  { %v7149_v27 = vmul.f32 14.285714, %v3452_v47  ;;  %3572 = vmax.xlane.f32.xlu1 %v3571_v44 }
 0x78a   :  { %v3456_v16 = vpop.f32.mrf.mxu0 }
 0x78b   :  { %v3574_v7 = vmax.f32 %v7147_v33, %v7149_v27  ;;  %v7153_v56 = vmul.f32 14.285714, %v3456_v16 }
 0x78c   :  { %v3458_v35 = vpop.f32.mrf.mxu0 }
 0x78d   :  { %v7155_v14 = vmul.f32 14.285714, %v3458_v35  ;;  %3575 = vmax.xlane.f32.xlu0 %v3574_v7 }
 0x78e   :  { %v3462_v15 = vpop.f32.mrf.mxu0 }
 0x78f   :  { %v3577_v37 = vmax.f32 %v7153_v56, %v7155_v14  ;;  %v7159_v57 = vmul.f32 14.285714, %v3462_v15 }
 0x790   :  { %v3464_v61 = vpop.f32.mrf.mxu0 }
 0x791   :  { %v7161_v45 = vmul.f32 14.285714, %v3464_v61  ;;  %3578 = vmax.xlane.f32.xlu0 %v3577_v37 }
 0x793   :  { %v3580_v21 = vmax.f32 %v7159_v57, %v7161_v45 }
 0x795   :  { %3581 = vmax.xlane.f32.xlu0 %v3580_v21 }
 0x798   :  { %v3468_v17 = vpop.f32.mrf.mxu0 }
 0x799   :  { %v7165_v26 = vmul.f32 14.285714, %v3468_v17 }
 0x79a   :  { %v3470_v60 = vpop.f32.mrf.mxu0 }
 0x79b   :  { %v7167_v62 = vmul.f32 14.285714, %v3470_v60 }
 0x79d   :  { %v3583_v9 = vmax.f32 %v7165_v26, %v7167_v62 }
 0x79f   :  { %3584 = vmax.xlane.f32.xlu0 %v3583_v9 }
 0x7a2   :  { %v3474_v50 = vpop.f32.mrf.mxu0 }
 0x7a3   :  { %v7171_v41 = vmul.f32 14.285714, %v3474_v50 }
 0x7a4   :  { %v3476_v43 = vpop.f32.mrf.mxu0 }
 0x7a5   :  { %v7173_v51 = vmul.f32 14.285714, %v3476_v43 }
 0x7a6   :  { %v3480_v3 = vpop.f32.mrf.mxu0 }
 0x7a7   :  { %v3586_v49 = vmax.f32 %v7171_v41, %v7173_v51  ;;  %v7177_v46 = vmul.f32 14.285714, %v3480_v3 }
 0x7a8   :  { %v3482_v58 = vpop.f32.mrf.mxu0 }
 0x7a9   :  { %v7179_v52 = vmul.f32 14.285714, %v3482_v58  ;;  %3587 = vmax.xlane.f32.xlu0 %v3586_v49 }
 0x7ab   :  { %v3589_v44 = vmax.f32 %v7177_v46, %v7179_v52 }
 0x7ad   :  { %3590 = vmax.xlane.f32.xlu0 %v3589_v44 }
 0x7ae   :  { %v3486_v47 = vpop.f32.mrf.mxu0 }
 0x7af   :  { %v7183_v7 = vmul.f32 14.285714, %v3486_v47 }
 0x7b0   :  { %v3488_v16 = vpop.f32.mrf.mxu0 }
 0x7b1   :  { %v7185_v35 = vmul.f32 14.285714, %v3488_v16 }
 0x7b2   :  { %v3492_v15 = vpop.f32.mrf.mxu0 }
 0x7b3   :  { %v3592_v37 = vmax.f32 %v7183_v7, %v7185_v35  ;;  %v7189_v21 = vmul.f32 14.285714, %v3492_v15 }
 0x7b4   :  { %v3494_v61 = vpop.f32.mrf.mxu0 }
 0x7b5   :  { %v7191_v17 = vmul.f32 14.285714, %v3494_v61  ;;  %3593 = vmax.xlane.f32.xlu0 %v3592_v37 }
 0x7b7   :  { %v3595_v60 = vmax.f32 %v7189_v21, %v7191_v17 }
 0x7b9   :  { %3596 = vmax.xlane.f32.xlu0 %v3595_v60 }
 0x7ba   :  { %v3498_v9 = vpop.f32.mrf.mxu0 }
 0x7bc   :  { %v3500_v50 = vpop.f32.mrf.mxu0 }
 0x7bd   :  { %v7198_v23 = vmul.f32 14.285714, %v3500_v50 }
 0x7be   :  { %v3504_v43 = vpop.f32.mrf.mxu0 }
 0x7c0   :  { %v3506_v3 = vpop.f32.mrf.mxu0 }
 0x7c6   :  { %v3510_v49 = vpop.f32.mrf.mxu0 }
 0x7c8   :  { %v3512_v58 = vpop.f32.mrf.mxu0 }
 0x7ca   :  { %v3516_v37 = vpop.f32.mrf.mxu0 }
 0x7cc   :  { %v3518_v22 = vpop.f32.mrf.mxu0 }
 0x7ce   :  { %v3522_v50 = vpop.f32.mrf.mxu0 }
 0x80b   :  { %v4746_v44 = vpop.f32.mrf.mxu1 }
 0x80c   :  { %3267 = vst [vmem:[#allocation9 + $0x8] sm:$0xff] %v4746_v44  ;;  %v3283_v47 = vmul.f32 %v4746_v44, %v6889_v30  ;;  %v7201_v30 = vmul.f32 14.285714, %v3498_v9  ;;  %v7215_v9 = vmul.f32 14.285714, %v3510_v49 }
 0x80d   :  { %v3082_v16 = vpop.f32.mrf.mxu1 }
 0x80e   :  { %3266 = vst [vmem:[#allocation9] sm:$0xff] %v3082_v16  ;;  %v3282_v15 = vmul.f32 %v3082_v16, %v6896_v40  ;;  %3300 = vadd.xlane.f32.xlu1 %v3283_v47  ;;  %v3598_v47 = vmax.f32 %v7201_v30, %v7198_v23 }
 0x80f   :  { %v4749_v61 = vpop.f32.mrf.mxu1 }
 0x810   :  { %3269 = vst [vmem:[#allocation9 + $0x18] sm:$0xff] %v4749_v61  ;;  %v3285_v60 = vmul.f32 %v4749_v61, %v6906_v19  ;;  %3298 = vadd.xlane.f32.xlu0 %v3282_v15  ;;  %v7206_v19 = vmul.f32 14.285714, %v3506_v3  ;;  %v7208_v15 = vmul.f32 14.285714, %v3504_v43 }
 0x811   :  { %v3092_v29 = vpop.f32.mrf.mxu1 }
 0x812   :  { %3268 = vst [vmem:[#allocation9 + $0x10] sm:$0xff] %v3092_v29  ;;  %v3284_v54 = vmul.f32 %v3092_v29, %v6918_v36  ;;  %3304 = vadd.xlane.f32.xlu1 %v3285_v60  ;;  %v7213_v36 = vmul.f32 14.285714, %v3512_v58  ;;  %v7220_v60 = vmul.f32 14.285714, %v3518_v22 }
 0x813   :  { %v7222_v58 = vmul.f32 14.285714, %v3516_v37  ;;  %v7229_v22 = vmul.f32 14.285714, %v3522_v50 }
 0x814   :  { %v4752_v44 = vpop.f32.mrf.mxu1  ;;  %3302 = vadd.xlane.f32.xlu0 %v3284_v54  ;;  %v3601_v54 = vmax.f32 %v7208_v15, %v7206_v19  ;;  %v3604_v43 = vmax.f32 %v7215_v9, %v7213_v36 }
 0x815   :  { %3271 = vst [vmem:[#allocation9 + $0x28] sm:$0xff] %v4752_v44  ;;  %v3287_v40 = vmul.f32 %v4752_v44, %v6972_v32  ;;  %v3524_v32 = vpop.f32.mrf.mxu0 }
 0x816   :  { %v3102_v16 = vpop.f32.mrf.mxu1 }
 0x817   :  { %3270 = vst [vmem:[#allocation9 + $0x20] sm:$0xff] %v3102_v16  ;;  %3308 = vadd.xlane.f32.xlu1 %v3287_v40  ;;  %v3286_v29 = vmul.f32 %v3102_v16, %v6959_v2  ;;  %v3528_v44 = vpop.f32.mrf.mxu0 }
 0x818   :  { %3599 = vmax.xlane.f32.xlu0 %v3598_v47  ;;  %v3607_v47 = vmax.f32 %v7222_v58, %v7220_v60 }
 0x81b   :  { %3306 = vadd.xlane.f32.xlu1 %v3286_v29  ;;  %v3530_v29 = vpop.f32.mrf.mxu0 }
 0x81c   :  { %v4755_v3 = vpop.f32.mrf.mxu1  ;;  %3602 = vmax.xlane.f32.xlu0 %v3601_v54 }
 0x81d   :  { %3273 = vst [vmem:[#allocation9 + $0x38] sm:$0xff] %v4755_v3  ;;  %v3289_v61 = vmul.f32 %v4755_v3, %v6996_v34  ;;  %v7227_v34 = vmul.f32 14.285714, %v3524_v32  ;;  %v7234_v3 = vmul.f32 14.285714, %v3530_v29 }
 0x81e   :  { %v3112_v2 = vpop.f32.mrf.mxu1  ;;  %v7236_v32 = vmul.f32 14.285714, %v3528_v44 }
 0x81f   :  { %3272 = vst [vmem:[#allocation9 + $0x30] sm:$0xff] %v3112_v2  ;;  %3312 = vadd.xlane.f32.xlu1 %v3289_v61  ;;  %v3288_v49 = vmul.f32 %v3112_v2, %v6979_v18  ;;  %v3610_v18 = vmax.f32 %v7229_v22, %v7227_v34 }
 0x820   :  { %v4774_v40 = vpop.f32.mrf.mxu1  ;;  %3605 = vmax.xlane.f32.xlu0 %v3604_v43  ;;  %v3613_v2 = vmax.f32 %v7236_v32, %v7234_v3 }
 0x821   :  { %3275 = vst [vmem:[#allocation9 + $0x48] sm:$0xff] %v4774_v40  ;;  %v3291_v37 = vmul.f32 %v4774_v40, %v7016_v53 }
 0x822   :  { %v3211_v16 = vpop.f32.mrf.mxu1 }
 0x823   :  { %3274 = vst [vmem:[#allocation9 + $0x40] sm:$0xff] %v3211_v16  ;;  %3310 = vadd.xlane.f32.xlu1 %v3288_v49  ;;  %v3290_v50 = vmul.f32 %v3211_v16, %v7003_v38 }
 0x824   :  { %v4777_v54 = vpop.f32.mrf.mxu1  ;;  %3608 = vmax.xlane.f32.xlu0 %v3607_v47 }
 0x825   :  { %3277 = vst [vmem:[#allocation9 + $0x58] sm:$0xff] %v4777_v54  ;;  %v3293_v47 = vmul.f32 %v4777_v54, %v7028_v12 }
 0x826   :  { %v3221_v61 = vpop.f32.mrf.mxu1 }
 0x827   :  { %3276 = vst [vmem:[#allocation9 + $0x50] sm:$0xff] %v3221_v61  ;;  %3316 = vadd.xlane.f32.xlu1 %v3291_v37  ;;  %v3292_v16 = vmul.f32 %v3221_v61, %v7021_v20  ;;  %v7726_v20 = vld [vmem:[#allocation25_spill] sm:$0xff] }
 0x828   :  { %v4780_v43 = vpop.f32.mrf.mxu1  ;;  %3611 = vmax.xlane.f32.xlu0 %v3610_v18  ;;  %v7259_v61 = vmul.f32 14.285714, %v7726_v20 }
 0x829   :  { %3279 = vst [vmem:[#allocation9 + $0x68] sm:$0xff] %v4780_v43 }
 0x82a   :  { %v3231_v53 = vpop.f32.mrf.mxu1 }
 0x82b   :  { %3278 = vst [vmem:[#allocation9 + $0x60] sm:$0xff] %v3231_v53  ;;  %v3534_v40 = vpop.f32.mrf.mxu0  ;;  %3314 = vadd.xlane.f32.xlu1 %v3290_v50  ;;  %v3295_v50 = vmul.f32 %v4780_v43, %v7033_v42  ;;  %v3294_v12 = vmul.f32 %v3231_v53, %v7037_v6  ;;  %v3576_v43 = vpop.xlane.xlu0 %3575 }
 0x82c   :  { %v4783_v49 = vpop.f32.mrf.mxu1  ;;  %3614 = vmax.xlane.f32.xlu0 %v3613_v2  ;;  %v7242_v44 = vmul.f32 14.285714, %v3534_v40  ;;  %v7724_v40 = vld [vmem:[#allocation26_spill] sm:$0xff] }
 0x82d   :  { %3281 = vst [vmem:[#allocation9 + $0x78] sm:$0xff] %v4783_v49  ;;  %v3536_v29 = vpop.f32.mrf.mxu0  ;;  %v3297_v54 = vmul.f32 %v4783_v49, %v7128_v63  ;;  %v1861_v63 = vsel %vm1702_vm6, %v7259_v61, -inf }
 0x82e   :  { %v7244_v37 = vmul.f32 14.285714, %v3536_v29  ;;  %v3241_v18 = vpop.f32.mrf.mxu1  ;;  %v7725_v29 = vld [vmem:[#allocation15_spill] sm:$0xff] }
 0x82f   :  { %3280 = vst [vmem:[#allocation9 + $0x70] sm:$0xff] %v3241_v18  ;;  %3320 = vadd.xlane.f32.xlu1 %v3293_v47  ;;  %v3296_v2 = vmul.f32 %v3241_v18, %v7044_v25  ;;  %v7254_v47 = vmul.f32 14.285714, %v7724_v40  ;;  %v1718_v48 = vmul.f32 %v7135_v24, %v7725_v29  ;;  %v3579_v53 = vpop.xlane.xlu0 %3578 }
 0x830   :  { %v3616_v38 = vmax.f32 %v7242_v44, %v7244_v37 }
 0x831   :  { %v1719_v42 = vsel %vm1702_vm6, %v1718_v48, 0.0  ;;  %v1862_v6 = vsel %vm1702_vm6, %v7254_v47, -inf }
 0x832   :  { %3617 = vmax.xlane.f32.xlu0 %v3616_v38  ;;  %v1863_v25 = vmax.f32 %v1861_v63, %v1862_v6 }
 0x833   :  { %3318 = vadd.xlane.f32.xlu1 %v3292_v16  ;;  %v3582_v49 = vpop.xlane.xlu0 %3581 }
 0x837   :  { %3324 = vadd.xlane.f32.xlu1 %v3295_v50  ;;  %v3585_v18 = vpop.xlane.xlu0 %3584  ;;  %v3573_v50 = vpop.xlane.xlu1 %3572 }
 0x83b   :  { %3322 = vadd.xlane.f32.xlu1 %v3294_v12  ;;  %v3588_v24 = vpop.xlane.xlu0 %3587 }
 0x83f   :  { %3328 = vadd.xlane.f32.xlu1 %v3297_v54  ;;  %v7266_v38 = vpop.xlane.xlu0 %3590 }
 0x843   :  { %3326 = vadd.xlane.f32.xlu1 %v3296_v2  ;;  %v3594_v16 = vpop.xlane.xlu0 %3593 }
 0x847   :  { %1720 = vadd.xlane.f32.xlu1 %v1719_v42  ;;  %v7268_v12 = vpop.xlane.xlu0 %3596 }
 0x84b   :  { %1864 = vmax.xlane.f32.xlu1 %v1863_v25 }
 0x897   :  { %v3301_v48 = vpop.xlane.xlu1 %3300 }
 0x898   :  { %v7270_v54 = vmul.f32 14.285714, %v3301_v48 }
 0x899   :  { %v3299_v2 = vpop.xlane.xlu0 %3298 }
 0x89a   :  { %v7273_v40 = vmax.f32 %v3576_v43, %v7270_v54  ;;  %v7275_v29 = vmul.f32 14.285714, %v3299_v2 }
 0x89b   :  { %v3305_v20 = vpop.xlane.xlu1 %3304 }
 0x89c   :  { %v3685_v42 = vsub.f32 %v7147_v33, %v7273_v40  ;;  %v3686_v6 = vsub.f32 %v7149_v27, %v7273_v40  ;;  %v7282_v63 = vmax.f32 %v3573_v50, %v7275_v29  ;;  %v7284_v25 = vmul.f32 14.285714, %v3305_v20 }
 0x89d   :  { %v3303_v48 = vpop.xlane.xlu0 %3302 }
 0x89e   :  { %v3719_v1 = vmul.f32 1.442695, %v3685_v42  ;;  %v3721_v59 = vmul.f32 1.442695, %v3686_v6  ;;  %v3683_v43 = vsub.f32 %v7141_v5, %v7282_v63  ;;  %v3684_v2 = vsub.f32 %v7143_v13, %v7282_v63 }
 0x89f   :  { %v7291_v39 = vmax.f32 %v3582_v49, %v7284_v25  ;;  %v7293_v33 = vmul.f32 14.285714, %v3303_v48 }
 0x8a0   :  { %v3309_v27 = vpop.xlane.xlu1 %3308  ;;  %4941 = vpow2.f32 %v3719_v1  ;;  %v3715_v50 = vmul.f32 1.442695, %v3683_v43  ;;  %v3717_v31 = vmul.f32 1.442695, %v3684_v2 }
 0x8a1   :  { %4943 = vpow2.f32 %v3721_v59  ;;  %v3689_v20 = vsub.f32 %v7159_v57, %v7291_v39  ;;  %v3690_v42 = vsub.f32 %v7161_v45, %v7291_v39  ;;  %v7300_v5 = vmax.f32 %v3579_v53, %v7293_v33  ;;  %v3600_v45 = vpop.xlane.xlu0 %3599 }
 0x8a2   :  { %v7302_v13 = vmul.f32 14.285714, %v3309_v27  ;;  %4945 = vpow2.f32 %v3715_v50 }
 0x8a3   :  { %v3727_v49 = vmul.f32 1.442695, %v3689_v20  ;;  %v3729_v6 = vmul.f32 1.442695, %v3690_v42  ;;  %4947 = vpow2.f32 %v3717_v31  ;;  %v3687_v1 = vsub.f32 %v7153_v56, %v7300_v5 }
 0x8a4   :  { %v3307_v48 = vpop.xlane.xlu1 %3306  ;;  %v3688_v59 = vsub.f32 %v7155_v14, %v7300_v5  ;;  %v7309_v57 = vmax.f32 %v3588_v24, %v7302_v13 }
 0x8a5   :  { %v7311_v43 = vmul.f32 14.285714, %v3307_v48  ;;  %4949 = vpow2.f32 %v3727_v49  ;;  %v3723_v53 = vmul.f32 1.442695, %v3687_v1 }
 0x8a6   :  { %v3725_v2 = vmul.f32 1.442695, %v3688_v59  ;;  %4951 = vpow2.f32 %v3729_v6  ;;  %v3693_v27 = vsub.f32 %v7171_v41, %v7309_v57  ;;  %v3694_v31 = vsub.f32 %v7173_v51, %v7309_v57  ;;  %v7329_v51 = vpop.xlane.xlu0 %3602 }
 0x8a7   :  { %v7318_v56 = vmax.f32 %v3585_v18, %v7311_v43  ;;  %4953 = vpow2.f32 %v3723_v53 }
 0x8a8   :  { %v3313_v14 = vpop.xlane.xlu1 %3312  ;;  %v3735_v24 = vmul.f32 1.442695, %v3693_v27  ;;  %v3737_v20 = vmul.f32 1.442695, %v3694_v31  ;;  %4955 = vpow2.f32 %v3725_v2 }
 0x8a9   :  { %v7320_v50 = vmul.f32 14.285714, %v3313_v14  ;;  %v3691_v42 = vsub.f32 %v7165_v26, %v7318_v56  ;;  %v3692_v49 = vsub.f32 %v7167_v62, %v7318_v56 }
 0x8aa   :  { %4957 = vpow2.f32 %v3735_v24 }
 0x8ab   :  { %v7327_v41 = vmax.f32 %v3594_v16, %v7320_v50  ;;  %v3731_v6 = vmul.f32 1.442695, %v3691_v42  ;;  %v3733_v48 = vmul.f32 1.442695, %v3692_v49  ;;  %4959 = vpow2.f32 %v3737_v20  ;;  %v3606_v42 = vpop.xlane.xlu0 %3605 }
 0x8ac   :  { %v3311_v18 = vpop.xlane.xlu1 %3310 }
 0x8ad   :  { %v4942_v1 = vpop.eup %4941  ;;  %v3697_v59 = vsub.f32 %v7183_v7, %v7327_v41  ;;  %v3698_v26 = vsub.f32 %v7185_v35, %v7327_v41  ;;  %v7335_v53 = vmul.f32 14.285714, %v3311_v18  ;;  %4961 = vpow2.f32 %v3731_v6 }
 0x8ae   :  { %v4944_v62 = vpop.eup %4943  ;;  %4963 = vpow2.f32 %v3733_v48 }
 0x8af   :  { %v3743_v16 = vmul.f32 1.442695, %v3697_v59  ;;  %v3745_v2 = vmul.f32 1.442695, %v3698_v26  ;;  %v7339_v27 = vmax.f32 %v7266_v38, %v7335_v53  ;;  %v4946_v14 = vpop.eup %4945  ;;  %v3782_v20 = vadd.f32 %v4944_v62, %v4942_v1 }
 0x8b0   :  { %v3317_v31 = vpop.xlane.xlu1 %3316  ;;  %v4948_v7 = vpop.eup %4947 }
 0x8b1   :  { %v7341_v24 = vmul.f32 14.285714, %v3317_v31  ;;  %v3695_v35 = vsub.f32 %v7177_v46, %v7339_v27  ;;  %v3696_v49 = vsub.f32 %v7179_v52, %v7339_v27  ;;  %4965 = vpow2.f32 %v3743_v16  ;;  %3783 = vadd.xlane.f32.xlu1 %v3782_v20 }
 0x8b2   :  { %v3779_v38 = vadd.f32 %v4948_v7, %v4946_v14  ;;  %v4950_v6 = vpop.eup %4949  ;;  %4967 = vpow2.f32 %v3745_v2  ;;  %v3609_v2 = vpop.xlane.xlu0 %3608 }
 0x8b3   :  { %v7348_v18 = vmax.f32 %v3600_v45, %v7341_v24  ;;  %v3739_v48 = vmul.f32 1.442695, %v3695_v35  ;;  %v3741_v59 = vmul.f32 1.442695, %v3696_v49  ;;  %v4952_v1 = vpop.eup %4951 }
 0x8b4   :  { %v3315_v26 = vpop.xlane.xlu1 %3314  ;;  %3780 = vadd.xlane.f32.xlu0 %v3779_v38  ;;  %v3788_v16 = vadd.f32 %v4952_v1, %v4950_v6  ;;  %v4954_v45 = vpop.eup %4953 }
 0x8b5   :  { %v3701_v62 = vsub.f32 %v7201_v30, %v7348_v18  ;;  %v3702_v46 = vsub.f32 %v7198_v23, %v7348_v18  ;;  %v7354_v52 = vmul.f32 14.285714, %v3315_v26  ;;  %4969 = vpow2.f32 %v3739_v48  ;;  %v4956_v20 = vpop.eup %4955 }
 0x8b6   :  { %4971 = vpow2.f32 %v3741_v59  ;;  %3789 = vadd.xlane.f32.xlu1 %v3788_v16  ;;  %v3785_v35 = vadd.f32 %v4956_v20, %v4954_v45 }
 0x8b7   :  { %v3751_v31 = vmul.f32 1.442695, %v3701_v62  ;;  %v3753_v14 = vmul.f32 1.442695, %v3702_v46  ;;  %v7358_v7 = vmax.f32 %v7268_v12, %v7354_v52  ;;  %v4958_v23 = vpop.eup %4957 }
 0x8b8   :  { %v3321_v30 = vpop.xlane.xlu1 %3320  ;;  %v4960_v48 = vpop.eup %4959  ;;  %3786 = vadd.xlane.f32.xlu0 %v3785_v35 }
 0x8b9   :  { %v7360_v49 = vmul.f32 14.285714, %v3321_v30  ;;  %4973 = vpow2.f32 %v3751_v31  ;;  %v3699_v38 = vsub.f32 %v7189_v21, %v7358_v7  ;;  %v3700_v6 = vsub.f32 %v7191_v17, %v7358_v7  ;;  %v3612_v31 = vpop.xlane.xlu0 %3611 }
 0x8ba   :  { %4975 = vpow2.f32 %v3753_v14  ;;  %v3794_v1 = vadd.f32 %v4960_v48, %v4958_v23  ;;  %v4962_v46 = vpop.eup %4961 }
 0x8bb   :  { %v7367_v59 = vmax.f32 %v3606_v42, %v7360_v49  ;;  %v3747_v12 = vmul.f32 1.442695, %v3699_v38  ;;  %v3749_v26 = vmul.f32 1.442695, %v3700_v6  ;;  %v4964_v17 = vpop.eup %4963 }
 0x8bc   :  { %v3319_v62 = vpop.xlane.xlu1 %3318  ;;  %3795 = vadd.xlane.f32.xlu1 %v3794_v1  ;;  %v3791_v35 = vadd.f32 %v4964_v17, %v4962_v46 }
 0x8bd   :  { %v3705_v16 = vsub.f32 %v7215_v9, %v7367_v59  ;;  %v3706_v21 = vsub.f32 %v7213_v36, %v7367_v59  ;;  %v7373_v45 = vmul.f32 14.285714, %v3319_v62  ;;  %4977 = vpow2.f32 %v3747_v12 }
 0x8be   :  { %v4966_v20 = vpop.eup %4965  ;;  %4979 = vpow2.f32 %v3749_v26  ;;  %3792 = vadd.xlane.f32.xlu0 %v3791_v35  ;;  %v3615_v26 = vpop.xlane.xlu0 %3614 }
 0x8bf   :  { %v3759_v14 = vmul.f32 1.442695, %v3705_v16  ;;  %v3761_v42 = vmul.f32 1.442695, %v3706_v21  ;;  %v7377_v30 = vmax.f32 %v7329_v51, %v7373_v45  ;;  %v4968_v9 = vpop.eup %4967 }
 0x8c0   :  { %v3325_v23 = vpop.xlane.xlu1 %3324  ;;  %v3800_v12 = vadd.f32 %v4968_v9, %v4966_v20 }
 0x8c1   :  { %v7379_v38 = vmul.f32 14.285714, %v3325_v23  ;;  %4981 = vpow2.f32 %v3759_v14  ;;  %v3703_v36 = vsub.f32 %v7208_v15, %v7377_v30  ;;  %v3704_v6 = vsub.f32 %v7206_v19, %v7377_v30 }
 0x8c2   :  { %4983 = vpow2.f32 %v3761_v42  ;;  %v4970_v51 = vpop.eup %4969  ;;  %3801 = vadd.xlane.f32.xlu1 %v3800_v12 }
 0x8c3   :  { %v7386_v48 = vmax.f32 %v3612_v31, %v7379_v38  ;;  %v3755_v1 = vmul.f32 1.442695, %v3703_v36  ;;  %v3757_v62 = vmul.f32 1.442695, %v3704_v6  ;;  %v4972_v16 = vpop.eup %4971  ;;  %v3618_v36 = vpop.xlane.xlu0 %3617 }
 0x8c4   :  { %v3323_v46 = vpop.xlane.xlu1 %3322  ;;  %v3797_v17 = vadd.f32 %v4972_v16, %v4970_v51 }
 0x8c5   :  { %v3709_v21 = vsub.f32 %v7229_v22, %v7386_v48  ;;  %v3710_v15 = vsub.f32 %v7227_v34, %v7386_v48  ;;  %v7392_v19 = vmul.f32 14.285714, %v3323_v46  ;;  %4985 = vpow2.f32 %v3755_v1 }
 0x8c6   :  { %v4974_v14 = vpop.eup %4973  ;;  %4987 = vpow2.f32 %v3757_v62  ;;  %3798 = vadd.xlane.f32.xlu0 %v3797_v17 }
 0x8c7   :  { %v3767_v31 = vmul.f32 1.442695, %v3709_v21  ;;  %v3769_v42 = vmul.f32 1.442695, %v3710_v15  ;;  %v4976_v20 = vpop.eup %4975  ;;  %v7395_v35 = vmax.f32 %v3609_v2, %v7392_v19 }
 0x8c8   :  { %v3329_v23 = vpop.xlane.xlu1 %3328  ;;  %v3806_v22 = vadd.f32 %v4976_v20, %v4974_v14 }
 0x8c9   :  { %v7397_v9 = vmul.f32 14.285714, %v3329_v23  ;;  %4989 = vpow2.f32 %v3767_v31  ;;  %v3707_v34 = vsub.f32 %v7222_v58, %v7395_v35  ;;  %v3708_v6 = vsub.f32 %v7220_v60, %v7395_v35 }
 0x8ca   :  { %4991 = vpow2.f32 %v3769_v42  ;;  %3807 = vadd.xlane.f32.xlu1 %v3806_v22  ;;  %v4978_v2 = vpop.eup %4977 }
 0x8cb   :  { %v7404_v12 = vmax.f32 %v3618_v36, %v7397_v9  ;;  %v3763_v51 = vmul.f32 1.442695, %v3707_v34  ;;  %v3765_v1 = vmul.f32 1.442695, %v3708_v6  ;;  %v4980_v46 = vpop.eup %4979 }
 0x8cc   :  { %v3327_v62 = vpop.xlane.xlu1 %3326  ;;  %v3803_v15 = vadd.f32 %v4980_v46, %v4978_v2 }
 0x8cd   :  { %v3713_v16 = vsub.f32 %v7242_v44, %v7404_v12  ;;  %v3714_v21 = vsub.f32 %v7244_v37, %v7404_v12  ;;  %v7410_v58 = vmul.f32 14.285714, %v3327_v62  ;;  %4993 = vpow2.f32 %v3763_v51 }
 0x8ce   :  { %v4982_v60 = vpop.eup %4981  ;;  %4995 = vpow2.f32 %v3765_v1  ;;  %3804 = vadd.xlane.f32.xlu0 %v3803_v15 }
 0x8cf   :  { %v3775_v17 = vmul.f32 1.442695, %v3713_v16  ;;  %v3777_v14 = vmul.f32 1.442695, %v3714_v21  ;;  %v4984_v31 = vpop.eup %4983  ;;  %v7413_v42 = vmax.f32 %v3615_v26, %v7410_v58 }
 0x8d0   :  { %v1721_v20 = vpop.xlane.xlu1 %1720  ;;  %v3812_v23 = vadd.f32 %v4984_v31, %v4982_v60 }
 0x8d1   :  { %4997 = vpow2.f32 %v3775_v17  ;;  %v3711_v44 = vsub.f32 %v7236_v32, %v7413_v42  ;;  %v3712_v37 = vsub.f32 %v7234_v3, %v7413_v42  ;;  %v7419_v22 = vmul.f32 14.285714, %v1721_v20 }
 0x8d2   :  { %4999 = vpow2.f32 %v3777_v14  ;;  %3813 = vadd.xlane.f32.xlu1 %v3812_v23  ;;  %v4986_v36 = vpop.eup %4985 }
 0x8d3   :  { %v3771_v34 = vmul.f32 1.442695, %v3711_v44  ;;  %v3773_v6 = vmul.f32 1.442695, %v3712_v37  ;;  %v4988_v26 = vpop.eup %4987 }
 0x8d4   :  { %v1865_v2 = vpop.xlane.xlu1 %1864  ;;  %v3809_v1 = vadd.f32 %v4988_v26, %v4986_v36 }
 0x8d5   :  { %v7422_v51 = vmax.f32 %v1865_v2, %v7419_v22  ;;  %5001 = vpow2.f32 %v3771_v34 }
 0x8d6   :  { %v4990_v62 = vpop.eup %4989  ;;  %5003 = vpow2.f32 %v3773_v6  ;;  %3810 = vadd.xlane.f32.xlu0 %v3809_v1 }
 0x8d7   :  { %v1870_v32 = vsub.f32 %v7259_v61, %v7422_v51  ;;  %v1871_v3 = vsub.f32 %v7254_v47, %v7422_v51  ;;  %v4992_v46 = vpop.eup %4991 }
 0x8d8   :  { %v3818_v15 = vadd.f32 %v4992_v46, %v4990_v62  ;;  %v3635_v62 = vsub.f32 %v7275_v29, %v7282_v63  ;;  %v3637_v46 = vsub.f32 %v7293_v33, %v7300_v5 }
 0x8d9   :  { %v1872_v16 = vmul.f32 1.442695, %v1870_v32  ;;  %v1874_v21 = vmul.f32 1.442695, %v1871_v3  ;;  %v3636_v32 = vsub.f32 %v7270_v54, %v7273_v40 }
 0x8da   :  { %3819 = vadd.xlane.f32.xlu1 %v3818_v15  ;;  %v4994_v60 = vpop.eup %4993  ;;  %v3651_v3 = vmul.f32 1.442695, %v3635_v62  ;;  %v3655_v15 = vmul.f32 1.442695, %v3637_v46  ;;  %v3644_v62 = vsub.f32 %v7341_v24, %v7348_v18 }
 0x8db   :  { %5005 = vpow2.f32 %v1872_v16  ;;  %v4996_v17 = vpop.eup %4995  ;;  %v3653_v16 = vmul.f32 1.442695, %v3636_v32 }
 0x8dc   :  { %5007 = vpow2.f32 %v1874_v21  ;;  %v3815_v14 = vadd.f32 %v4996_v17, %v4994_v60  ;;  %v3638_v21 = vsub.f32 %v7284_v25, %v7291_v39  ;;  %v3639_v17 = vsub.f32 %v7311_v43, %v7318_v56 }
 0x8dd   :  { %5009 = vpow2.f32 %v3651_v3  ;;  %v3643_v3 = vsub.f32 %v7354_v52, %v7358_v7 }
 0x8de   :  { %v4998_v31 = vpop.eup %4997  ;;  %3816 = vadd.xlane.f32.xlu0 %v3815_v14  ;;  %5011 = vpow2.f32 %v3653_v16  ;;  %v3657_v60 = vmul.f32 1.442695, %v3638_v21  ;;  %v3640_v14 = vsub.f32 %v7302_v13, %v7309_v57 }
 0x8df   :  { %v5000_v20 = vpop.eup %4999  ;;  %5013 = vpow2.f32 %v3655_v15 }
 0x8e0   :  { %v3824_v23 = vadd.f32 %v5000_v20, %v4998_v31  ;;  %5015 = vpow2.f32 %v3657_v60  ;;  %v3659_v31 = vmul.f32 1.442695, %v3639_v17  ;;  %v3661_v20 = vmul.f32 1.442695, %v3640_v14 }
 0x8e1   :  { %v3669_v60 = vmul.f32 1.442695, %v3644_v62  ;;  %v3667_v14 = vmul.f32 1.442695, %v3643_v3 }
 0x8e2   :  { %3825 = vadd.xlane.f32.xlu1 %v3824_v23  ;;  %v5002_v44 = vpop.eup %5001  ;;  %v3641_v23 = vsub.f32 %v7335_v53, %v7339_v27  ;;  %5017 = vpow2.f32 %v3659_v31  ;;  %v3646_v31 = vsub.f32 %v7360_v49, %v7367_v59 }
 0x8e3   :  { %v5004_v37 = vpop.eup %5003  ;;  %5019 = vpow2.f32 %v3661_v20 }
 0x8e4   :  { %v3821_v36 = vadd.f32 %v5004_v37, %v5002_v44  ;;  %v3642_v44 = vsub.f32 %v7320_v50, %v7327_v41 }
 0x8e6   :  { %3822 = vadd.xlane.f32.xlu0 %v3821_v36 }
 0x8e8   :  { %v5006_v34 = vpop.eup %5005 }
 0x8e9   :  { %v5008_v6 = vpop.eup %5007  ;;  %v1876_v2 = vsel %vm1702_vm6, %v5006_v34, 0.0 }
 0x8ea   :  { %v1877_v26 = vsel %vm1702_vm6, %v5008_v6, 0.0  ;;  %v5010_v34 = vpop.eup %5009  ;;  %v3663_v6 = vmul.f32 1.442695, %v3641_v23 }
 0x8eb   :  { %v1878_v1 = vadd.f32 %v1877_v26, %v1876_v2  ;;  %v5012_v26 = vpop.eup %5011 }
 0x8ec   :  { %5021 = vpow2.f32 %v3663_v6  ;;  %v5014_v46 = vpop.eup %5013  ;;  %v3673_v6 = vmul.f32 1.442695, %v3646_v31 }
 0x8ed   :  { %1879 = vadd.xlane.f32.xlu0 %v1878_v1  ;;  %v3665_v1 = vmul.f32 1.442695, %v3642_v44  ;;  %v5016_v17 = vpop.eup %5015 }
 0x8ef   :  { %v5018_v44 = vpop.eup %5017 }
 0x93a   :  { %v3784_v37 = vpop.xlane.xlu1 %3783 }
 0x93b   :  { %v3828_v32 = vadd.f32 %v5012_v26, %v3784_v37  ;;  %v3645_v37 = vsub.f32 %v7373_v45, %v7377_v30 }
 0x93d   :  { %v3781_v36 = vpop.xlane.xlu0 %3780 }
 0x93e   :  { %v3827_v2 = vadd.f32 %v5010_v34, %v3781_v36  ;;  %v5020_v34 = vpop.eup %5019 }
 0x93f   :  { %v3790_v16 = vpop.xlane.xlu1 %3789  ;;  %v5022_v62 = vpop.eup %5021 }
 0x940   :  { %5023 = vlog2.f32 %v3827_v2  ;;  %v3830_v20 = vadd.f32 %v5016_v17, %v3790_v16  ;;  %v3647_v17 = vsub.f32 %v7392_v19, %v7395_v35 }
 0x941   :  { %v3787_v21 = vpop.xlane.xlu0 %3786  ;;  %5025 = vpow2.f32 %v3665_v1  ;;  %v3671_v1 = vmul.f32 1.442695, %v3645_v37  ;;  %v3950_v37 = vadd.f32 %v6758_v0, %v6770_v28  ;;  %v3649_v0 = vsub.f32 %v7410_v58, %v7413_v42 }
 0x942   :  { %v3829_v15 = vadd.f32 %v5014_v46, %v3787_v21  ;;  %5027 = vlog2.f32 %v3828_v32  ;;  %v3648_v32 = vsub.f32 %v7379_v38, %v7386_v48 }
 0x944   :  { %5029 = vlog2.f32 %v3829_v15 }
 0x945   :  { %5031 = vpow2.f32 %v3669_v60  ;;  %v3796_v23 = vpop.xlane.xlu1 %3795 }
 0x946   :  { %5033 = vpow2.f32 %v3667_v14  ;;  %v3832_v26 = vadd.f32 %v5020_v34, %v3796_v23 }
 0x947   :  { %v3793_v36 = vpop.xlane.xlu0 %3792  ;;  %5035 = vlog2.f32 %v3830_v20  ;;  %v3677_v20 = vmul.f32 1.442695, %v3648_v32 }
 0x948   :  { %v3831_v2 = vadd.f32 %v5018_v44, %v3793_v36  ;;  %v3963_v44 = vadd.f32 %v7722_v55, %v7723_v4  ;;  %v3951_v55 = vadd.f32 %v3950_v37, %v6764_v10  ;;  %v3679_v37 = vmul.f32 1.442695, %v3649_v0 }
 0x94a   :  { %5037 = vlog2.f32 %v3831_v2 }
 0x94b   :  { %5039 = vpow2.f32 %v3673_v6  ;;  %v3802_v3 = vpop.xlane.xlu1 %3801 }
 0x94c   :  { %5041 = vlog2.f32 %v3832_v26  ;;  %v3964_v26 = vadd.f32 %v3963_v44, %v7721_v8 }
 0x94d   :  { %v5024_v46 = vpop.eup %5023  ;;  %5043 = vpow2.f32 %v3671_v1  ;;  %v3675_v1 = vmul.f32 1.442695, %v3647_v17 }
 0x94e   :  { %v5026_v21 = vpop.eup %5025  ;;  %v3844_v23 = vmul.f32 0.6931472, %v5024_v46 }
 0x94f   :  { %v3799_v16 = vpop.xlane.xlu0 %3798  ;;  %v5028_v60 = vpop.eup %5027  ;;  %v3834_v14 = vadd.f32 %v5026_v21, %v3802_v3 }
 0x950   :  { %v3833_v15 = vadd.f32 %v5022_v62, %v3799_v16  ;;  %v3846_v36 = vmul.f32 0.6931472, %v5028_v60  ;;  %v3650_v62 = vsub.f32 %v7397_v9, %v7404_v12  ;;  %v3875_v3 = vadd.f32 %v3844_v23, %v7282_v63  ;;  %v7727_v23 = vld [vmem:[#allocation36_spill] sm:$0xff] }
 0x951   :  { %v5030_v31 = vpop.eup %5029  ;;  %v3965_v60 = vadd.f32 %v3964_v26, %v7720_v11  ;;  %v3952_v44 = vadd.f32 %v3951_v55, %v7727_v23 }
 0x952   :  { %5045 = vlog2.f32 %v3833_v15  ;;  %v3848_v34 = vmul.f32 0.6931472, %v5030_v31  ;;  %v5032_v2 = vpop.eup %5031  ;;  %v3876_v16 = vadd.f32 %v3846_v36, %v7273_v40  ;;  %v3681_v17 = vmul.f32 1.442695, %v3650_v62 }
 0x953   :  { %v3808_v6 = vpop.xlane.xlu1 %3807  ;;  %5047 = vlog2.f32 %v3834_v14  ;;  %v5034_v32 = vpop.eup %5033  ;;  %v3891_v63 = vsub.f32 %v3875_v3, %v7275_v29 }
 0x954   :  { %5049 = vpow2.f32 %v3677_v20  ;;  %v5036_v46 = vpop.eup %5035  ;;  %v3836_v28 = vadd.f32 %v5032_v2, %v3808_v6  ;;  %v3877_v8 = vadd.f32 %v3848_v34, %v7300_v5  ;;  %v3892_v5 = vsub.f32 %v3876_v16, %v7270_v54  ;;  %v7728_v34 = vld [vmem:[#allocation41_spill] sm:$0xff]  ;;  %v7730_v16 = vld [vmem:[#allocation39_spill] sm:$0xff] }
 0x955   :  { %5051 = vpow2.f32 %v3675_v1  ;;  %v3850_v14 = vmul.f32 0.6931472, %v5036_v46  ;;  %v3966_v11 = vadd.f32 %v3965_v60, %v7728_v34  ;;  %v3907_v2 = vsel %vm1834_vm5, %v3891_v63, 0.0  ;;  %v7731_v63 = vld [vmem:[#allocation33_spill] sm:$0xff] }
 0x956   :  { %v3893_v36 = vsub.f32 %v3877_v8, %v7293_v33  ;;  %v1867_v54 = vsub.f32 %v7419_v22, %v7422_v51  ;;  %v3908_v55 = vsel %vm1834_vm5, %v3892_v5, 0.0 }
 0x957   :  { %v3805_v4 = vpop.xlane.xlu0 %3804  ;;  %v5038_v15 = vpop.eup %5037  ;;  %v3878_v26 = vadd.f32 %v3850_v14, %v7291_v39  ;;  %v3967_v8 = vadd.f32 %v3966_v11, %v7730_v16  ;;  %v3909_v39 = vadd.f32 %v3908_v55, %v3907_v2  ;;  %v7733_v11 = vld [vmem:[#allocation34_spill] sm:$0xff] }
 0x958   :  { %v3835_v21 = vadd.f32 %v5034_v32, %v3805_v4  ;;  %v3852_v31 = vmul.f32 0.6931472, %v5038_v15  ;;  %v5040_v20 = vpop.eup %5039  ;;  %v7729_v32 = vld [vmem:[#allocation35_spill] sm:$0xff]  ;;  %v3910_v0 = vsel %vm1834_vm5, %v3893_v36, 0.0 }
 0x959   :  { %v5042_v40 = vpop.eup %5041  ;;  %v3953_v3 = vadd.f32 %v3952_v44, %v7729_v32  ;;  %v7734_v32 = vld [vmem:[#allocation38_spill] sm:$0xff] }
 0x95a   :  { %5053 = vlog2.f32 %v3835_v21  ;;  %v5044_v29 = vpop.eup %5043  ;;  %v3879_v1 = vadd.f32 %v3852_v31, %v7318_v56  ;;  %v3854_v33 = vmul.f32 0.6931472, %v5042_v40  ;;  %v3894_v21 = vsub.f32 %v3878_v26, %v7284_v25 }
 0x95b   :  { %v3814_v10 = vpop.xlane.xlu1 %3813  ;;  %5055 = vlog2.f32 %v3836_v28  ;;  %v3954_v14 = vadd.f32 %v3953_v3, %v7731_v63  ;;  %v1868_v31 = vmul.f32 1.442695, %v1867_v54 }
 0x95c   :  { %5057 = vpow2.f32 %v3681_v17  ;;  %v3838_v6 = vadd.f32 %v5040_v20, %v3814_v10  ;;  %v3895_v15 = vsub.f32 %v3879_v1, %v7311_v43  ;;  %v3911_v10 = vadd.f32 %v3910_v0, %v3909_v39 }
 0x95d   :  { %5059 = vpow2.f32 %v3679_v37  ;;  %v3880_v20 = vadd.f32 %v3854_v33, %v7309_v57  ;;  %v7732_v37 = vld [vmem:[#allocation40_spill] sm:$0xff]  ;;  %v3912_v25 = vsel %vm1834_vm5, %v3894_v21, 0.0 }
 0x95e   :  { %5061 = vlog2.f32 %v3838_v6  ;;  %v3968_v40 = vadd.f32 %v3967_v8, %v7732_v37  ;;  %v3914_v43 = vsel %vm1834_vm5, %v3895_v15, 0.0  ;;  %v3955_v6 = vadd.f32 %v3954_v14, %v7733_v11 }
 0x95f   :  { %v5046_v62 = vpop.eup %5045  ;;  %v3811_v46 = vpop.xlane.xlu0 %3810  ;;  %v3913_v2 = vadd.f32 %v3912_v25, %v3911_v10 }
 0x960   :  { %v3856_v28 = vmul.f32 0.6931472, %v5046_v62  ;;  %v3837_v4 = vadd.f32 %v5044_v29, %v3811_v46  ;;  %v5048_v56 = vpop.eup %5047  ;;  %v3896_v29 = vsub.f32 %v3880_v20, %v7302_v13  ;;  %v3969_v3 = vadd.f32 %v3968_v40, %v7734_v32 }
 0x961   :  { %v5050_v17 = vpop.eup %5049  ;;  %v3858_v5 = vmul.f32 0.6931472, %v5048_v56  ;;  %v3915_v54 = vadd.f32 %v3914_v43, %v3913_v2 }
 0x962   :  { %5063 = vlog2.f32 %v3837_v4  ;;  %v3881_v23 = vadd.f32 %v3856_v28, %v7339_v27  ;;  %v5052_v36 = vpop.eup %5051  ;;  %v7735_v28 = vld [vmem:[#allocation32_spill] sm:$0xff]  ;;  %v3970_v56 = vrot.slane %v3969_v3, 4 }
 0x963   :  { %v3820_v60 = vpop.xlane.xlu1 %3819  ;;  %5065 = vpow2.f32 %v1868_v31  ;;  %v3882_v33 = vadd.f32 %v3858_v5, %v7327_v41  ;;  %v3956_v13 = vadd.f32 %v3955_v6, %v7735_v28 }
 0x964   :  { %v3840_v44 = vadd.f32 %v5050_v17, %v3820_v60  ;;  %v3897_v27 = vsub.f32 %v3881_v23, %v7335_v53  ;;  %v3916_v53 = vsel %vm1834_vm5, %v3896_v29, 0.0  ;;  %v3971_v23 = vadd.f32 %v3970_v56, %v3969_v3 }
 0x965   :  { %v3898_v21 = vsub.f32 %v3882_v33, %v7320_v50  ;;  %v3917_v15 = vadd.f32 %v3916_v53, %v3915_v54  ;;  %v3957_v17 = vrot.slane %v3956_v13, 4 }
 0x966   :  { %5067 = vlog2.f32 %v3840_v44  ;;  %v3918_v39 = vsel %vm1834_vm5, %v3897_v27, 0.0 }
 0x967   :  { %v5054_v34 = vpop.eup %5053  ;;  %v3817_v26 = vpop.xlane.xlu0 %3816  ;;  %v3919_v63 = vadd.f32 %v3918_v39, %v3917_v15  ;;  %v3920_v44 = vsel %vm1834_vm5, %v3898_v21, 0.0  ;;  %v3958_v5 = vadd.f32 %v3957_v17, %v3956_v13 }
 0x968   :  { %v5056_v57 = vpop.eup %5055  ;;  %v3860_v1 = vmul.f32 0.6931472, %v5054_v34  ;;  %v3839_v62 = vadd.f32 %v5052_v36, %v3817_v26  ;;  %v3972_v34 = vrot.slane %v3971_v23, 2 }
 0x969   :  { %v5058_v46 = vpop.eup %5057  ;;  %v3862_v4 = vmul.f32 0.6931472, %v5056_v57  ;;  %v3921_v36 = vadd.f32 %v3920_v44, %v3919_v63  ;;  %v3959_v57 = vrot.slane %v3958_v5, 2 }
 0x96a   :  { %v3883_v55 = vadd.f32 %v3860_v1, %v7358_v7  ;;  %5069 = vlog2.f32 %v3839_v62  ;;  %v5060_v8 = vpop.eup %5059 }
 0x96b   :  { %v3826_v0 = vpop.xlane.xlu1 %3825  ;;  %v5062_v41 = vpop.eup %5061  ;;  %v3884_v14 = vadd.f32 %v3862_v4, %v7348_v18  ;;  %v3960_v33 = vadd.f32 %v3959_v57, %v3958_v5 }
 0x96c   :  { %v3842_v16 = vadd.f32 %v5058_v46, %v3826_v0  ;;  %v3899_v60 = vsub.f32 %v3883_v55, %v7354_v52  ;;  %v3866_v40 = vmul.f32 0.6931472, %v5062_v41 }
 0x96d   :  { %v3900_v52 = vsub.f32 %v3884_v14, %v7341_v24  ;;  %v3973_v24 = vadd.f32 %v3972_v34, %v3971_v23  ;;  %v3961_v53 = vrot.slane %v3960_v33, 1 }
 0x96e   :  { %5071 = vlog2.f32 %v3842_v16  ;;  %v3922_v37 = vsel %vm1834_vm5, %v3899_v60, 0.0  ;;  %v3886_v29 = vadd.f32 %v3866_v40, %v7367_v59 }
 0x96f   :  { %v5064_v7 = vpop.eup %5063  ;;  %v3823_v31 = vpop.xlane.xlu0 %3822  ;;  %v3923_v11 = vadd.f32 %v3922_v37, %v3921_v36  ;;  %v3924_v27 = vsel %vm1834_vm5, %v3900_v52, 0.0  ;;  %v3974_v28 = vrot.slane %v3973_v24, 1  ;;  %v3962_v15 = vadd.f32 %v3961_v53, %v3960_v33 }
 0x970   :  { %v3864_v10 = vmul.f32 0.6931472, %v5064_v7  ;;  %v3841_v20 = vadd.f32 %v5060_v8, %v3823_v31  ;;  %v5066_v25 = vpop.eup %5065 }
 0x971   :  { %v3925_v32 = vadd.f32 %v3924_v27, %v3923_v11  ;;  %v3975_v21 = vadd.f32 %v3974_v28, %v3973_v24  ;;  %v7529_v31 = vmul.f32 0.015625, %v3962_v15 }
 0x972   :  { %v3885_v50 = vadd.f32 %v3864_v10, %v7377_v30  ;;  %5073 = vlog2.f32 %v3841_v20 }
 0x973   :  { %v5068_v18 = vpop.eup %5067  ;;  %v7526_v63 = vmul.f32 0.015625, %v3975_v21  ;;  %v3978_v23 = vmul.f32 %v7529_v31, %v7529_v31 }
 0x974   :  { %v3901_v43 = vsub.f32 %v3885_v50, %v7373_v45  ;;  %v3870_v1 = vmul.f32 0.6931472, %v5068_v18  ;;  %v3902_v45 = vsub.f32 %v3886_v29, %v7360_v49 }
 0x976   :  { %v1880_v6 = vpop.xlane.xlu0 %1879  ;;  %v3926_v30 = vsel %vm1834_vm5, %v3901_v43, 0.0  ;;  %v3888_v59 = vadd.f32 %v3870_v1, %v7386_v48  ;;  %v3928_v13 = vsel %vm1834_vm5, %v3902_v45, 0.0 }
 0x977   :  { %v1881_v2 = vadd.f32 %v5066_v25, %v1880_v6  ;;  %v5070_v26 = vpop.eup %5069  ;;  %v3927_v46 = vadd.f32 %v3926_v30, %v3925_v32 }
 0x978   :  { %v3868_v62 = vmul.f32 0.6931472, %v5070_v26  ;;  %v3904_v39 = vsub.f32 %v3888_v59, %v7379_v38 }
 0x979   :  { %5075 = vlog2.f32 %v1881_v2  ;;  %v3929_v8 = vadd.f32 %v3928_v13, %v3927_v46 }
 0x97a   :  { %v3887_v54 = vadd.f32 %v3868_v62, %v7395_v35  ;;  %v3932_v60 = vsel %vm1834_vm5, %v3904_v39, 0.0 }
 0x97b   :  { %v5072_v3 = vpop.eup %5071 }
 0x97c   :  { %v3903_v55 = vsub.f32 %v3887_v54, %v7392_v19  ;;  %v3874_v0 = vmul.f32 0.6931472, %v5072_v3 }
 0x97e   :  { %v3930_v4 = vsel %vm1834_vm5, %v3903_v55, 0.0  ;;  %v3890_v49 = vadd.f32 %v3874_v0, %v7404_v12 }
 0x97f   :  { %v5074_v16 = vpop.eup %5073  ;;  %v3931_v56 = vadd.f32 %v3930_v4, %v3929_v8 }
 0x980   :  { %v3872_v35 = vmul.f32 0.6931472, %v5074_v16  ;;  %v3906_v41 = vsub.f32 %v3890_v49, %v7397_v9  ;;  %v3979_v9 = vmul.f32 %v7526_v63, %v7526_v63 }
 0x981   :  { %v3933_v17 = vadd.f32 %v3932_v60, %v3931_v56 }
 0x982   :  { %v3889_v48 = vadd.f32 %v3872_v35, %v7413_v42  ;;  %v3936_v10 = vsel %vm1834_vm5, %v3906_v41, 0.0  ;;  %v3982_v37 = vsel %vm395_vm4, %v3979_v9, %v3978_v23 }
 0x983   :  { %v3984_v40 = vsel %vm1702_vm6, %v3982_v37, 0.0 }
 0x984   :  { %v3905_v19 = vsub.f32 %v3889_v48, %v7410_v58 }
 0x986   :  { %v5076_v7 = vpop.eup %5075  ;;  %v3934_v38 = vsel %vm1834_vm5, %v3905_v19, 0.0 }
 0x987   :  { %v1883_v14 = vmul.f32 0.6931472, %v5076_v7  ;;  %v3935_v12 = vadd.f32 %v3934_v38, %v3933_v17 }
 0x989   :  { %v1884_v42 = vadd.f32 %v1883_v14, %v7422_v51  ;;  %v3937_v20 = vadd.f32 %v3936_v10, %v3935_v12 }
 0x98b   :  { %v1885_v58 = vsub.f32 %v1884_v42, %v7419_v22  ;;  %3938 = vadd.xlane.f32.xlu0 %v3937_v20 }
 0x98d   :  { %v1887_v44 = vsel %vm1886_vm0, %v1885_v58, 0.0 }
 0x98e   :  { %1888 = vadd.xlane.f32.xlu1 %v1887_v44 }
 0x992   :  { %3985 = vadd.xlane.f32.xlu1 %v3984_v40 }
 0x9a1   :  { %1830 = vrot.lane.b32.xlu0 %v7259_v61, %s5192_s21 }
 0x9a3   :  { %1832 = vrot.lane.b32.xlu1 %v7254_v47, %s5192_s21 }
 0x9a4   :  { %5110 = shalt.err (!%p5107_p9)
}
 0x9a5   :  { %4013 = dma.vmem_to_hbm [thread:$0]  %s4011_s27, 32, %s7595_s20, [#allocation4]  }
 0x9a6   :  { %s5194_s29 = smov [#allocation9]  }
 0x9a7   :  { %s4043_s0 = sshll.u32 %s5194_s29, 4  ;;  %s4044_s0 = int_to_ptr.vmem [resolvable:$true] %s4043_s0 }
 0x9a8   :  { %s5119_s6 = scalar_lea.vmem %s4044_s0, 2048  ;;  %p5124_p11 = scmp.lt.s32.totalorder %s4044_s0, %s4044_s0 }
 0x9a9   :  { %p5120_p10 = scmp.ne.s32.totalorder %s4044_s0, %s5119_s6  ;;  %p5125_p12 = scmp.lt.s32.totalorder %s5119_s6, %s5119_s6 }
 0x9ab   :  { %p5126_p13 = por %p5125_p12, %p5124_p11 }
 0x9ad   :  { %p5127_p0 = pnand %p5126_p13, %p5120_p10 }
 0x9af   :  { %5130 = shalt.err (!%p5127_p0)
}
 0x9b0   :  { %4049 = dma.vmem_to_hbm [thread:$0]  %s4044_s0, 2048, %s7599_s24, [#allocation10], %s5188_s28, %s5188_s28, %s5189_s8   ;;  %v5195_v50 = vmov 1983009808   ;;  %v7736_v11 = vlaneseq  ;;  %vm1856_vm1 = vcmask 1043458   ;;  %vm1858_vm3 = vcmask 5124  }
 0x9b1   :  { %v1841_v5 = vunpack.c.l.s4 %v5195_v50  ;;  %vm1857_vm2 = vmor %vm1856_vm1, %vm1702_vm6  ;;  %s5196_s20 = smov [#allocation6]   ;;  %s5197_s18 = smov [#allocation8]  }
 0x9b2   :  { %v1844_v6 = vshrl.u32 %v7736_v11, 7  ;;  %s4022_s24 = sshll.u32 %s5196_s20, 4  ;;  %s4031_s30 = sshll.u32 %s5197_s18, 4  ;;  %vm1859_vm7 = vmor %vm1858_vm3, %vm1857_vm2  ;;  %s4023_s24 = int_to_ptr.vmem [resolvable:$true] %s4022_s24  ;;  %s4032_s30 = int_to_ptr.vmem [resolvable:$true] %s4031_s30 }
 0x9b3   :  { %v1842_v34 = vunpack.c.0.s8 %v1841_v5  ;;  %s5139_s15 = scalar_lea.vmem %s4023_s24, 96  ;;  %p5144_p2 = scmp.lt.s32.totalorder %s4023_s24, %s4023_s24 }
 0x9b4   :  { %p5140_p1 = scmp.ne.s32.totalorder %s4023_s24, %s5139_s15  ;;  %p5145_p3 = scmp.lt.s32.totalorder %s5139_s15, %s5139_s15 }
 0x9b5   :  { %v1845_v30 = vsub.s32 %v1842_v34, %v1844_v6 }
 0x9b6   :  { %p5146_p4 = por %p5145_p3, %p5144_p2 }
 0x9b8   :  { %p5147_p5 = pnand %p5146_p4, %p5140_p1 }
 0xa14   :  { %v3939_v47 = vpop.xlane.xlu0 %3938 }
 0xa15   :  { %v3940_v61 = vrot.slane %v3939_v47, 4 }
 0xa17   :  { %v1889_v51 = vpop.xlane.xlu1 %1888  ;;  %v3941_v52 = vadd.f32 %v3940_v61, %v3939_v47 }
 0xa18   :  { %v1890_v36 = vrot.slane %v1889_v51, 4  ;;  %v1831_v57 = vpop.permute.xlu0 %1830 }
 0xa19   :  { %v3942_v25 = vrot.slane %v3941_v52, 2  ;;  %v1837_v24 = vsel %vm1834_vm5, %v7419_v22, %v1831_v57 }
 0xa1a   :  { %v1891_v43 = vadd.f32 %v1890_v36, %v1889_v51 }
 0xa1b   :  { %v3986_v18 = vpop.xlane.xlu1 %3985  ;;  %v3943_v26 = vadd.f32 %v3942_v25, %v3941_v52 }
 0xa1c   :  { %v1892_v29 = vrot.slane %v1891_v43, 2  ;;  %v3987_v2 = vadd.f32 1e-24, %v3986_v18 }
 0xa1d   :  { %v3944_v62 = vrot.slane %v3943_v26, 1 }
 0xa1e   :  { %5077 = vrsqrt.f32 %v3987_v2  ;;  %v1893_v27 = vadd.f32 %v1892_v29, %v1891_v43 }
 0xa1f   :  { %v1833_v1 = vpop.permute.xlu1 %1832  ;;  %v3945_v59 = vadd.f32 %v3944_v62, %v3943_v26 }
 0xa20   :  { %v1835_v32 = vsel %vm1834_vm5, %v1831_v57, %v1833_v1  ;;  %v1894_v3 = vrot.slane %v1893_v27, 1  ;;  %v1853_v46 = vrot.slane %v1833_v1, %v1845_v30 }
 0xa21   :  { %v1839_v45 = vcombine.low %v1837_v24, %v1835_v32 }
 0xa22   :  { %v1895_v54 = vadd.f32 %v1894_v3, %v1893_v27 }
 0xa23   :  { %v1846_v33 = vrot.slane %v1839_v45, %v1845_v30 }
 0xa24   :  { %4794 = vpush %v1895_v54 }
 0xa25   :  { %v1854_v55 = vcombine.low %v1846_v33, %v1853_v46  ;;  %4796 = vpush %v3945_v59 }
 0xa27   :  { %1860 = vst.msk [vmem:[#allocation6] sm:$0x3f] %vm1859_vm7, %v1854_v55 }
 0xa28   :  { %5150 = shalt.err (!%p5147_p5)
}
 0xa29   :  { %4025 = dma.vmem_to_hbm [thread:$0]  %s4023_s24, 96, %s7597_s22, [#allocation7]  }
 0xa2a   :  { %s5159_s12 = scalar_lea.vmem %s4032_s30, 2048  ;;  %p5164_p7 = scmp.lt.s32.totalorder %s4032_s30, %s4032_s30 }
 0xa2b   :  { %p5160_p6 = scmp.ne.s32.totalorder %s4032_s30, %s5159_s12  ;;  %p5165_p8 = scmp.lt.s32.totalorder %s5159_s12, %s5159_s12 }
 0xa2d   :  { %p5166_p9 = por %p5165_p8, %p5164_p7 }
 0xa2f   :  { %p5167_p10 = pnand %p5166_p9, %p5160_p6 }
 0xa31   :  { %5170 = shalt.err (!%p5167_p10)
}
 0xa32   :  { %4037 = dma.vmem_to_hbm [thread:$0]  %s4032_s30, 2048, %s7598_s23, [#allocation7], %s5188_s28, %s5188_s28, %s5189_s8   ;;  %v5078_v22 = vpop.eup %5077  ;;  %vm4002_vm6 = vcmask 8192  }
 0xa33   :  { %v3990_v0 = vrot.slane %v5078_v22, 1  ;;  %v3993_v13 = vmul.f32 %v5078_v22, %v7529_v31 }
 0xa35   :  { %v3994_v28 = vmul.f32 %v3990_v0, %v7526_v63 }
 0xa37   :  { %v3997_v4 = vrot.slane %v3994_v28, 7 }
 0xa39   :  { %v3998_v16 = vsel %vm395_vm4, %v3997_v4, %v3993_v13 }
 0xa3a   :  { %4000 = vst [vmem:[%s7600_s25] sm:$0x3] %v3998_v16 }
 0xa55   :  { %s4795_s3 = spop %4794 }
 0xa56   :  { %v1897_v8 = vstv %s4795_s3  ;;  %s4797_s13 = spop %4796 }
 0xa57   :  { %v1899_v53 = vmul.f32 0.5, %v1897_v8  ;;  %v3947_v39 = vstv %s4797_s13 }
 0xa58   :  { %v3949_v49 = vmul.f32 0.0078125, %v3947_v39 }
 0xa5a   :  { %v4001_v35 = vsel %vm1834_vm5, %v1899_v53, %v3949_v49 }
 0xa5b   :  { %4003 = vst.msk [vmem:[%s7601_s26] sm:$0x1] %vm4002_vm6, %v4001_v35 }
 0xa5c   :  { %5181 = dma.done.wait [#allocation4], 32  }
 0xa5d   :  { %5182 = vsyncadd [#allocation4], 4294967264 }
 0xa5e   :  { %5183 = dma.done.wait [#allocation7], 2144  }
 0xa5f   :  { %5184 = vsyncadd [#allocation7], 4294965152 }
 0xa60   :  { %5185 = dma.done.wait [#allocation10], 2048  }
 0xa61   :  { %5186 = vsyncadd [#allocation10], 4294965248 }
 0xa62   :  { %4072 = vsyncpa [#allocation3], 1 }
 0xa63   :  { %4073 = vsyncpa [#allocation4], 1 }
 0xa64   :  { %4074 = vsyncpa [#allocation7], 1 }
 0xa65   :  { %4075 = vsyncpa [#allocation10], 1 }

</bundles_post_ra>
